<compile_context>
chip_gen: v6e
topology: v6e:2x2x1
jax: 0.10.0
libtpu: 0.0.40
codegen_flags: <defaults>
</compile_context>

<pallas_src>
import functools

import jax
import jax.numpy as jnp
from jax.experimental import pallas as pl
from jax.experimental.pallas import tpu as pltpu

# ---------------- config (scaled-down analogs of the PyTorch module) ----------------
VOCAB      = 48        # analog of 21128 (ids >= VOCAB are soft-prompt tokens)
VOCAB_PAD  = 128       # lane-dense padded vocab width for the generator output
PROMPT_LEN = 16        # analog of 100
MASK_ID    = 3         # analog of 103 ([MASK])
HIDDEN     = 32        # analog of 768
N_HEADS    = 4
HEAD_DIM   = HIDDEN // N_HEADS
FFN        = 4 * HIDDEN
N_LAYERS   = 2
MAX_POS    = 16
LN_EPS     = 1e-12
NEG_INF    = -1e30


# ---------------------------------- kernel helpers ----------------------------------
def _gelu(x):
    # TODO(synk): PyTorch nn.GELU default is the exact erf form; tanh approximation used
    # in-kernel for guaranteed Mosaic lowering (small systematic deviation).
    return 0.5 * x * (1.0 + jnp.tanh(0.7978845608028654 * (x + 0.044715 * x * x * x)))


def _layernorm(h, g, b):
    """LayerNorm over the last dim; h:[S,H] f32, g,b:[1,H]."""
    mu = jnp.mean(h, axis=-1, keepdims=True)
    var = jnp.mean(jnp.square(h - mu), axis=-1, keepdims=True)
    return (h - mu) * jax.lax.rsqrt(var + LN_EPS) * g + b


# -------------------------- single fused encoder kernel ------------------------------
def _encoder_kernel(
    # per-batch activations / mask (blocked over grid axis 0 = batch)
    base_ref, praw_ref, psel_ref, bias_ref,
    # prompt MLP + embedding LN
    pw_ref, pb_ref, eg_ref, eb_ref,
    # stacked per-layer weights (leading dim = N_LAYERS, head-major where relevant)
    wq_ref, bq_ref, wk_ref, bk_ref, wv_ref, bv_ref,
    wo_ref, bo_ref, g1_ref, b1_ref,
    wi_ref, bi_ref, wf_ref, bf_ref, g2_ref, b2_ref,
    # generator head (lane-padded to VOCAB_PAD)
    gw_ref, gb_ref,
    # output
    out_ref):
    scale = 1.0 / (HEAD_DIM ** 0.5)

    # --- prompt embedding MLP: GELU(p_raw @ W + b) ---
    p_emb = _gelu(
        jnp.dot(praw_ref[...], pw_ref[...], preferred_element_type=jnp.float32)
        + pb_ref[...])

    # --- select prompt vs word embeddings (base already holds word + pos + type), LN ---
    emb = base_ref[...] + psel_ref[...] * p_emb
    h = _layernorm(emb, eg_ref[...], eb_ref[...])        # [S, H] f32 (vreg resident)

    key_bias = bias_ref[0]                               # [1, S] additive key mask

    # --- encoder layers (statically unrolled; all intermediates live in vregs) ---
    for l in range(N_LAYERS):
        attn = None
        for hd in range(N_HEADS):
            q = jnp.dot(h, wq_ref[l, hd],
                        preferred_element_type=jnp.float32) + bq_ref[l, hd]   # [S, D]
            k = jnp.dot(h, wk_ref[l, hd],
                        preferred_element_type=jnp.float32) + bk_ref[l, hd]   # [S, D]
            v = jnp.dot(h, wv_ref[l, hd],
                        preferred_element_type=jnp.float32) + bv_ref[l, hd]   # [S, D]
            s = jax.lax.dot_general(q, k, (((1,), (1,)), ((), ())),
                                    preferred_element_type=jnp.float32) * scale
            s = s + key_bias
            s = s - jnp.max(s, axis=-1, keepdims=True)
            p = jnp.exp(s)
            p = p * pl.reciprocal(jnp.sum(p, axis=-1, keepdims=True), approx=True)
            ctx = jnp.dot(p, v, preferred_element_type=jnp.float32)           # [S, D]
            # fold the output projection into the head loop (accumulate in vregs)
            head_out = jnp.dot(ctx, wo_ref[l, hd],
                               preferred_element_type=jnp.float32)            # [S, H]
            attn = head_out if attn is None else attn + head_out

        # add & LN
        h = _layernorm(attn + bo_ref[l] + h, g1_ref[l], b1_ref[l])

        # GELU FFN + add & LN (intermediate never leaves the kernel)
        inter = _gelu(jnp.dot(h, wi_ref[l], preferred_element_type=jnp.float32)
                      + bi_ref[l])
        ffn_out = (jnp.dot(inter, wf_ref[l], preferred_element_type=jnp.float32)
                   + bf_ref[l])
        h = _layernorm(ffn_out + h, g2_ref[l], b2_ref[l])

    # --- generator (vocab) projection, lane-dense 128-wide output ---
    logits = jnp.dot(h, gw_ref[...], preferred_element_type=jnp.float32) + gb_ref[...]
    out_ref[...] = logits.astype(out_ref.dtype)


def encoder_forward(params, base, p_raw, psel_b, mask_bias, batch, seq):
    """Run the whole encoder + generator head in a single pallas_call, grid over batch."""
    m = batch * seq

    act_spec = pl.BlockSpec((seq, HIDDEN), lambda b: (b, 0))
    bias_spec = pl.BlockSpec((1, 1, seq), lambda b: (b, 0, 0))

    def wspec(arr):
        nd = arr.ndim
        return pl.BlockSpec(arr.shape, lambda b, _nd=nd: (0,) * _nd)  # resident weights

    weights = [
        params["prompt_w"], params["prompt_b"],
        params["emb_ln_g"], params["emb_ln_b"],
        params["wq"], params["bq"], params["wk"], params["bk"],
        params["wv"], params["bv"], params["wo"], params["bo"],
        params["ln1_g"], params["ln1_b"],
        params["wi"], params["bi"], params["wout"], params["bout"],
        params["ln2_g"], params["ln2_b"],
        params["gen_w"], params["gen_b"],
    ]

    return pl.pallas_call(
        _encoder_kernel,
        out_shape=jax.ShapeDtypeStruct((m, VOCAB_PAD), jnp.float32),
        grid_spec=pltpu.PrefetchScalarGridSpec(
            num_scalar_prefetch=0,
            grid=(batch,),
            in_specs=[act_spec, act_spec, act_spec, bias_spec]
                     + [wspec(w) for w in weights],
            out_specs=pl.BlockSpec((seq, VOCAB_PAD), lambda b: (b, 0)),
        ),
        compiler_params=pltpu.CompilerParams(
            dimension_semantics=("parallel",)),       # both TCs on v7x; no-op on v5e/v6e
    )(base, p_raw, psel_b, mask_bias, *weights)


# ------------------------------- parameter construction -----------------------------
def init_params(key):
    def nrm(k, shape, scale=0.02):
        return (jax.random.normal(k, shape, jnp.float32) * scale).astype(jnp.float32)

    keys = iter(jax.random.split(key, 40))

    gen_w = jnp.zeros((HIDDEN, VOCAB_PAD), jnp.float32)
    gen_w = gen_w.at[:, :VOCAB].set(nrm(next(keys), (HIDDEN, VOCAB)))

    return {
        "word_emb":   nrm(next(keys), (VOCAB, HIDDEN)),
        "pos_emb":    nrm(next(keys), (MAX_POS, HIDDEN)),
        "type_emb":   nrm(next(keys), (2, HIDDEN)),
        "emb_ln_g":   jnp.ones((1, HIDDEN), jnp.float32),
        "emb_ln_b":   jnp.zeros((1, HIDDEN), jnp.float32),
        "prompt_emb": nrm(next(keys), (PROMPT_LEN, HIDDEN)),
        "prompt_w":   nrm(next(keys), (HIDDEN, HIDDEN)),
        "prompt_b":   jnp.zeros((1, HIDDEN), jnp.float32),
        # generator head padded to a lane-dense 128-wide output slab
        "gen_w":      gen_w,
        "gen_b":      jnp.zeros((1, VOCAB_PAD), jnp.float32),
        # stacked per-layer weights; Q/K/V/O stored head-major so the kernel never does
        # lane-offset column slicing of activations or weights.
        "wq":    nrm(next(keys), (N_LAYERS, N_HEADS, HIDDEN, HEAD_DIM)),
        "bq":    jnp.zeros((N_LAYERS, N_HEADS, 1, HEAD_DIM), jnp.float32),
        "wk":    nrm(next(keys), (N_LAYERS, N_HEADS, HIDDEN, HEAD_DIM)),
        "bk":    jnp.zeros((N_LAYERS, N_HEADS, 1, HEAD_DIM), jnp.float32),
        "wv":    nrm(next(keys), (N_LAYERS, N_HEADS, HIDDEN, HEAD_DIM)),
        "bv":    jnp.zeros((N_LAYERS, N_HEADS, 1, HEAD_DIM), jnp.float32),
        "wo":    nrm(next(keys), (N_LAYERS, N_HEADS, HEAD_DIM, HIDDEN)),
        "bo":    jnp.zeros((N_LAYERS, 1, HIDDEN), jnp.float32),
        "ln1_g": jnp.ones((N_LAYERS, 1, HIDDEN), jnp.float32),
        "ln1_b": jnp.zeros((N_LAYERS, 1, HIDDEN), jnp.float32),
        "wi":    nrm(next(keys), (N_LAYERS, HIDDEN, FFN)),
        "bi":    jnp.zeros((N_LAYERS, 1, FFN), jnp.float32),
        "wout":  nrm(next(keys), (N_LAYERS, FFN, HIDDEN)),
        "bout":  jnp.zeros((N_LAYERS, 1, HIDDEN), jnp.float32),
        "ln2_g": jnp.ones((N_LAYERS, 1, HIDDEN), jnp.float32),
        "ln2_b": jnp.zeros((N_LAYERS, 1, HIDDEN), jnp.float32),
    }


# ----------------------------------- forward pass -----------------------------------
def bert_model_forward(params, x, label=None):
    """x: int32 [B, S] token ids; ids >= VOCAB are soft-prompt tokens."""
    B, S = x.shape
    x_mask = x                                     # `copy.deepcopy(x)` before mutation
    prompt_position = x >= VOCAB                   # x >= 21128

    bert_ids   = jnp.where(prompt_position, 0, x)                 # x[prompt_position] = 0
    # Mirrors the original `copy_x[...] - 21127` (first soft-prompt id -> index 1).
    prompt_ids = jnp.where(prompt_position, x - (VOCAB - 1), 0)

    # embedding gathers stay in plain JAX (no clean tiny-scale Pallas equivalent)
    word_e = jnp.take(params["word_emb"], bert_ids, axis=0).reshape(B * S, HIDDEN)
    p_raw  = jnp.take(params["prompt_emb"], prompt_ids, axis=0).reshape(B * S, HIDDEN)

    # lane-dense prompt selector, pre-broadcast to H lanes
    psel   = prompt_position.astype(jnp.float32).reshape(B * S, 1)
    psel_b = jnp.broadcast_to(psel, (B * S, HIDDEN))

    # position + token-type(=0) embeddings folded into the non-prompt base term
    pte = params["pos_emb"][:S] + params["type_emb"][0][None, :]
    pte = jnp.broadcast_to(pte[None], (B, S, HIDDEN)).reshape(B * S, HIDDEN)
    base = (1.0 - psel) * word_e + pte             # word contribution zeroed at prompts

    # attention_mask = (x_mask != 103) & (x_mask != 0), as additive key bias [B,1,S]
    attn_mask = (x_mask != MASK_ID) & (x_mask != 0)
    mask_bias = jnp.where(attn_mask, 0.0, NEG_INF).astype(jnp.float32)[:, None, :]

    logits_pad = encoder_forward(params, base, p_raw, psel_b, mask_bias, B, S)
    logits = logits_pad[:, :VOCAB].reshape(B, S, VOCAB)

    if label is not None:
        # nn.CrossEntropyLoss() over flattened (B*S, V) logits vs (B*S,) labels (mean).
        flat = logits.reshape(-1, VOCAB)
        logp = flat - jax.scipy.special.logsumexp(flat, axis=-1, keepdims=True)
        nll = -jnp.take_along_axis(logp, label.reshape(-1, 1), axis=-1)
        return jnp.mean(nll)
    return logits


# -------------------------------------- driver ---------------------------------------
if __name__ == "__main__":
    root = jax.random.PRNGKey(0)
    pkey, xkey = jax.random.split(root)
    params = init_params(pkey)

    B, S = 2, 8
    x = jax.random.randint(xkey, (B, S), 4, VOCAB)     # ordinary vocab ids
    x = x.at[:, 0].set(VOCAB + 1)                      # soft-prompt tokens (>= VOCAB)
    x = x.at[:, 1].set(VOCAB + 3)
    x = x.at[0, 4].set(MASK_ID)                        # [MASK] analog (masked out of attn)
    x = x.at[1, 7].set(0)                              # pad (masked out of attn)
    x = x.astype(jnp.int32)

    fwd = jax.jit(functools.partial(bert_model_forward, params))
    logits = fwd(x)
    jax.block_until_ready(logits)
    assert logits.shape == (B, S, VOCAB) and logits.dtype == jnp.float32
    assert bool(jnp.all(jnp.isfinite(logits)))
    print("KERNEL_OK")
</pallas_src>

<mosaic_0001>
module attributes {stable_mosaic.version = 11 : i64} {
  func.func @_encoder_kernel(%arg0: i32, %arg1: memref<8x32xf32, #tpu.memory_space<vmem>>, %arg2: memref<8x32xf32, #tpu.memory_space<vmem>>, %arg3: memref<8x32xf32, #tpu.memory_space<vmem>>, %arg4: memref<1x1x8xf32, #tpu.memory_space<vmem>>, %arg5: memref<32x32xf32, #tpu.memory_space<vmem>>, %arg6: memref<1x32xf32, #tpu.memory_space<vmem>>, %arg7: memref<1x32xf32, #tpu.memory_space<vmem>>, %arg8: memref<1x32xf32, #tpu.memory_space<vmem>>, %arg9: memref<2x4x32x8xf32, #tpu.memory_space<vmem>>, %arg10: memref<2x4x1x8xf32, #tpu.memory_space<vmem>>, %arg11: memref<2x4x32x8xf32, #tpu.memory_space<vmem>>, %arg12: memref<2x4x1x8xf32, #tpu.memory_space<vmem>>, %arg13: memref<2x4x32x8xf32, #tpu.memory_space<vmem>>, %arg14: memref<2x4x1x8xf32, #tpu.memory_space<vmem>>, %arg15: memref<2x4x8x32xf32, #tpu.memory_space<vmem>>, %arg16: memref<2x1x32xf32, #tpu.memory_space<vmem>>, %arg17: memref<2x1x32xf32, #tpu.memory_space<vmem>>, %arg18: memref<2x1x32xf32, #tpu.memory_space<vmem>>, %arg19: memref<2x32x128xf32, #tpu.memory_space<vmem>>, %arg20: memref<2x1x128xf32, #tpu.memory_space<vmem>>, %arg21: memref<2x128x32xf32, #tpu.memory_space<vmem>>, %arg22: memref<2x1x32xf32, #tpu.memory_space<vmem>>, %arg23: memref<2x1x32xf32, #tpu.memory_space<vmem>>, %arg24: memref<2x1x32xf32, #tpu.memory_space<vmem>>, %arg25: memref<32x128xf32, #tpu.memory_space<vmem>>, %arg26: memref<1x128xf32, #tpu.memory_space<vmem>>, %arg27: memref<8x128xf32, #tpu.memory_space<vmem>>) attributes {dimension_semantics = [#tpu.dimension_semantics<parallel>], iteration_bounds = array<i64: 2>, scalar_prefetch = 0 : i64, scratch_operands = 0 : i64, tpu.core_type = #tpu.core_type<tc>, window_params = [{transform_indices = @transform_0, window_bounds = array<i64: 8, 32>}, {transform_indices = @transform_1, window_bounds = array<i64: 8, 32>}, {transform_indices = @transform_2, window_bounds = array<i64: 8, 32>}, {transform_indices = @transform_3, window_bounds = array<i64: 1, 1, 8>}, {pipeline_mode = #tpu.pipeline_mode<synchronous>, transform_indices = @transform_4, window_bounds = array<i64: 32, 32>}, {pipeline_mode = #tpu.pipeline_mode<synchronous>, transform_indices = @transform_5, window_bounds = array<i64: 1, 32>}, {pipeline_mode = #tpu.pipeline_mode<synchronous>, transform_indices = @transform_6, window_bounds = array<i64: 1, 32>}, {pipeline_mode = #tpu.pipeline_mode<synchronous>, transform_indices = @transform_7, window_bounds = array<i64: 1, 32>}, {pipeline_mode = #tpu.pipeline_mode<synchronous>, transform_indices = @transform_8, window_bounds = array<i64: 2, 4, 32, 8>}, {pipeline_mode = #tpu.pipeline_mode<synchronous>, transform_indices = @transform_9, window_bounds = array<i64: 2, 4, 1, 8>}, {pipeline_mode = #tpu.pipeline_mode<synchronous>, transform_indices = @transform_10, window_bounds = array<i64: 2, 4, 32, 8>}, {pipeline_mode = #tpu.pipeline_mode<synchronous>, transform_indices = @transform_11, window_bounds = array<i64: 2, 4, 1, 8>}, {pipeline_mode = #tpu.pipeline_mode<synchronous>, transform_indices = @transform_12, window_bounds = array<i64: 2, 4, 32, 8>}, {pipeline_mode = #tpu.pipeline_mode<synchronous>, transform_indices = @transform_13, window_bounds = array<i64: 2, 4, 1, 8>}, {pipeline_mode = #tpu.pipeline_mode<synchronous>, transform_indices = @transform_14, window_bounds = array<i64: 2, 4, 8, 32>}, {pipeline_mode = #tpu.pipeline_mode<synchronous>, transform_indices = @transform_15, window_bounds = array<i64: 2, 1, 32>}, {pipeline_mode = #tpu.pipeline_mode<synchronous>, transform_indices = @transform_16, window_bounds = array<i64: 2, 1, 32>}, {pipeline_mode = #tpu.pipeline_mode<synchronous>, transform_indices = @transform_17, window_bounds = array<i64: 2, 1, 32>}, {pipeline_mode = #tpu.pipeline_mode<synchronous>, transform_indices = @transform_18, window_bounds = array<i64: 2, 32, 128>}, {pipeline_mode = #tpu.pipeline_mode<synchronous>, transform_indices = @transform_19, window_bounds = array<i64: 2, 1, 128>}, {pipeline_mode = #tpu.pipeline_mode<synchronous>, transform_indices = @transform_20, window_bounds = array<i64: 2, 128, 32>}, {pipeline_mode = #tpu.pipeline_mode<synchronous>, transform_indices = @transform_21, window_bounds = array<i64: 2, 1, 32>}, {pipeline_mode = #tpu.pipeline_mode<synchronous>, transform_indices = @transform_22, window_bounds = array<i64: 2, 1, 32>}, {pipeline_mode = #tpu.pipeline_mode<synchronous>, transform_indices = @transform_23, window_bounds = array<i64: 2, 1, 32>}, {pipeline_mode = #tpu.pipeline_mode<synchronous>, transform_indices = @transform_24, window_bounds = array<i64: 32, 128>}, {pipeline_mode = #tpu.pipeline_mode<synchronous>, transform_indices = @transform_25, window_bounds = array<i64: 1, 128>}, {transform_indices = @transform_26, window_bounds = array<i64: 8, 128>}]} {
    %c0 = arith.constant 0 : index
    %c0_0 = arith.constant 0 : index
    %0 = vector.load %arg2[%c0, %c0_0] : memref<8x32xf32, #tpu.memory_space<vmem>>, vector<8x32xf32>
    %c0_1 = arith.constant 0 : index
    %c0_2 = arith.constant 0 : index
    %1 = vector.load %arg5[%c0_1, %c0_2] : memref<32x32xf32, #tpu.memory_space<vmem>>, vector<32x32xf32>
    %cst = arith.constant dense<0.000000e+00> : vector<8x32xf32>
    %2 = tpu.matmul %0, %1, %cst {dimension_numbers = #tpu.dot_dimension_numbers<[1], [0], [0], [1], [0, 0, 1, 1], [], []>} : vector<8x32xf32>, vector<32x32xf32>, vector<8x32xf32> -> vector<8x32xf32>
    %c0_3 = arith.constant 0 : index
    %c0_4 = arith.constant 0 : index
    %3 = vector.load %arg6[%c0_3, %c0_4] : memref<1x32xf32, #tpu.memory_space<vmem>>, vector<1x32xf32>
    %4 = vector.broadcast %3 : vector<1x32xf32> to vector<8x32xf32>
    %5 = arith.addf %2, %4 : vector<8x32xf32>
    %cst_5 = arith.constant 5.000000e-01 : f32
    %6 = vector.broadcast %cst_5 : f32 to vector<8x32xf32>
    %7 = arith.mulf %6, %5 : vector<8x32xf32>
    %cst_6 = arith.constant 4.471500e-02 : f32
    %8 = vector.broadcast %cst_6 : f32 to vector<8x32xf32>
    %9 = arith.mulf %8, %5 : vector<8x32xf32>
    %10 = arith.mulf %9, %5 : vector<8x32xf32>
    %11 = arith.mulf %10, %5 : vector<8x32xf32>
    %12 = arith.addf %5, %11 : vector<8x32xf32>
    %cst_7 = arith.constant 0.797884583 : f32
    %13 = vector.broadcast %cst_7 : f32 to vector<8x32xf32>
    %14 = arith.mulf %13, %12 : vector<8x32xf32>
    %15 = math.tanh %14 : vector<8x32xf32>
    %cst_8 = arith.constant 1.000000e+00 : f32
    %16 = vector.broadcast %cst_8 : f32 to vector<8x32xf32>
    %17 = arith.addf %16, %15 : vector<8x32xf32>
    %18 = arith.mulf %7, %17 : vector<8x32xf32>
    %c0_9 = arith.constant 0 : index
    %c0_10 = arith.constant 0 : index
    %19 = vector.load %arg1[%c0_9, %c0_10] : memref<8x32xf32, #tpu.memory_space<vmem>>, vector<8x32xf32>
    %c0_11 = arith.constant 0 : index
    %c0_12 = arith.constant 0 : index
    %20 = vector.load %arg3[%c0_11, %c0_12] : memref<8x32xf32, #tpu.memory_space<vmem>>, vector<8x32xf32>
    %21 = arith.mulf %20, %18 : vector<8x32xf32>
    %22 = arith.addf %19, %21 : vector<8x32xf32>
    %c0_13 = arith.constant 0 : index
    %c0_14 = arith.constant 0 : index
    %23 = vector.load %arg7[%c0_13, %c0_14] : memref<1x32xf32, #tpu.memory_space<vmem>>, vector<1x32xf32>
    %c0_15 = arith.constant 0 : index
    %c0_16 = arith.constant 0 : index
    %24 = vector.load %arg8[%c0_15, %c0_16] : memref<1x32xf32, #tpu.memory_space<vmem>>, vector<1x32xf32>
    %cst_17 = arith.constant dense<0.000000e+00> : vector<8xf32>
    %25 = vector.multi_reduction <add>, %22, %cst_17 [1] : vector<8x32xf32> to vector<8xf32>
    %26 = vector.shape_cast %25 : vector<8xf32> to vector<8x1xf32>
    %cst_18 = arith.constant 3.200000e+01 : f32
    %27 = vector.broadcast %cst_18 : f32 to vector<8x1xf32>
    %28 = arith.divf %26, %27 : vector<8x1xf32>
    %29 = vector.broadcast %28 : vector<8x1xf32> to vector<8x32xf32>
    %30 = arith.subf %22, %29 : vector<8x32xf32>
    %31 = arith.mulf %30, %30 : vector<8x32xf32>
    %cst_19 = arith.constant dense<0.000000e+00> : vector<8xf32>
    %32 = vector.multi_reduction <add>, %31, %cst_19 [1] : vector<8x32xf32> to vector<8xf32>
    %33 = vector.shape_cast %32 : vector<8xf32> to vector<8x1xf32>
    %cst_20 = arith.constant 3.200000e+01 : f32
    %34 = vector.broadcast %cst_20 : f32 to vector<8x1xf32>
    %35 = arith.divf %33, %34 : vector<8x1xf32>
    %36 = vector.broadcast %28 : vector<8x1xf32> to vector<8x32xf32>
    %37 = arith.subf %22, %36 : vector<8x32xf32>
    %cst_21 = arith.constant 9.99999996E-13 : f32
    %38 = vector.broadcast %cst_21 : f32 to vector<8x1xf32>
    %39 = arith.addf %35, %38 : vector<8x1xf32>
    %40 = math.rsqrt %39 : vector<8x1xf32>
    %41 = vector.broadcast %40 : vector<8x1xf32> to vector<8x32xf32>
    %42 = arith.mulf %37, %41 : vector<8x32xf32>
    %43 = vector.broadcast %23 : vector<1x32xf32> to vector<8x32xf32>
    %44 = arith.mulf %42, %43 : vector<8x32xf32>
    %45 = vector.broadcast %24 : vector<1x32xf32> to vector<8x32xf32>
    %46 = arith.addf %44, %45 : vector<8x32xf32>
    %c0_22 = arith.constant 0 : index
    %c0_23 = arith.constant 0 : index
    %c0_24 = arith.constant 0 : index
    %47 = vector.load %arg4[%c0_22, %c0_23, %c0_24] : memref<1x1x8xf32, #tpu.memory_space<vmem>>, vector<1x1x8xf32>
    %48 = vector.shape_cast %47 : vector<1x1x8xf32> to vector<1x8xf32>
    %c0_25 = arith.constant 0 : index
    %c0_26 = arith.constant 0 : index
    %c0_27 = arith.constant 0 : index
    %c0_28 = arith.constant 0 : index
    %49 = vector.load %arg9[%c0_25, %c0_26, %c0_27, %c0_28] : memref<2x4x32x8xf32, #tpu.memory_space<vmem>>, vector<1x1x32x8xf32>
    %50 = vector.shape_cast %49 : vector<1x1x32x8xf32> to vector<32x8xf32>
    %cst_29 = arith.constant dense<0.000000e+00> : vector<8x8xf32>
    %51 = tpu.matmul %46, %50, %cst_29 {dimension_numbers = #tpu.dot_dimension_numbers<[1], [0], [0], [1], [0, 0, 1, 1], [], []>} : vector<8x32xf32>, vector<32x8xf32>, vector<8x8xf32> -> vector<8x8xf32>
    %c0_30 = arith.constant 0 : index
    %c0_31 = arith.constant 0 : index
    %c0_32 = arith.constant 0 : index
    %c0_33 = arith.constant 0 : index
    %52 = vector.load %arg10[%c0_30, %c0_31, %c0_32, %c0_33] : memref<2x4x1x8xf32, #tpu.memory_space<vmem>>, vector<1x1x1x8xf32>
    %53 = vector.shape_cast %52 : vector<1x1x1x8xf32> to vector<1x8xf32>
    %54 = vector.broadcast %53 : vector<1x8xf32> to vector<8x8xf32>
    %55 = arith.addf %51, %54 : vector<8x8xf32>
    %c0_34 = arith.constant 0 : index
    %c0_35 = arith.constant 0 : index
    %c0_36 = arith.constant 0 : index
    %c0_37 = arith.constant 0 : index
    %56 = vector.load %arg11[%c0_34, %c0_35, %c0_36, %c0_37] : memref<2x4x32x8xf32, #tpu.memory_space<vmem>>, vector<1x1x32x8xf32>
    %57 = vector.shape_cast %56 : vector<1x1x32x8xf32> to vector<32x8xf32>
    %cst_38 = arith.constant dense<0.000000e+00> : vector<8x8xf32>
    %58 = tpu.matmul %46, %57, %cst_38 {dimension_numbers = #tpu.dot_dimension_numbers<[1], [0], [0], [1], [0, 0, 1, 1], [], []>} : vector<8x32xf32>, vector<32x8xf32>, vector<8x8xf32> -> vector<8x8xf32>
    %c0_39 = arith.constant 0 : index
    %c0_40 = arith.constant 0 : index
    %c0_41 = arith.constant 0 : index
    %c0_42 = arith.constant 0 : index
    %59 = vector.load %arg12[%c0_39, %c0_40, %c0_41, %c0_42] : memref<2x4x1x8xf32, #tpu.memory_space<vmem>>, vector<1x1x1x8xf32>
    %60 = vector.shape_cast %59 : vector<1x1x1x8xf32> to vector<1x8xf32>
    %61 = vector.broadcast %60 : vector<1x8xf32> to vector<8x8xf32>
    %62 = arith.addf %58, %61 : vector<8x8xf32>
    %c0_43 = arith.constant 0 : index
    %c0_44 = arith.constant 0 : index
    %c0_45 = arith.constant 0 : index
    %c0_46 = arith.constant 0 : index
    %63 = vector.load %arg13[%c0_43, %c0_44, %c0_45, %c0_46] : memref<2x4x32x8xf32, #tpu.memory_space<vmem>>, vector<1x1x32x8xf32>
    %64 = vector.shape_cast %63 : vector<1x1x32x8xf32> to vector<32x8xf32>
    %cst_47 = arith.constant dense<0.000000e+00> : vector<8x8xf32>
    %65 = tpu.matmul %46, %64, %cst_47 {dimension_numbers = #tpu.dot_dimension_numbers<[1], [0], [0], [1], [0, 0, 1, 1], [], []>} : vector<8x32xf32>, vector<32x8xf32>, vector<8x8xf32> -> vector<8x8xf32>
    %c0_48 = arith.constant 0 : index
    %c0_49 = arith.constant 0 : index
    %c0_50 = arith.constant 0 : index
    %c0_51 = arith.constant 0 : index
    %66 = vector.load %arg14[%c0_48, %c0_49, %c0_50, %c0_51] : memref<2x4x1x8xf32, #tpu.memory_space<vmem>>, vector<1x1x1x8xf32>
    %67 = vector.shape_cast %66 : vector<1x1x1x8xf32> to vector<1x8xf32>
    %68 = vector.broadcast %67 : vector<1x8xf32> to vector<8x8xf32>
    %69 = arith.addf %65, %68 : vector<8x8xf32>
    %cst_52 = arith.constant dense<0.000000e+00> : vector<8x8xf32>
    %70 = tpu.matmul %55, %62, %cst_52 {dimension_numbers = #tpu.dot_dimension_numbers<[1], [1], [0], [0], [0, 0, 1, 0], [], []>} : vector<8x8xf32>, vector<8x8xf32>, vector<8x8xf32> -> vector<8x8xf32>
    %cst_53 = arith.constant 0.353553385 : f32
    %71 = vector.broadcast %cst_53 : f32 to vector<8x8xf32>
    %72 = arith.mulf %70, %71 : vector<8x8xf32>
    %73 = vector.broadcast %48 : vector<1x8xf32> to vector<8x8xf32>
    %74 = arith.addf %72, %73 : vector<8x8xf32>
    %cst_54 = arith.constant dense<0xFF800000> : vector<8xf32>
    %75 = vector.multi_reduction <maximumf>, %74, %cst_54 [1] : vector<8x8xf32> to vector<8xf32>
    %76 = vector.shape_cast %75 : vector<8xf32> to vector<8x1xf32>
    %77 = vector.broadcast %76 : vector<8x1xf32> to vector<8x8xf32>
    %78 = arith.subf %74, %77 : vector<8x8xf32>
    %79 = math.exp %78 : vector<8x8xf32>
    %cst_55 = arith.constant dense<0.000000e+00> : vector<8xf32>
    %80 = vector.multi_reduction <add>, %79, %cst_55 [1] : vector<8x8xf32> to vector<8xf32>
    %81 = vector.shape_cast %80 : vector<8xf32> to vector<8x1xf32>
    %82 = tpu.reciprocal %81 {approx = true} : vector<8x1xf32> -> vector<8x1xf32>
    %83 = vector.broadcast %82 : vector<8x1xf32> to vector<8x8xf32>
    %84 = arith.mulf %79, %83 : vector<8x8xf32>
    %cst_56 = arith.constant dense<0.000000e+00> : vector<8x8xf32>
    %85 = tpu.matmul %84, %69, %cst_56 {dimension_numbers = #tpu.dot_dimension_numbers<[1], [0], [0], [1], [0, 0, 1, 1], [], []>} : vector<8x8xf32>, vector<8x8xf32>, vector<8x8xf32> -> vector<8x8xf32>
    %c0_57 = arith.constant 0 : index
    %c0_58 = arith.constant 0 : index
    %c0_59 = arith.constant 0 : index
    %c0_60 = arith.constant 0 : index
    %86 = vector.load %arg15[%c0_57, %c0_58, %c0_59, %c0_60] : memref<2x4x8x32xf32, #tpu.memory_space<vmem>>, vector<1x1x8x32xf32>
    %87 = vector.shape_cast %86 : vector<1x1x8x32xf32> to vector<8x32xf32>
    %cst_61 = arith.constant dense<0.000000e+00> : vector<8x32xf32>
    %88 = tpu.matmul %85, %87, %cst_61 {dimension_numbers = #tpu.dot_dimension_numbers<[1], [0], [0], [1], [0, 0, 1, 1], [], []>} : vector<8x8xf32>, vector<8x32xf32>, vector<8x32xf32> -> vector<8x32xf32>
    %c0_62 = arith.constant 0 : index
    %c1 = arith.constant 1 : index
    %c0_63 = arith.constant 0 : index
    %c0_64 = arith.constant 0 : index
    %89 = vector.load %arg9[%c0_62, %c1, %c0_63, %c0_64] : memref<2x4x32x8xf32, #tpu.memory_space<vmem>>, vector<1x1x32x8xf32>
    %90 = vector.shape_cast %89 : vector<1x1x32x8xf32> to vector<32x8xf32>
    %cst_65 = arith.constant dense<0.000000e+00> : vector<8x8xf32>
    %91 = tpu.matmul %46, %90, %cst_65 {dimension_numbers = #tpu.dot_dimension_numbers<[1], [0], [0], [1], [0, 0, 1, 1], [], []>} : vector<8x32xf32>, vector<32x8xf32>, vector<8x8xf32> -> vector<8x8xf32>
    %c0_66 = arith.constant 0 : index
    %c1_67 = arith.constant 1 : index
    %c0_68 = arith.constant 0 : index
    %c0_69 = arith.constant 0 : index
    %92 = vector.load %arg10[%c0_66, %c1_67, %c0_68, %c0_69] : memref<2x4x1x8xf32, #tpu.memory_space<vmem>>, vector<1x1x1x8xf32>
    %93 = vector.shape_cast %92 : vector<1x1x1x8xf32> to vector<1x8xf32>
    %94 = vector.broadcast %93 : vector<1x8xf32> to vector<8x8xf32>
    %95 = arith.addf %91, %94 : vector<8x8xf32>
    %c0_70 = arith.constant 0 : index
    %c1_71 = arith.constant 1 : index
    %c0_72 = arith.constant 0 : index
    %c0_73 = arith.constant 0 : index
    %96 = vector.load %arg11[%c0_70, %c1_71, %c0_72, %c0_73] : memref<2x4x32x8xf32, #tpu.memory_space<vmem>>, vector<1x1x32x8xf32>
    %97 = vector.shape_cast %96 : vector<1x1x32x8xf32> to vector<32x8xf32>
    %cst_74 = arith.constant dense<0.000000e+00> : vector<8x8xf32>
    %98 = tpu.matmul %46, %97, %cst_74 {dimension_numbers = #tpu.dot_dimension_numbers<[1], [0], [0], [1], [0, 0, 1, 1], [], []>} : vector<8x32xf32>, vector<32x8xf32>, vector<8x8xf32> -> vector<8x8xf32>
    %c0_75 = arith.constant 0 : index
    %c1_76 = arith.constant 1 : index
    %c0_77 = arith.constant 0 : index
    %c0_78 = arith.constant 0 : index
    %99 = vector.load %arg12[%c0_75, %c1_76, %c0_77, %c0_78] : memref<2x4x1x8xf32, #tpu.memory_space<vmem>>, vector<1x1x1x8xf32>
    %100 = vector.shape_cast %99 : vector<1x1x1x8xf32> to vector<1x8xf32>
    %101 = vector.broadcast %100 : vector<1x8xf32> to vector<8x8xf32>
    %102 = arith.addf %98, %101 : vector<8x8xf32>
    %c0_79 = arith.constant 0 : index
    %c1_80 = arith.constant 1 : index
    %c0_81 = arith.constant 0 : index
    %c0_82 = arith.constant 0 : index
    %103 = vector.load %arg13[%c0_79, %c1_80, %c0_81, %c0_82] : memref<2x4x32x8xf32, #tpu.memory_space<vmem>>, vector<1x1x32x8xf32>
    %104 = vector.shape_cast %103 : vector<1x1x32x8xf32> to vector<32x8xf32>
    %cst_83 = arith.constant dense<0.000000e+00> : vector<8x8xf32>
    %105 = tpu.matmul %46, %104, %cst_83 {dimension_numbers = #tpu.dot_dimension_numbers<[1], [0], [0], [1], [0, 0, 1, 1], [], []>} : vector<8x32xf32>, vector<32x8xf32>, vector<8x8xf32> -> vector<8x8xf32>
    %c0_84 = arith.constant 0 : index
    %c1_85 = arith.constant 1 : index
    %c0_86 = arith.constant 0 : index
    %c0_87 = arith.constant 0 : index
    %106 = vector.load %arg14[%c0_84, %c1_85, %c0_86, %c0_87] : memref<2x4x1x8xf32, #tpu.memory_space<vmem>>, vector<1x1x1x8xf32>
    %107 = vector.shape_cast %106 : vector<1x1x1x8xf32> to vector<1x8xf32>
    %108 = vector.broadcast %107 : vector<1x8xf32> to vector<8x8xf32>
    %109 = arith.addf %105, %108 : vector<8x8xf32>
    %cst_88 = arith.constant dense<0.000000e+00> : vector<8x8xf32>
    %110 = tpu.matmul %95, %102, %cst_88 {dimension_numbers = #tpu.dot_dimension_numbers<[1], [1], [0], [0], [0, 0, 1, 0], [], []>} : vector<8x8xf32>, vector<8x8xf32>, vector<8x8xf32> -> vector<8x8xf32>
    %cst_89 = arith.constant 0.353553385 : f32
    %111 = vector.broadcast %cst_89 : f32 to vector<8x8xf32>
    %112 = arith.mulf %110, %111 : vector<8x8xf32>
    %113 = vector.broadcast %48 : vector<1x8xf32> to vector<8x8xf32>
    %114 = arith.addf %112, %113 : vector<8x8xf32>
    %cst_90 = arith.constant dense<0xFF800000> : vector<8xf32>
    %115 = vector.multi_reduction <maximumf>, %114, %cst_90 [1] : vector<8x8xf32> to vector<8xf32>
    %116 = vector.shape_cast %115 : vector<8xf32> to vector<8x1xf32>
    %117 = vector.broadcast %116 : vector<8x1xf32> to vector<8x8xf32>
    %118 = arith.subf %114, %117 : vector<8x8xf32>
    %119 = math.exp %118 : vector<8x8xf32>
    %cst_91 = arith.constant dense<0.000000e+00> : vector<8xf32>
    %120 = vector.multi_reduction <add>, %119, %cst_91 [1] : vector<8x8xf32> to vector<8xf32>
    %121 = vector.shape_cast %120 : vector<8xf32> to vector<8x1xf32>
    %122 = tpu.reciprocal %121 {approx = true} : vector<8x1xf32> -> vector<8x1xf32>
    %123 = vector.broadcast %122 : vector<8x1xf32> to vector<8x8xf32>
    %124 = arith.mulf %119, %123 : vector<8x8xf32>
    %cst_92 = arith.constant dense<0.000000e+00> : vector<8x8xf32>
    %125 = tpu.matmul %124, %109, %cst_92 {dimension_numbers = #tpu.dot_dimension_numbers<[1], [0], [0], [1], [0, 0, 1, 1], [], []>} : vector<8x8xf32>, vector<8x8xf32>, vector<8x8xf32> -> vector<8x8xf32>
    %c0_93 = arith.constant 0 : index
    %c1_94 = arith.constant 1 : index
    %c0_95 = arith.constant 0 : index
    %c0_96 = arith.constant 0 : index
    %126 = vector.load %arg15[%c0_93, %c1_94, %c0_95, %c0_96] : memref<2x4x8x32xf32, #tpu.memory_space<vmem>>, vector<1x1x8x32xf32>
    %127 = vector.shape_cast %126 : vector<1x1x8x32xf32> to vector<8x32xf32>
    %cst_97 = arith.constant dense<0.000000e+00> : vector<8x32xf32>
    %128 = tpu.matmul %125, %127, %cst_97 {dimension_numbers = #tpu.dot_dimension_numbers<[1], [0], [0], [1], [0, 0, 1, 1], [], []>} : vector<8x8xf32>, vector<8x32xf32>, vector<8x32xf32> -> vector<8x32xf32>
    %129 = arith.addf %88, %128 : vector<8x32xf32>
    %c0_98 = arith.constant 0 : index
    %c2 = arith.constant 2 : index
    %c0_99 = arith.constant 0 : index
    %c0_100 = arith.constant 0 : index
    %130 = vector.load %arg9[%c0_98, %c2, %c0_99, %c0_100] : memref<2x4x32x8xf32, #tpu.memory_space<vmem>>, vector<1x1x32x8xf32>
    %131 = vector.shape_cast %130 : vector<1x1x32x8xf32> to vector<32x8xf32>
    %cst_101 = arith.constant dense<0.000000e+00> : vector<8x8xf32>
    %132 = tpu.matmul %46, %131, %cst_101 {dimension_numbers = #tpu.dot_dimension_numbers<[1], [0], [0], [1], [0, 0, 1, 1], [], []>} : vector<8x32xf32>, vector<32x8xf32>, vector<8x8xf32> -> vector<8x8xf32>
    %c0_102 = arith.constant 0 : index
    %c2_103 = arith.constant 2 : index
    %c0_104 = arith.constant 0 : index
    %c0_105 = arith.constant 0 : index
    %133 = vector.load %arg10[%c0_102, %c2_103, %c0_104, %c0_105] : memref<2x4x1x8xf32, #tpu.memory_space<vmem>>, vector<1x1x1x8xf32>
    %134 = vector.shape_cast %133 : vector<1x1x1x8xf32> to vector<1x8xf32>
    %135 = vector.broadcast %134 : vector<1x8xf32> to vector<8x8xf32>
    %136 = arith.addf %132, %135 : vector<8x8xf32>
    %c0_106 = arith.constant 0 : index
    %c2_107 = arith.constant 2 : index
    %c0_108 = arith.constant 0 : index
    %c0_109 = arith.constant 0 : index
    %137 = vector.load %arg11[%c0_106, %c2_107, %c0_108, %c0_109] : memref<2x4x32x8xf32, #tpu.memory_space<vmem>>, vector<1x1x32x8xf32>
    %138 = vector.shape_cast %137 : vector<1x1x32x8xf32> to vector<32x8xf32>
    %cst_110 = arith.constant dense<0.000000e+00> : vector<8x8xf32>
    %139 = tpu.matmul %46, %138, %cst_110 {dimension_numbers = #tpu.dot_dimension_numbers<[1], [0], [0], [1], [0, 0, 1, 1], [], []>} : vector<8x32xf32>, vector<32x8xf32>, vector<8x8xf32> -> vector<8x8xf32>
    %c0_111 = arith.constant 0 : index
    %c2_112 = arith.constant 2 : index
    %c0_113 = arith.constant 0 : index
    %c0_114 = arith.constant 0 : index
    %140 = vector.load %arg12[%c0_111, %c2_112, %c0_113, %c0_114] : memref<2x4x1x8xf32, #tpu.memory_space<vmem>>, vector<1x1x1x8xf32>
    %141 = vector.shape_cast %140 : vector<1x1x1x8xf32> to vector<1x8xf32>
    %142 = vector.broadcast %141 : vector<1x8xf32> to vector<8x8xf32>
    %143 = arith.addf %139, %142 : vector<8x8xf32>
    %c0_115 = arith.constant 0 : index
    %c2_116 = arith.constant 2 : index
    %c0_117 = arith.constant 0 : index
    %c0_118 = arith.constant 0 : index
    %144 = vector.load %arg13[%c0_115, %c2_116, %c0_117, %c0_118] : memref<2x4x32x8xf32, #tpu.memory_space<vmem>>, vector<1x1x32x8xf32>
    %145 = vector.shape_cast %144 : vector<1x1x32x8xf32> to vector<32x8xf32>
    %cst_119 = arith.constant dense<0.000000e+00> : vector<8x8xf32>
    %146 = tpu.matmul %46, %145, %cst_119 {dimension_numbers = #tpu.dot_dimension_numbers<[1], [0], [0], [1], [0, 0, 1, 1], [], []>} : vector<8x32xf32>, vector<32x8xf32>, vector<8x8xf32> -> vector<8x8xf32>
    %c0_120 = arith.constant 0 : index
    %c2_121 = arith.constant 2 : index
    %c0_122 = arith.constant 0 : index
    %c0_123 = arith.constant 0 : index
    %147 = vector.load %arg14[%c0_120, %c2_121, %c0_122, %c0_123] : memref<2x4x1x8xf32, #tpu.memory_space<vmem>>, vector<1x1x1x8xf32>
    %148 = vector.shape_cast %147 : vector<1x1x1x8xf32> to vector<1x8xf32>
    %149 = vector.broadcast %148 : vector<1x8xf32> to vector<8x8xf32>
    %150 = arith.addf %146, %149 : vector<8x8xf32>
    %cst_124 = arith.constant dense<0.000000e+00> : vector<8x8xf32>
    %151 = tpu.matmul %136, %143, %cst_124 {dimension_numbers = #tpu.dot_dimension_numbers<[1], [1], [0], [0], [0, 0, 1, 0], [], []>} : vector<8x8xf32>, vector<8x8xf32>, vector<8x8xf32> -> vector<8x8xf32>
    %cst_125 = arith.constant 0.353553385 : f32
    %152 = vector.broadcast %cst_125 : f32 to vector<8x8xf32>
    %153 = arith.mulf %151, %152 : vector<8x8xf32>
    %154 = vector.broadcast %48 : vector<1x8xf32> to vector<8x8xf32>
    %155 = arith.addf %153, %154 : vector<8x8xf32>
    %cst_126 = arith.constant dense<0xFF800000> : vector<8xf32>
    %156 = vector.multi_reduction <maximumf>, %155, %cst_126 [1] : vector<8x8xf32> to vector<8xf32>
    %157 = vector.shape_cast %156 : vector<8xf32> to vector<8x1xf32>
    %158 = vector.broadcast %157 : vector<8x1xf32> to vector<8x8xf32>
    %159 = arith.subf %155, %158 : vector<8x8xf32>
    %160 = math.exp %159 : vector<8x8xf32>
    %cst_127 = arith.constant dense<0.000000e+00> : vector<8xf32>
    %161 = vector.multi_reduction <add>, %160, %cst_127 [1] : vector<8x8xf32> to vector<8xf32>
    %162 = vector.shape_cast %161 : vector<8xf32> to vector<8x1xf32>
    %163 = tpu.reciprocal %162 {approx = true} : vector<8x1xf32> -> vector<8x1xf32>
    %164 = vector.broadcast %163 : vector<8x1xf32> to vector<8x8xf32>
    %165 = arith.mulf %160, %164 : vector<8x8xf32>
    %cst_128 = arith.constant dense<0.000000e+00> : vector<8x8xf32>
    %166 = tpu.matmul %165, %150, %cst_128 {dimension_numbers = #tpu.dot_dimension_numbers<[1], [0], [0], [1], [0, 0, 1, 1], [], []>} : vector<8x8xf32>, vector<8x8xf32>, vector<8x8xf32> -> vector<8x8xf32>
    %c0_129 = arith.constant 0 : index
    %c2_130 = arith.constant 2 : index
    %c0_131 = arith.constant 0 : index
    %c0_132 = arith.constant 0 : index
    %167 = vector.load %arg15[%c0_129, %c2_130, %c0_131, %c0_132] : memref<2x4x8x32xf32, #tpu.memory_space<vmem>>, vector<1x1x8x32xf32>
    %168 = vector.shape_cast %167 : vector<1x1x8x32xf32> to vector<8x32xf32>
    %cst_133 = arith.constant dense<0.000000e+00> : vector<8x32xf32>
    %169 = tpu.matmul %166, %168, %cst_133 {dimension_numbers = #tpu.dot_dimension_numbers<[1], [0], [0], [1], [0, 0, 1, 1], [], []>} : vector<8x8xf32>, vector<8x32xf32>, vector<8x32xf32> -> vector<8x32xf32>
    %170 = arith.addf %129, %169 : vector<8x32xf32>
    %c0_134 = arith.constant 0 : index
    %c3 = arith.constant 3 : index
    %c0_135 = arith.constant 0 : index
    %c0_136 = arith.constant 0 : index
    %171 = vector.load %arg9[%c0_134, %c3, %c0_135, %c0_136] : memref<2x4x32x8xf32, #tpu.memory_space<vmem>>, vector<1x1x32x8xf32>
    %172 = vector.shape_cast %171 : vector<1x1x32x8xf32> to vector<32x8xf32>
    %cst_137 = arith.constant dense<0.000000e+00> : vector<8x8xf32>
    %173 = tpu.matmul %46, %172, %cst_137 {dimension_numbers = #tpu.dot_dimension_numbers<[1], [0], [0], [1], [0, 0, 1, 1], [], []>} : vector<8x32xf32>, vector<32x8xf32>, vector<8x8xf32> -> vector<8x8xf32>
    %c0_138 = arith.constant 0 : index
    %c3_139 = arith.constant 3 : index
    %c0_140 = arith.constant 0 : index
    %c0_141 = arith.constant 0 : index
    %174 = vector.load %arg10[%c0_138, %c3_139, %c0_140, %c0_141] : memref<2x4x1x8xf32, #tpu.memory_space<vmem>>, vector<1x1x1x8xf32>
    %175 = vector.shape_cast %174 : vector<1x1x1x8xf32> to vector<1x8xf32>
    %176 = vector.broadcast %175 : vector<1x8xf32> to vector<8x8xf32>
    %177 = arith.addf %173, %176 : vector<8x8xf32>
    %c0_142 = arith.constant 0 : index
    %c3_143 = arith.constant 3 : index
    %c0_144 = arith.constant 0 : index
    %c0_145 = arith.constant 0 : index
    %178 = vector.load %arg11[%c0_142, %c3_143, %c0_144, %c0_145] : memref<2x4x32x8xf32, #tpu.memory_space<vmem>>, vector<1x1x32x8xf32>
    %179 = vector.shape_cast %178 : vector<1x1x32x8xf32> to vector<32x8xf32>
    %cst_146 = arith.constant dense<0.000000e+00> : vector<8x8xf32>
    %180 = tpu.matmul %46, %179, %cst_146 {dimension_numbers = #tpu.dot_dimension_numbers<[1], [0], [0], [1], [0, 0, 1, 1], [], []>} : vector<8x32xf32>, vector<32x8xf32>, vector<8x8xf32> -> vector<8x8xf32>
    %c0_147 = arith.constant 0 : index
    %c3_148 = arith.constant 3 : index
    %c0_149 = arith.constant 0 : index
    %c0_150 = arith.constant 0 : index
    %181 = vector.load %arg12[%c0_147, %c3_148, %c0_149, %c0_150] : memref<2x4x1x8xf32, #tpu.memory_space<vmem>>, vector<1x1x1x8xf32>
    %182 = vector.shape_cast %181 : vector<1x1x1x8xf32> to vector<1x8xf32>
    %183 = vector.broadcast %182 : vector<1x8xf32> to vector<8x8xf32>
    %184 = arith.addf %180, %183 : vector<8x8xf32>
    %c0_151 = arith.constant 0 : index
    %c3_152 = arith.constant 3 : index
    %c0_153 = arith.constant 0 : index
    %c0_154 = arith.constant 0 : index
    %185 = vector.load %arg13[%c0_151, %c3_152, %c0_153, %c0_154] : memref<2x4x32x8xf32, #tpu.memory_space<vmem>>, vector<1x1x32x8xf32>
    %186 = vector.shape_cast %185 : vector<1x1x32x8xf32> to vector<32x8xf32>
    %cst_155 = arith.constant dense<0.000000e+00> : vector<8x8xf32>
    %187 = tpu.matmul %46, %186, %cst_155 {dimension_numbers = #tpu.dot_dimension_numbers<[1], [0], [0], [1], [0, 0, 1, 1], [], []>} : vector<8x32xf32>, vector<32x8xf32>, vector<8x8xf32> -> vector<8x8xf32>
    %c0_156 = arith.constant 0 : index
    %c3_157 = arith.constant 3 : index
    %c0_158 = arith.constant 0 : index
    %c0_159 = arith.constant 0 : index
    %188 = vector.load %arg14[%c0_156, %c3_157, %c0_158, %c0_159] : memref<2x4x1x8xf32, #tpu.memory_space<vmem>>, vector<1x1x1x8xf32>
    %189 = vector.shape_cast %188 : vector<1x1x1x8xf32> to vector<1x8xf32>
    %190 = vector.broadcast %189 : vector<1x8xf32> to vector<8x8xf32>
    %191 = arith.addf %187, %190 : vector<8x8xf32>
    %cst_160 = arith.constant dense<0.000000e+00> : vector<8x8xf32>
    %192 = tpu.matmul %177, %184, %cst_160 {dimension_numbers = #tpu.dot_dimension_numbers<[1], [1], [0], [0], [0, 0, 1, 0], [], []>} : vector<8x8xf32>, vector<8x8xf32>, vector<8x8xf32> -> vector<8x8xf32>
    %cst_161 = arith.constant 0.353553385 : f32
    %193 = vector.broadcast %cst_161 : f32 to vector<8x8xf32>
    %194 = arith.mulf %192, %193 : vector<8x8xf32>
    %195 = vector.broadcast %48 : vector<1x8xf32> to vector<8x8xf32>
    %196 = arith.addf %194, %195 : vector<8x8xf32>
    %cst_162 = arith.constant dense<0xFF800000> : vector<8xf32>
    %197 = vector.multi_reduction <maximumf>, %196, %cst_162 [1] : vector<8x8xf32> to vector<8xf32>
    %198 = vector.shape_cast %197 : vector<8xf32> to vector<8x1xf32>
    %199 = vector.broadcast %198 : vector<8x1xf32> to vector<8x8xf32>
    %200 = arith.subf %196, %199 : vector<8x8xf32>
    %201 = math.exp %200 : vector<8x8xf32>
    %cst_163 = arith.constant dense<0.000000e+00> : vector<8xf32>
    %202 = vector.multi_reduction <add>, %201, %cst_163 [1] : vector<8x8xf32> to vector<8xf32>
    %203 = vector.shape_cast %202 : vector<8xf32> to vector<8x1xf32>
    %204 = tpu.reciprocal %203 {approx = true} : vector<8x1xf32> -> vector<8x1xf32>
    %205 = vector.broadcast %204 : vector<8x1xf32> to vector<8x8xf32>
    %206 = arith.mulf %201, %205 : vector<8x8xf32>
    %cst_164 = arith.constant dense<0.000000e+00> : vector<8x8xf32>
    %207 = tpu.matmul %206, %191, %cst_164 {dimension_numbers = #tpu.dot_dimension_numbers<[1], [0], [0], [1], [0, 0, 1, 1], [], []>} : vector<8x8xf32>, vector<8x8xf32>, vector<8x8xf32> -> vector<8x8xf32>
    %c0_165 = arith.constant 0 : index
    %c3_166 = arith.constant 3 : index
    %c0_167 = arith.constant 0 : index
    %c0_168 = arith.constant 0 : index
    %208 = vector.load %arg15[%c0_165, %c3_166, %c0_167, %c0_168] : memref<2x4x8x32xf32, #tpu.memory_space<vmem>>, vector<1x1x8x32xf32>
    %209 = vector.shape_cast %208 : vector<1x1x8x32xf32> to vector<8x32xf32>
    %cst_169 = arith.constant dense<0.000000e+00> : vector<8x32xf32>
    %210 = tpu.matmul %207, %209, %cst_169 {dimension_numbers = #tpu.dot_dimension_numbers<[1], [0], [0], [1], [0, 0, 1, 1], [], []>} : vector<8x8xf32>, vector<8x32xf32>, vector<8x32xf32> -> vector<8x32xf32>
    %211 = arith.addf %170, %210 : vector<8x32xf32>
    %c0_170 = arith.constant 0 : index
    %c0_171 = arith.constant 0 : index
    %c0_172 = arith.constant 0 : index
    %212 = vector.load %arg16[%c0_170, %c0_171, %c0_172] : memref<2x1x32xf32, #tpu.memory_space<vmem>>, vector<1x1x32xf32>
    %213 = vector.shape_cast %212 : vector<1x1x32xf32> to vector<1x32xf32>
    %214 = vector.broadcast %213 : vector<1x32xf32> to vector<8x32xf32>
    %215 = arith.addf %211, %214 : vector<8x32xf32>
    %216 = arith.addf %215, %46 : vector<8x32xf32>
    %c0_173 = arith.constant 0 : index
    %c0_174 = arith.constant 0 : index
    %c0_175 = arith.constant 0 : index
    %217 = vector.load %arg17[%c0_173, %c0_174, %c0_175] : memref<2x1x32xf32, #tpu.memory_space<vmem>>, vector<1x1x32xf32>
    %218 = vector.shape_cast %217 : vector<1x1x32xf32> to vector<1x32xf32>
    %c0_176 = arith.constant 0 : index
    %c0_177 = arith.constant 0 : index
    %c0_178 = arith.constant 0 : index
    %219 = vector.load %arg18[%c0_176, %c0_177, %c0_178] : memref<2x1x32xf32, #tpu.memory_space<vmem>>, vector<1x1x32xf32>
    %220 = vector.shape_cast %219 : vector<1x1x32xf32> to vector<1x32xf32>
    %cst_179 = arith.constant dense<0.000000e+00> : vector<8xf32>
    %221 = vector.multi_reduction <add>, %216, %cst_179 [1] : vector<8x32xf32> to vector<8xf32>
    %222 = vector.shape_cast %221 : vector<8xf32> to vector<8x1xf32>
    %cst_180 = arith.constant 3.200000e+01 : f32
    %223 = vector.broadcast %cst_180 : f32 to vector<8x1xf32>
    %224 = arith.divf %222, %223 : vector<8x1xf32>
    %225 = vector.broadcast %224 : vector<8x1xf32> to vector<8x32xf32>
    %226 = arith.subf %216, %225 : vector<8x32xf32>
    %227 = arith.mulf %226, %226 : vector<8x32xf32>
    %cst_181 = arith.constant dense<0.000000e+00> : vector<8xf32>
    %228 = vector.multi_reduction <add>, %227, %cst_181 [1] : vector<8x32xf32> to vector<8xf32>
    %229 = vector.shape_cast %228 : vector<8xf32> to vector<8x1xf32>
    %cst_182 = arith.constant 3.200000e+01 : f32
    %230 = vector.broadcast %cst_182 : f32 to vector<8x1xf32>
    %231 = arith.divf %229, %230 : vector<8x1xf32>
    %232 = vector.broadcast %224 : vector<8x1xf32> to vector<8x32xf32>
    %233 = arith.subf %216, %232 : vector<8x32xf32>
    %cst_183 = arith.constant 9.99999996E-13 : f32
    %234 = vector.broadcast %cst_183 : f32 to vector<8x1xf32>
    %235 = arith.addf %231, %234 : vector<8x1xf32>
    %236 = math.rsqrt %235 : vector<8x1xf32>
    %237 = vector.broadcast %236 : vector<8x1xf32> to vector<8x32xf32>
    %238 = arith.mulf %233, %237 : vector<8x32xf32>
    %239 = vector.broadcast %218 : vector<1x32xf32> to vector<8x32xf32>
    %240 = arith.mulf %238, %239 : vector<8x32xf32>
    %241 = vector.broadcast %220 : vector<1x32xf32> to vector<8x32xf32>
    %242 = arith.addf %240, %241 : vector<8x32xf32>
    %c0_184 = arith.constant 0 : index
    %c0_185 = arith.constant 0 : index
    %c0_186 = arith.constant 0 : index
    %243 = vector.load %arg19[%c0_184, %c0_185, %c0_186] : memref<2x32x128xf32, #tpu.memory_space<vmem>>, vector<1x32x128xf32>
    %244 = vector.shape_cast %243 : vector<1x32x128xf32> to vector<32x128xf32>
    %cst_187 = arith.constant dense<0.000000e+00> : vector<8x128xf32>
    %245 = tpu.matmul %242, %244, %cst_187 {dimension_numbers = #tpu.dot_dimension_numbers<[1], [0], [0], [1], [0, 0, 1, 1], [], []>} : vector<8x32xf32>, vector<32x128xf32>, vector<8x128xf32> -> vector<8x128xf32>
    %c0_188 = arith.constant 0 : index
    %c0_189 = arith.constant 0 : index
    %c0_190 = arith.constant 0 : index
    %246 = vector.load %arg20[%c0_188, %c0_189, %c0_190] : memref<2x1x128xf32, #tpu.memory_space<vmem>>, vector<1x1x128xf32>
    %247 = vector.shape_cast %246 : vector<1x1x128xf32> to vector<1x128xf32>
    %248 = vector.broadcast %247 : vector<1x128xf32> to vector<8x128xf32>
    %249 = arith.addf %245, %248 : vector<8x128xf32>
    %cst_191 = arith.constant 5.000000e-01 : f32
    %250 = vector.broadcast %cst_191 : f32 to vector<8x128xf32>
    %251 = arith.mulf %250, %249 : vector<8x128xf32>
    %cst_192 = arith.constant 4.471500e-02 : f32
    %252 = vector.broadcast %cst_192 : f32 to vector<8x128xf32>
    %253 = arith.mulf %252, %249 : vector<8x128xf32>
    %254 = arith.mulf %253, %249 : vector<8x128xf32>
    %255 = arith.mulf %254, %249 : vector<8x128xf32>
    %256 = arith.addf %249, %255 : vector<8x128xf32>
    %cst_193 = arith.constant 0.797884583 : f32
    %257 = vector.broadcast %cst_193 : f32 to vector<8x128xf32>
    %258 = arith.mulf %257, %256 : vector<8x128xf32>
    %259 = math.tanh %258 : vector<8x128xf32>
    %cst_194 = arith.constant 1.000000e+00 : f32
    %260 = vector.broadcast %cst_194 : f32 to vector<8x128xf32>
    %261 = arith.addf %260, %259 : vector<8x128xf32>
    %262 = arith.mulf %251, %261 : vector<8x128xf32>
    %c0_195 = arith.constant 0 : index
    %c0_196 = arith.constant 0 : index
    %c0_197 = arith.constant 0 : index
    %263 = vector.load %arg21[%c0_195, %c0_196, %c0_197] : memref<2x128x32xf32, #tpu.memory_space<vmem>>, vector<1x128x32xf32>
    %264 = vector.shape_cast %263 : vector<1x128x32xf32> to vector<128x32xf32>
    %cst_198 = arith.constant dense<0.000000e+00> : vector<8x32xf32>
    %265 = tpu.matmul %262, %264, %cst_198 {dimension_numbers = #tpu.dot_dimension_numbers<[1], [0], [0], [1], [0, 0, 1, 1], [], []>} : vector<8x128xf32>, vector<128x32xf32>, vector<8x32xf32> -> vector<8x32xf32>
    %c0_199 = arith.constant 0 : index
    %c0_200 = arith.constant 0 : index
    %c0_201 = arith.constant 0 : index
    %266 = vector.load %arg22[%c0_199, %c0_200, %c0_201] : memref<2x1x32xf32, #tpu.memory_space<vmem>>, vector<1x1x32xf32>
    %267 = vector.shape_cast %266 : vector<1x1x32xf32> to vector<1x32xf32>
    %268 = vector.broadcast %267 : vector<1x32xf32> to vector<8x32xf32>
    %269 = arith.addf %265, %268 : vector<8x32xf32>
    %270 = arith.addf %269, %242 : vector<8x32xf32>
    %c0_202 = arith.constant 0 : index
    %c0_203 = arith.constant 0 : index
    %c0_204 = arith.constant 0 : index
    %271 = vector.load %arg23[%c0_202, %c0_203, %c0_204] : memref<2x1x32xf32, #tpu.memory_space<vmem>>, vector<1x1x32xf32>
    %272 = vector.shape_cast %271 : vector<1x1x32xf32> to vector<1x32xf32>
    %c0_205 = arith.constant 0 : index
    %c0_206 = arith.constant 0 : index
    %c0_207 = arith.constant 0 : index
    %273 = vector.load %arg24[%c0_205, %c0_206, %c0_207] : memref<2x1x32xf32, #tpu.memory_space<vmem>>, vector<1x1x32xf32>
    %274 = vector.shape_cast %273 : vector<1x1x32xf32> to vector<1x32xf32>
    %cst_208 = arith.constant dense<0.000000e+00> : vector<8xf32>
    %275 = vector.multi_reduction <add>, %270, %cst_208 [1] : vector<8x32xf32> to vector<8xf32>
    %276 = vector.shape_cast %275 : vector<8xf32> to vector<8x1xf32>
    %cst_209 = arith.constant 3.200000e+01 : f32
    %277 = vector.broadcast %cst_209 : f32 to vector<8x1xf32>
    %278 = arith.divf %276, %277 : vector<8x1xf32>
    %279 = vector.broadcast %278 : vector<8x1xf32> to vector<8x32xf32>
    %280 = arith.subf %270, %279 : vector<8x32xf32>
    %281 = arith.mulf %280, %280 : vector<8x32xf32>
    %cst_210 = arith.constant dense<0.000000e+00> : vector<8xf32>
    %282 = vector.multi_reduction <add>, %281, %cst_210 [1] : vector<8x32xf32> to vector<8xf32>
    %283 = vector.shape_cast %282 : vector<8xf32> to vector<8x1xf32>
    %cst_211 = arith.constant 3.200000e+01 : f32
    %284 = vector.broadcast %cst_211 : f32 to vector<8x1xf32>
    %285 = arith.divf %283, %284 : vector<8x1xf32>
    %286 = vector.broadcast %278 : vector<8x1xf32> to vector<8x32xf32>
    %287 = arith.subf %270, %286 : vector<8x32xf32>
    %cst_212 = arith.constant 9.99999996E-13 : f32
    %288 = vector.broadcast %cst_212 : f32 to vector<8x1xf32>
    %289 = arith.addf %285, %288 : vector<8x1xf32>
    %290 = math.rsqrt %289 : vector<8x1xf32>
    %291 = vector.broadcast %290 : vector<8x1xf32> to vector<8x32xf32>
    %292 = arith.mulf %287, %291 : vector<8x32xf32>
    %293 = vector.broadcast %272 : vector<1x32xf32> to vector<8x32xf32>
    %294 = arith.mulf %292, %293 : vector<8x32xf32>
    %295 = vector.broadcast %274 : vector<1x32xf32> to vector<8x32xf32>
    %296 = arith.addf %294, %295 : vector<8x32xf32>
    %c1_213 = arith.constant 1 : index
    %c0_214 = arith.constant 0 : index
    %c0_215 = arith.constant 0 : index
    %c0_216 = arith.constant 0 : index
    %297 = vector.load %arg9[%c1_213, %c0_214, %c0_215, %c0_216] : memref<2x4x32x8xf32, #tpu.memory_space<vmem>>, vector<1x1x32x8xf32>
    %298 = vector.shape_cast %297 : vector<1x1x32x8xf32> to vector<32x8xf32>
    %cst_217 = arith.constant dense<0.000000e+00> : vector<8x8xf32>
    %299 = tpu.matmul %296, %298, %cst_217 {dimension_numbers = #tpu.dot_dimension_numbers<[1], [0], [0], [1], [0, 0, 1, 1], [], []>} : vector<8x32xf32>, vector<32x8xf32>, vector<8x8xf32> -> vector<8x8xf32>
    %c1_218 = arith.constant 1 : index
    %c0_219 = arith.constant 0 : index
    %c0_220 = arith.constant 0 : index
    %c0_221 = arith.constant 0 : index
    %300 = vector.load %arg10[%c1_218, %c0_219, %c0_220, %c0_221] : memref<2x4x1x8xf32, #tpu.memory_space<vmem>>, vector<1x1x1x8xf32>
    %301 = vector.shape_cast %300 : vector<1x1x1x8xf32> to vector<1x8xf32>
    %302 = vector.broadcast %301 : vector<1x8xf32> to vector<8x8xf32>
    %303 = arith.addf %299, %302 : vector<8x8xf32>
    %c1_222 = arith.constant 1 : index
    %c0_223 = arith.constant 0 : index
    %c0_224 = arith.constant 0 : index
    %c0_225 = arith.constant 0 : index
    %304 = vector.load %arg11[%c1_222, %c0_223, %c0_224, %c0_225] : memref<2x4x32x8xf32, #tpu.memory_space<vmem>>, vector<1x1x32x8xf32>
    %305 = vector.shape_cast %304 : vector<1x1x32x8xf32> to vector<32x8xf32>
    %cst_226 = arith.constant dense<0.000000e+00> : vector<8x8xf32>
    %306 = tpu.matmul %296, %305, %cst_226 {dimension_numbers = #tpu.dot_dimension_numbers<[1], [0], [0], [1], [0, 0, 1, 1], [], []>} : vector<8x32xf32>, vector<32x8xf32>, vector<8x8xf32> -> vector<8x8xf32>
    %c1_227 = arith.constant 1 : index
    %c0_228 = arith.constant 0 : index
    %c0_229 = arith.constant 0 : index
    %c0_230 = arith.constant 0 : index
    %307 = vector.load %arg12[%c1_227, %c0_228, %c0_229, %c0_230] : memref<2x4x1x8xf32, #tpu.memory_space<vmem>>, vector<1x1x1x8xf32>
    %308 = vector.shape_cast %307 : vector<1x1x1x8xf32> to vector<1x8xf32>
    %309 = vector.broadcast %308 : vector<1x8xf32> to vector<8x8xf32>
    %310 = arith.addf %306, %309 : vector<8x8xf32>
    %c1_231 = arith.constant 1 : index
    %c0_232 = arith.constant 0 : index
    %c0_233 = arith.constant 0 : index
    %c0_234 = arith.constant 0 : index
    %311 = vector.load %arg13[%c1_231, %c0_232, %c0_233, %c0_234] : memref<2x4x32x8xf32, #tpu.memory_space<vmem>>, vector<1x1x32x8xf32>
    %312 = vector.shape_cast %311 : vector<1x1x32x8xf32> to vector<32x8xf32>
    %cst_235 = arith.constant dense<0.000000e+00> : vector<8x8xf32>
    %313 = tpu.matmul %296, %312, %cst_235 {dimension_numbers = #tpu.dot_dimension_numbers<[1], [0], [0], [1], [0, 0, 1, 1], [], []>} : vector<8x32xf32>, vector<32x8xf32>, vector<8x8xf32> -> vector<8x8xf32>
    %c1_236 = arith.constant 1 : index
    %c0_237 = arith.constant 0 : index
    %c0_238 = arith.constant 0 : index
    %c0_239 = arith.constant 0 : index
    %314 = vector.load %arg14[%c1_236, %c0_237, %c0_238, %c0_239] : memref<2x4x1x8xf32, #tpu.memory_space<vmem>>, vector<1x1x1x8xf32>
    %315 = vector.shape_cast %314 : vector<1x1x1x8xf32> to vector<1x8xf32>
    %316 = vector.broadcast %315 : vector<1x8xf32> to vector<8x8xf32>
    %317 = arith.addf %313, %316 : vector<8x8xf32>
    %cst_240 = arith.constant dense<0.000000e+00> : vector<8x8xf32>
    %318 = tpu.matmul %303, %310, %cst_240 {dimension_numbers = #tpu.dot_dimension_numbers<[1], [1], [0], [0], [0, 0, 1, 0], [], []>} : vector<8x8xf32>, vector<8x8xf32>, vector<8x8xf32> -> vector<8x8xf32>
    %cst_241 = arith.constant 0.353553385 : f32
    %319 = vector.broadcast %cst_241 : f32 to vector<8x8xf32>
    %320 = arith.mulf %318, %319 : vector<8x8xf32>
    %321 = vector.broadcast %48 : vector<1x8xf32> to vector<8x8xf32>
    %322 = arith.addf %320, %321 : vector<8x8xf32>
    %cst_242 = arith.constant dense<0xFF800000> : vector<8xf32>
    %323 = vector.multi_reduction <maximumf>, %322, %cst_242 [1] : vector<8x8xf32> to vector<8xf32>
    %324 = vector.shape_cast %323 : vector<8xf32> to vector<8x1xf32>
    %325 = vector.broadcast %324 : vector<8x1xf32> to vector<8x8xf32>
    %326 = arith.subf %322, %325 : vector<8x8xf32>
    %327 = math.exp %326 : vector<8x8xf32>
    %cst_243 = arith.constant dense<0.000000e+00> : vector<8xf32>
    %328 = vector.multi_reduction <add>, %327, %cst_243 [1] : vector<8x8xf32> to vector<8xf32>
    %329 = vector.shape_cast %328 : vector<8xf32> to vector<8x1xf32>
    %330 = tpu.reciprocal %329 {approx = true} : vector<8x1xf32> -> vector<8x1xf32>
    %331 = vector.broadcast %330 : vector<8x1xf32> to vector<8x8xf32>
    %332 = arith.mulf %327, %331 : vector<8x8xf32>
    %cst_244 = arith.constant dense<0.000000e+00> : vector<8x8xf32>
    %333 = tpu.matmul %332, %317, %cst_244 {dimension_numbers = #tpu.dot_dimension_numbers<[1], [0], [0], [1], [0, 0, 1, 1], [], []>} : vector<8x8xf32>, vector<8x8xf32>, vector<8x8xf32> -> vector<8x8xf32>
    %c1_245 = arith.constant 1 : index
    %c0_246 = arith.constant 0 : index
    %c0_247 = arith.constant 0 : index
    %c0_248 = arith.constant 0 : index
    %334 = vector.load %arg15[%c1_245, %c0_246, %c0_247, %c0_248] : memref<2x4x8x32xf32, #tpu.memory_space<vmem>>, vector<1x1x8x32xf32>
    %335 = vector.shape_cast %334 : vector<1x1x8x32xf32> to vector<8x32xf32>
    %cst_249 = arith.constant dense<0.000000e+00> : vector<8x32xf32>
    %336 = tpu.matmul %333, %335, %cst_249 {dimension_numbers = #tpu.dot_dimension_numbers<[1], [0], [0], [1], [0, 0, 1, 1], [], []>} : vector<8x8xf32>, vector<8x32xf32>, vector<8x32xf32> -> vector<8x32xf32>
    %c1_250 = arith.constant 1 : index
    %c1_251 = arith.constant 1 : index
    %c0_252 = arith.constant 0 : index
    %c0_253 = arith.constant 0 : index
    %337 = vector.load %arg9[%c1_250, %c1_251, %c0_252, %c0_253] : memref<2x4x32x8xf32, #tpu.memory_space<vmem>>, vector<1x1x32x8xf32>
    %338 = vector.shape_cast %337 : vector<1x1x32x8xf32> to vector<32x8xf32>
    %cst_254 = arith.constant dense<0.000000e+00> : vector<8x8xf32>
    %339 = tpu.matmul %296, %338, %cst_254 {dimension_numbers = #tpu.dot_dimension_numbers<[1], [0], [0], [1], [0, 0, 1, 1], [], []>} : vector<8x32xf32>, vector<32x8xf32>, vector<8x8xf32> -> vector<8x8xf32>
    %c1_255 = arith.constant 1 : index
    %c1_256 = arith.constant 1 : index
    %c0_257 = arith.constant 0 : index
    %c0_258 = arith.constant 0 : index
    %340 = vector.load %arg10[%c1_255, %c1_256, %c0_257, %c0_258] : memref<2x4x1x8xf32, #tpu.memory_space<vmem>>, vector<1x1x1x8xf32>
    %341 = vector.shape_cast %340 : vector<1x1x1x8xf32> to vector<1x8xf32>
    %342 = vector.broadcast %341 : vector<1x8xf32> to vector<8x8xf32>
    %343 = arith.addf %339, %342 : vector<8x8xf32>
    %c1_259 = arith.constant 1 : index
    %c1_260 = arith.constant 1 : index
    %c0_261 = arith.constant 0 : index
    %c0_262 = arith.constant 0 : index
    %344 = vector.load %arg11[%c1_259, %c1_260, %c0_261, %c0_262] : memref<2x4x32x8xf32, #tpu.memory_space<vmem>>, vector<1x1x32x8xf32>
    %345 = vector.shape_cast %344 : vector<1x1x32x8xf32> to vector<32x8xf32>
    %cst_263 = arith.constant dense<0.000000e+00> : vector<8x8xf32>
    %346 = tpu.matmul %296, %345, %cst_263 {dimension_numbers = #tpu.dot_dimension_numbers<[1], [0], [0], [1], [0, 0, 1, 1], [], []>} : vector<8x32xf32>, vector<32x8xf32>, vector<8x8xf32> -> vector<8x8xf32>
    %c1_264 = arith.constant 1 : index
    %c1_265 = arith.constant 1 : index
    %c0_266 = arith.constant 0 : index
    %c0_267 = arith.constant 0 : index
    %347 = vector.load %arg12[%c1_264, %c1_265, %c0_266, %c0_267] : memref<2x4x1x8xf32, #tpu.memory_space<vmem>>, vector<1x1x1x8xf32>
    %348 = vector.shape_cast %347 : vector<1x1x1x8xf32> to vector<1x8xf32>
    %349 = vector.broadcast %348 : vector<1x8xf32> to vector<8x8xf32>
    %350 = arith.addf %346, %349 : vector<8x8xf32>
    %c1_268 = arith.constant 1 : index
    %c1_269 = arith.constant 1 : index
    %c0_270 = arith.constant 0 : index
    %c0_271 = arith.constant 0 : index
    %351 = vector.load %arg13[%c1_268, %c1_269, %c0_270, %c0_271] : memref<2x4x32x8xf32, #tpu.memory_space<vmem>>, vector<1x1x32x8xf32>
    %352 = vector.shape_cast %351 : vector<1x1x32x8xf32> to vector<32x8xf32>
    %cst_272 = arith.constant dense<0.000000e+00> : vector<8x8xf32>
    %353 = tpu.matmul %296, %352, %cst_272 {dimension_numbers = #tpu.dot_dimension_numbers<[1], [0], [0], [1], [0, 0, 1, 1], [], []>} : vector<8x32xf32>, vector<32x8xf32>, vector<8x8xf32> -> vector<8x8xf32>
    %c1_273 = arith.constant 1 : index
    %c1_274 = arith.constant 1 : index
    %c0_275 = arith.constant 0 : index
    %c0_276 = arith.constant 0 : index
    %354 = vector.load %arg14[%c1_273, %c1_274, %c0_275, %c0_276] : memref<2x4x1x8xf32, #tpu.memory_space<vmem>>, vector<1x1x1x8xf32>
    %355 = vector.shape_cast %354 : vector<1x1x1x8xf32> to vector<1x8xf32>
    %356 = vector.broadcast %355 : vector<1x8xf32> to vector<8x8xf32>
    %357 = arith.addf %353, %356 : vector<8x8xf32>
    %cst_277 = arith.constant dense<0.000000e+00> : vector<8x8xf32>
    %358 = tpu.matmul %343, %350, %cst_277 {dimension_numbers = #tpu.dot_dimension_numbers<[1], [1], [0], [0], [0, 0, 1, 0], [], []>} : vector<8x8xf32>, vector<8x8xf32>, vector<8x8xf32> -> vector<8x8xf32>
    %cst_278 = arith.constant 0.353553385 : f32
    %359 = vector.broadcast %cst_278 : f32 to vector<8x8xf32>
    %360 = arith.mulf %358, %359 : vector<8x8xf32>
    %361 = vector.broadcast %48 : vector<1x8xf32> to vector<8x8xf32>
    %362 = arith.addf %360, %361 : vector<8x8xf32>
    %cst_279 = arith.constant dense<0xFF800000> : vector<8xf32>
    %363 = vector.multi_reduction <maximumf>, %362, %cst_279 [1] : vector<8x8xf32> to vector<8xf32>
    %364 = vector.shape_cast %363 : vector<8xf32> to vector<8x1xf32>
    %365 = vector.broadcast %364 : vector<8x1xf32> to vector<8x8xf32>
    %366 = arith.subf %362, %365 : vector<8x8xf32>
    %367 = math.exp %366 : vector<8x8xf32>
    %cst_280 = arith.constant dense<0.000000e+00> : vector<8xf32>
    %368 = vector.multi_reduction <add>, %367, %cst_280 [1] : vector<8x8xf32> to vector<8xf32>
    %369 = vector.shape_cast %368 : vector<8xf32> to vector<8x1xf32>
    %370 = tpu.reciprocal %369 {approx = true} : vector<8x1xf32> -> vector<8x1xf32>
    %371 = vector.broadcast %370 : vector<8x1xf32> to vector<8x8xf32>
    %372 = arith.mulf %367, %371 : vector<8x8xf32>
    %cst_281 = arith.constant dense<0.000000e+00> : vector<8x8xf32>
    %373 = tpu.matmul %372, %357, %cst_281 {dimension_numbers = #tpu.dot_dimension_numbers<[1], [0], [0], [1], [0, 0, 1, 1], [], []>} : vector<8x8xf32>, vector<8x8xf32>, vector<8x8xf32> -> vector<8x8xf32>
    %c1_282 = arith.constant 1 : index
    %c1_283 = arith.constant 1 : index
    %c0_284 = arith.constant 0 : index
    %c0_285 = arith.constant 0 : index
    %374 = vector.load %arg15[%c1_282, %c1_283, %c0_284, %c0_285] : memref<2x4x8x32xf32, #tpu.memory_space<vmem>>, vector<1x1x8x32xf32>
    %375 = vector.shape_cast %374 : vector<1x1x8x32xf32> to vector<8x32xf32>
    %cst_286 = arith.constant dense<0.000000e+00> : vector<8x32xf32>
    %376 = tpu.matmul %373, %375, %cst_286 {dimension_numbers = #tpu.dot_dimension_numbers<[1], [0], [0], [1], [0, 0, 1, 1], [], []>} : vector<8x8xf32>, vector<8x32xf32>, vector<8x32xf32> -> vector<8x32xf32>
    %377 = arith.addf %336, %376 : vector<8x32xf32>
    %c1_287 = arith.constant 1 : index
    %c2_288 = arith.constant 2 : index
    %c0_289 = arith.constant 0 : index
    %c0_290 = arith.constant 0 : index
    %378 = vector.load %arg9[%c1_287, %c2_288, %c0_289, %c0_290] : memref<2x4x32x8xf32, #tpu.memory_space<vmem>>, vector<1x1x32x8xf32>
    %379 = vector.shape_cast %378 : vector<1x1x32x8xf32> to vector<32x8xf32>
    %cst_291 = arith.constant dense<0.000000e+00> : vector<8x8xf32>
    %380 = tpu.matmul %296, %379, %cst_291 {dimension_numbers = #tpu.dot_dimension_numbers<[1], [0], [0], [1], [0, 0, 1, 1], [], []>} : vector<8x32xf32>, vector<32x8xf32>, vector<8x8xf32> -> vector<8x8xf32>
    %c1_292 = arith.constant 1 : index
    %c2_293 = arith.constant 2 : index
    %c0_294 = arith.constant 0 : index
    %c0_295 = arith.constant 0 : index
    %381 = vector.load %arg10[%c1_292, %c2_293, %c0_294, %c0_295] : memref<2x4x1x8xf32, #tpu.memory_space<vmem>>, vector<1x1x1x8xf32>
    %382 = vector.shape_cast %381 : vector<1x1x1x8xf32> to vector<1x8xf32>
    %383 = vector.broadcast %382 : vector<1x8xf32> to vector<8x8xf32>
    %384 = arith.addf %380, %383 : vector<8x8xf32>
    %c1_296 = arith.constant 1 : index
    %c2_297 = arith.constant 2 : index
    %c0_298 = arith.constant 0 : index
    %c0_299 = arith.constant 0 : index
    %385 = vector.load %arg11[%c1_296, %c2_297, %c0_298, %c0_299] : memref<2x4x32x8xf32, #tpu.memory_space<vmem>>, vector<1x1x32x8xf32>
    %386 = vector.shape_cast %385 : vector<1x1x32x8xf32> to vector<32x8xf32>
    %cst_300 = arith.constant dense<0.000000e+00> : vector<8x8xf32>
    %387 = tpu.matmul %296, %386, %cst_300 {dimension_numbers = #tpu.dot_dimension_numbers<[1], [0], [0], [1], [0, 0, 1, 1], [], []>} : vector<8x32xf32>, vector<32x8xf32>, vector<8x8xf32> -> vector<8x8xf32>
    %c1_301 = arith.constant 1 : index
    %c2_302 = arith.constant 2 : index
    %c0_303 = arith.constant 0 : index
    %c0_304 = arith.constant 0 : index
    %388 = vector.load %arg12[%c1_301, %c2_302, %c0_303, %c0_304] : memref<2x4x1x8xf32, #tpu.memory_space<vmem>>, vector<1x1x1x8xf32>
    %389 = vector.shape_cast %388 : vector<1x1x1x8xf32> to vector<1x8xf32>
    %390 = vector.broadcast %389 : vector<1x8xf32> to vector<8x8xf32>
    %391 = arith.addf %387, %390 : vector<8x8xf32>
    %c1_305 = arith.constant 1 : index
    %c2_306 = arith.constant 2 : index
    %c0_307 = arith.constant 0 : index
    %c0_308 = arith.constant 0 : index
    %392 = vector.load %arg13[%c1_305, %c2_306, %c0_307, %c0_308] : memref<2x4x32x8xf32, #tpu.memory_space<vmem>>, vector<1x1x32x8xf32>
    %393 = vector.shape_cast %392 : vector<1x1x32x8xf32> to vector<32x8xf32>
    %cst_309 = arith.constant dense<0.000000e+00> : vector<8x8xf32>
    %394 = tpu.matmul %296, %393, %cst_309 {dimension_numbers = #tpu.dot_dimension_numbers<[1], [0], [0], [1], [0, 0, 1, 1], [], []>} : vector<8x32xf32>, vector<32x8xf32>, vector<8x8xf32> -> vector<8x8xf32>
    %c1_310 = arith.constant 1 : index
    %c2_311 = arith.constant 2 : index
    %c0_312 = arith.constant 0 : index
    %c0_313 = arith.constant 0 : index
    %395 = vector.load %arg14[%c1_310, %c2_311, %c0_312, %c0_313] : memref<2x4x1x8xf32, #tpu.memory_space<vmem>>, vector<1x1x1x8xf32>
    %396 = vector.shape_cast %395 : vector<1x1x1x8xf32> to vector<1x8xf32>
    %397 = vector.broadcast %396 : vector<1x8xf32> to vector<8x8xf32>
    %398 = arith.addf %394, %397 : vector<8x8xf32>
    %cst_314 = arith.constant dense<0.000000e+00> : vector<8x8xf32>
    %399 = tpu.matmul %384, %391, %cst_314 {dimension_numbers = #tpu.dot_dimension_numbers<[1], [1], [0], [0], [0, 0, 1, 0], [], []>} : vector<8x8xf32>, vector<8x8xf32>, vector<8x8xf32> -> vector<8x8xf32>
    %cst_315 = arith.constant 0.353553385 : f32
    %400 = vector.broadcast %cst_315 : f32 to vector<8x8xf32>
    %401 = arith.mulf %399, %400 : vector<8x8xf32>
    %402 = vector.broadcast %48 : vector<1x8xf32> to vector<8x8xf32>
    %403 = arith.addf %401, %402 : vector<8x8xf32>
    %cst_316 = arith.constant dense<0xFF800000> : vector<8xf32>
    %404 = vector.multi_reduction <maximumf>, %403, %cst_316 [1] : vector<8x8xf32> to vector<8xf32>
    %405 = vector.shape_cast %404 : vector<8xf32> to vector<8x1xf32>
    %406 = vector.broadcast %405 : vector<8x1xf32> to vector<8x8xf32>
    %407 = arith.subf %403, %406 : vector<8x8xf32>
    %408 = math.exp %407 : vector<8x8xf32>
    %cst_317 = arith.constant dense<0.000000e+00> : vector<8xf32>
    %409 = vector.multi_reduction <add>, %408, %cst_317 [1] : vector<8x8xf32> to vector<8xf32>
    %410 = vector.shape_cast %409 : vector<8xf32> to vector<8x1xf32>
    %411 = tpu.reciprocal %410 {approx = true} : vector<8x1xf32> -> vector<8x1xf32>
    %412 = vector.broadcast %411 : vector<8x1xf32> to vector<8x8xf32>
    %413 = arith.mulf %408, %412 : vector<8x8xf32>
    %cst_318 = arith.constant dense<0.000000e+00> : vector<8x8xf32>
    %414 = tpu.matmul %413, %398, %cst_318 {dimension_numbers = #tpu.dot_dimension_numbers<[1], [0], [0], [1], [0, 0, 1, 1], [], []>} : vector<8x8xf32>, vector<8x8xf32>, vector<8x8xf32> -> vector<8x8xf32>
    %c1_319 = arith.constant 1 : index
    %c2_320 = arith.constant 2 : index
    %c0_321 = arith.constant 0 : index
    %c0_322 = arith.constant 0 : index
    %415 = vector.load %arg15[%c1_319, %c2_320, %c0_321, %c0_322] : memref<2x4x8x32xf32, #tpu.memory_space<vmem>>, vector<1x1x8x32xf32>
    %416 = vector.shape_cast %415 : vector<1x1x8x32xf32> to vector<8x32xf32>
    %cst_323 = arith.constant dense<0.000000e+00> : vector<8x32xf32>
    %417 = tpu.matmul %414, %416, %cst_323 {dimension_numbers = #tpu.dot_dimension_numbers<[1], [0], [0], [1], [0, 0, 1, 1], [], []>} : vector<8x8xf32>, vector<8x32xf32>, vector<8x32xf32> -> vector<8x32xf32>
    %418 = arith.addf %377, %417 : vector<8x32xf32>
    %c1_324 = arith.constant 1 : index
    %c3_325 = arith.constant 3 : index
    %c0_326 = arith.constant 0 : index
    %c0_327 = arith.constant 0 : index
    %419 = vector.load %arg9[%c1_324, %c3_325, %c0_326, %c0_327] : memref<2x4x32x8xf32, #tpu.memory_space<vmem>>, vector<1x1x32x8xf32>
    %420 = vector.shape_cast %419 : vector<1x1x32x8xf32> to vector<32x8xf32>
    %cst_328 = arith.constant dense<0.000000e+00> : vector<8x8xf32>
    %421 = tpu.matmul %296, %420, %cst_328 {dimension_numbers = #tpu.dot_dimension_numbers<[1], [0], [0], [1], [0, 0, 1, 1], [], []>} : vector<8x32xf32>, vector<32x8xf32>, vector<8x8xf32> -> vector<8x8xf32>
    %c1_329 = arith.constant 1 : index
    %c3_330 = arith.constant 3 : index
    %c0_331 = arith.constant 0 : index
    %c0_332 = arith.constant 0 : index
    %422 = vector.load %arg10[%c1_329, %c3_330, %c0_331, %c0_332] : memref<2x4x1x8xf32, #tpu.memory_space<vmem>>, vector<1x1x1x8xf32>
    %423 = vector.shape_cast %422 : vector<1x1x1x8xf32> to vector<1x8xf32>
    %424 = vector.broadcast %423 : vector<1x8xf32> to vector<8x8xf32>
    %425 = arith.addf %421, %424 : vector<8x8xf32>
    %c1_333 = arith.constant 1 : index
    %c3_334 = arith.constant 3 : index
    %c0_335 = arith.constant 0 : index
    %c0_336 = arith.constant 0 : index
    %426 = vector.load %arg11[%c1_333, %c3_334, %c0_335, %c0_336] : memref<2x4x32x8xf32, #tpu.memory_space<vmem>>, vector<1x1x32x8xf32>
    %427 = vector.shape_cast %426 : vector<1x1x32x8xf32> to vector<32x8xf32>
    %cst_337 = arith.constant dense<0.000000e+00> : vector<8x8xf32>
    %428 = tpu.matmul %296, %427, %cst_337 {dimension_numbers = #tpu.dot_dimension_numbers<[1], [0], [0], [1], [0, 0, 1, 1], [], []>} : vector<8x32xf32>, vector<32x8xf32>, vector<8x8xf32> -> vector<8x8xf32>
    %c1_338 = arith.constant 1 : index
    %c3_339 = arith.constant 3 : index
    %c0_340 = arith.constant 0 : index
    %c0_341 = arith.constant 0 : index
    %429 = vector.load %arg12[%c1_338, %c3_339, %c0_340, %c0_341] : memref<2x4x1x8xf32, #tpu.memory_space<vmem>>, vector<1x1x1x8xf32>
    %430 = vector.shape_cast %429 : vector<1x1x1x8xf32> to vector<1x8xf32>
    %431 = vector.broadcast %430 : vector<1x8xf32> to vector<8x8xf32>
    %432 = arith.addf %428, %431 : vector<8x8xf32>
    %c1_342 = arith.constant 1 : index
    %c3_343 = arith.constant 3 : index
    %c0_344 = arith.constant 0 : index
    %c0_345 = arith.constant 0 : index
    %433 = vector.load %arg13[%c1_342, %c3_343, %c0_344, %c0_345] : memref<2x4x32x8xf32, #tpu.memory_space<vmem>>, vector<1x1x32x8xf32>
    %434 = vector.shape_cast %433 : vector<1x1x32x8xf32> to vector<32x8xf32>
    %cst_346 = arith.constant dense<0.000000e+00> : vector<8x8xf32>
    %435 = tpu.matmul %296, %434, %cst_346 {dimension_numbers = #tpu.dot_dimension_numbers<[1], [0], [0], [1], [0, 0, 1, 1], [], []>} : vector<8x32xf32>, vector<32x8xf32>, vector<8x8xf32> -> vector<8x8xf32>
    %c1_347 = arith.constant 1 : index
    %c3_348 = arith.constant 3 : index
    %c0_349 = arith.constant 0 : index
    %c0_350 = arith.constant 0 : index
    %436 = vector.load %arg14[%c1_347, %c3_348, %c0_349, %c0_350] : memref<2x4x1x8xf32, #tpu.memory_space<vmem>>, vector<1x1x1x8xf32>
    %437 = vector.shape_cast %436 : vector<1x1x1x8xf32> to vector<1x8xf32>
    %438 = vector.broadcast %437 : vector<1x8xf32> to vector<8x8xf32>
    %439 = arith.addf %435, %438 : vector<8x8xf32>
    %cst_351 = arith.constant dense<0.000000e+00> : vector<8x8xf32>
    %440 = tpu.matmul %425, %432, %cst_351 {dimension_numbers = #tpu.dot_dimension_numbers<[1], [1], [0], [0], [0, 0, 1, 0], [], []>} : vector<8x8xf32>, vector<8x8xf32>, vector<8x8xf32> -> vector<8x8xf32>
    %cst_352 = arith.constant 0.353553385 : f32
    %441 = vector.broadcast %cst_352 : f32 to vector<8x8xf32>
    %442 = arith.mulf %440, %441 : vector<8x8xf32>
    %443 = vector.broadcast %48 : vector<1x8xf32> to vector<8x8xf32>
    %444 = arith.addf %442, %443 : vector<8x8xf32>
    %cst_353 = arith.constant dense<0xFF800000> : vector<8xf32>
    %445 = vector.multi_reduction <maximumf>, %444, %cst_353 [1] : vector<8x8xf32> to vector<8xf32>
    %446 = vector.shape_cast %445 : vector<8xf32> to vector<8x1xf32>
    %447 = vector.broadcast %446 : vector<8x1xf32> to vector<8x8xf32>
    %448 = arith.subf %444, %447 : vector<8x8xf32>
    %449 = math.exp %448 : vector<8x8xf32>
    %cst_354 = arith.constant dense<0.000000e+00> : vector<8xf32>
    %450 = vector.multi_reduction <add>, %449, %cst_354 [1] : vector<8x8xf32> to vector<8xf32>
    %451 = vector.shape_cast %450 : vector<8xf32> to vector<8x1xf32>
    %452 = tpu.reciprocal %451 {approx = true} : vector<8x1xf32> -> vector<8x1xf32>
    %453 = vector.broadcast %452 : vector<8x1xf32> to vector<8x8xf32>
    %454 = arith.mulf %449, %453 : vector<8x8xf32>
    %cst_355 = arith.constant dense<0.000000e+00> : vector<8x8xf32>
    %455 = tpu.matmul %454, %439, %cst_355 {dimension_numbers = #tpu.dot_dimension_numbers<[1], [0], [0], [1], [0, 0, 1, 1], [], []>} : vector<8x8xf32>, vector<8x8xf32>, vector<8x8xf32> -> vector<8x8xf32>
    %c1_356 = arith.constant 1 : index
    %c3_357 = arith.constant 3 : index
    %c0_358 = arith.constant 0 : index
    %c0_359 = arith.constant 0 : index
    %456 = vector.load %arg15[%c1_356, %c3_357, %c0_358, %c0_359] : memref<2x4x8x32xf32, #tpu.memory_space<vmem>>, vector<1x1x8x32xf32>
    %457 = vector.shape_cast %456 : vector<1x1x8x32xf32> to vector<8x32xf32>
    %cst_360 = arith.constant dense<0.000000e+00> : vector<8x32xf32>
    %458 = tpu.matmul %455, %457, %cst_360 {dimension_numbers = #tpu.dot_dimension_numbers<[1], [0], [0], [1], [0, 0, 1, 1], [], []>} : vector<8x8xf32>, vector<8x32xf32>, vector<8x32xf32> -> vector<8x32xf32>
    %459 = arith.addf %418, %458 : vector<8x32xf32>
    %c1_361 = arith.constant 1 : index
    %c0_362 = arith.constant 0 : index
    %c0_363 = arith.constant 0 : index
    %460 = vector.load %arg16[%c1_361, %c0_362, %c0_363] : memref<2x1x32xf32, #tpu.memory_space<vmem>>, vector<1x1x32xf32>
    %461 = vector.shape_cast %460 : vector<1x1x32xf32> to vector<1x32xf32>
    %462 = vector.broadcast %461 : vector<1x32xf32> to vector<8x32xf32>
    %463 = arith.addf %459, %462 : vector<8x32xf32>
    %464 = arith.addf %463, %296 : vector<8x32xf32>
    %c1_364 = arith.constant 1 : index
    %c0_365 = arith.constant 0 : index
    %c0_366 = arith.constant 0 : index
    %465 = vector.load %arg17[%c1_364, %c0_365, %c0_366] : memref<2x1x32xf32, #tpu.memory_space<vmem>>, vector<1x1x32xf32>
    %466 = vector.shape_cast %465 : vector<1x1x32xf32> to vector<1x32xf32>
    %c1_367 = arith.constant 1 : index
    %c0_368 = arith.constant 0 : index
    %c0_369 = arith.constant 0 : index
    %467 = vector.load %arg18[%c1_367, %c0_368, %c0_369] : memref<2x1x32xf32, #tpu.memory_space<vmem>>, vector<1x1x32xf32>
    %468 = vector.shape_cast %467 : vector<1x1x32xf32> to vector<1x32xf32>
    %cst_370 = arith.constant dense<0.000000e+00> : vector<8xf32>
    %469 = vector.multi_reduction <add>, %464, %cst_370 [1] : vector<8x32xf32> to vector<8xf32>
    %470 = vector.shape_cast %469 : vector<8xf32> to vector<8x1xf32>
    %cst_371 = arith.constant 3.200000e+01 : f32
    %471 = vector.broadcast %cst_371 : f32 to vector<8x1xf32>
    %472 = arith.divf %470, %471 : vector<8x1xf32>
    %473 = vector.broadcast %472 : vector<8x1xf32> to vector<8x32xf32>
    %474 = arith.subf %464, %473 : vector<8x32xf32>
    %475 = arith.mulf %474, %474 : vector<8x32xf32>
    %cst_372 = arith.constant dense<0.000000e+00> : vector<8xf32>
    %476 = vector.multi_reduction <add>, %475, %cst_372 [1] : vector<8x32xf32> to vector<8xf32>
    %477 = vector.shape_cast %476 : vector<8xf32> to vector<8x1xf32>
    %cst_373 = arith.constant 3.200000e+01 : f32
    %478 = vector.broadcast %cst_373 : f32 to vector<8x1xf32>
    %479 = arith.divf %477, %478 : vector<8x1xf32>
    %480 = vector.broadcast %472 : vector<8x1xf32> to vector<8x32xf32>
    %481 = arith.subf %464, %480 : vector<8x32xf32>
    %cst_374 = arith.constant 9.99999996E-13 : f32
    %482 = vector.broadcast %cst_374 : f32 to vector<8x1xf32>
    %483 = arith.addf %479, %482 : vector<8x1xf32>
    %484 = math.rsqrt %483 : vector<8x1xf32>
    %485 = vector.broadcast %484 : vector<8x1xf32> to vector<8x32xf32>
    %486 = arith.mulf %481, %485 : vector<8x32xf32>
    %487 = vector.broadcast %466 : vector<1x32xf32> to vector<8x32xf32>
    %488 = arith.mulf %486, %487 : vector<8x32xf32>
    %489 = vector.broadcast %468 : vector<1x32xf32> to vector<8x32xf32>
    %490 = arith.addf %488, %489 : vector<8x32xf32>
    %c1_375 = arith.constant 1 : index
    %c0_376 = arith.constant 0 : index
    %c0_377 = arith.constant 0 : index
    %491 = vector.load %arg19[%c1_375, %c0_376, %c0_377] : memref<2x32x128xf32, #tpu.memory_space<vmem>>, vector<1x32x128xf32>
    %492 = vector.shape_cast %491 : vector<1x32x128xf32> to vector<32x128xf32>
    %cst_378 = arith.constant dense<0.000000e+00> : vector<8x128xf32>
    %493 = tpu.matmul %490, %492, %cst_378 {dimension_numbers = #tpu.dot_dimension_numbers<[1], [0], [0], [1], [0, 0, 1, 1], [], []>} : vector<8x32xf32>, vector<32x128xf32>, vector<8x128xf32> -> vector<8x128xf32>
    %c1_379 = arith.constant 1 : index
    %c0_380 = arith.constant 0 : index
    %c0_381 = arith.constant 0 : index
    %494 = vector.load %arg20[%c1_379, %c0_380, %c0_381] : memref<2x1x128xf32, #tpu.memory_space<vmem>>, vector<1x1x128xf32>
    %495 = vector.shape_cast %494 : vector<1x1x128xf32> to vector<1x128xf32>
    %496 = vector.broadcast %495 : vector<1x128xf32> to vector<8x128xf32>
    %497 = arith.addf %493, %496 : vector<8x128xf32>
    %cst_382 = arith.constant 5.000000e-01 : f32
    %498 = vector.broadcast %cst_382 : f32 to vector<8x128xf32>
    %499 = arith.mulf %498, %497 : vector<8x128xf32>
    %cst_383 = arith.constant 4.471500e-02 : f32
    %500 = vector.broadcast %cst_383 : f32 to vector<8x128xf32>
    %501 = arith.mulf %500, %497 : vector<8x128xf32>
    %502 = arith.mulf %501, %497 : vector<8x128xf32>
    %503 = arith.mulf %502, %497 : vector<8x128xf32>
    %504 = arith.addf %497, %503 : vector<8x128xf32>
    %cst_384 = arith.constant 0.797884583 : f32
    %505 = vector.broadcast %cst_384 : f32 to vector<8x128xf32>
    %506 = arith.mulf %505, %504 : vector<8x128xf32>
    %507 = math.tanh %506 : vector<8x128xf32>
    %cst_385 = arith.constant 1.000000e+00 : f32
    %508 = vector.broadcast %cst_385 : f32 to vector<8x128xf32>
    %509 = arith.addf %508, %507 : vector<8x128xf32>
    %510 = arith.mulf %499, %509 : vector<8x128xf32>
    %c1_386 = arith.constant 1 : index
    %c0_387 = arith.constant 0 : index
    %c0_388 = arith.constant 0 : index
    %511 = vector.load %arg21[%c1_386, %c0_387, %c0_388] : memref<2x128x32xf32, #tpu.memory_space<vmem>>, vector<1x128x32xf32>
    %512 = vector.shape_cast %511 : vector<1x128x32xf32> to vector<128x32xf32>
    %cst_389 = arith.constant dense<0.000000e+00> : vector<8x32xf32>
    %513 = tpu.matmul %510, %512, %cst_389 {dimension_numbers = #tpu.dot_dimension_numbers<[1], [0], [0], [1], [0, 0, 1, 1], [], []>} : vector<8x128xf32>, vector<128x32xf32>, vector<8x32xf32> -> vector<8x32xf32>
    %c1_390 = arith.constant 1 : index
    %c0_391 = arith.constant 0 : index
    %c0_392 = arith.constant 0 : index
    %514 = vector.load %arg22[%c1_390, %c0_391, %c0_392] : memref<2x1x32xf32, #tpu.memory_space<vmem>>, vector<1x1x32xf32>
    %515 = vector.shape_cast %514 : vector<1x1x32xf32> to vector<1x32xf32>
    %516 = vector.broadcast %515 : vector<1x32xf32> to vector<8x32xf32>
    %517 = arith.addf %513, %516 : vector<8x32xf32>
    %518 = arith.addf %517, %490 : vector<8x32xf32>
    %c1_393 = arith.constant 1 : index
    %c0_394 = arith.constant 0 : index
    %c0_395 = arith.constant 0 : index
    %519 = vector.load %arg23[%c1_393, %c0_394, %c0_395] : memref<2x1x32xf32, #tpu.memory_space<vmem>>, vector<1x1x32xf32>
    %520 = vector.shape_cast %519 : vector<1x1x32xf32> to vector<1x32xf32>
    %c1_396 = arith.constant 1 : index
    %c0_397 = arith.constant 0 : index
    %c0_398 = arith.constant 0 : index
    %521 = vector.load %arg24[%c1_396, %c0_397, %c0_398] : memref<2x1x32xf32, #tpu.memory_space<vmem>>, vector<1x1x32xf32>
    %522 = vector.shape_cast %521 : vector<1x1x32xf32> to vector<1x32xf32>
    %cst_399 = arith.constant dense<0.000000e+00> : vector<8xf32>
    %523 = vector.multi_reduction <add>, %518, %cst_399 [1] : vector<8x32xf32> to vector<8xf32>
    %524 = vector.shape_cast %523 : vector<8xf32> to vector<8x1xf32>
    %cst_400 = arith.constant 3.200000e+01 : f32
    %525 = vector.broadcast %cst_400 : f32 to vector<8x1xf32>
    %526 = arith.divf %524, %525 : vector<8x1xf32>
    %527 = vector.broadcast %526 : vector<8x1xf32> to vector<8x32xf32>
    %528 = arith.subf %518, %527 : vector<8x32xf32>
    %529 = arith.mulf %528, %528 : vector<8x32xf32>
    %cst_401 = arith.constant dense<0.000000e+00> : vector<8xf32>
    %530 = vector.multi_reduction <add>, %529, %cst_401 [1] : vector<8x32xf32> to vector<8xf32>
    %531 = vector.shape_cast %530 : vector<8xf32> to vector<8x1xf32>
    %cst_402 = arith.constant 3.200000e+01 : f32
    %532 = vector.broadcast %cst_402 : f32 to vector<8x1xf32>
    %533 = arith.divf %531, %532 : vector<8x1xf32>
    %534 = vector.broadcast %526 : vector<8x1xf32> to vector<8x32xf32>
    %535 = arith.subf %518, %534 : vector<8x32xf32>
    %cst_403 = arith.constant 9.99999996E-13 : f32
    %536 = vector.broadcast %cst_403 : f32 to vector<8x1xf32>
    %537 = arith.addf %533, %536 : vector<8x1xf32>
    %538 = math.rsqrt %537 : vector<8x1xf32>
    %539 = vector.broadcast %538 : vector<8x1xf32> to vector<8x32xf32>
    %540 = arith.mulf %535, %539 : vector<8x32xf32>
    %541 = vector.broadcast %520 : vector<1x32xf32> to vector<8x32xf32>
    %542 = arith.mulf %540, %541 : vector<8x32xf32>
    %543 = vector.broadcast %522 : vector<1x32xf32> to vector<8x32xf32>
    %544 = arith.addf %542, %543 : vector<8x32xf32>
    %c0_404 = arith.constant 0 : index
    %c0_405 = arith.constant 0 : index
    %545 = vector.load %arg25[%c0_404, %c0_405] : memref<32x128xf32, #tpu.memory_space<vmem>>, vector<32x128xf32>
    %cst_406 = arith.constant dense<0.000000e+00> : vector<8x128xf32>
    %546 = tpu.matmul %544, %545, %cst_406 {dimension_numbers = #tpu.dot_dimension_numbers<[1], [0], [0], [1], [0, 0, 1, 1], [], []>} : vector<8x32xf32>, vector<32x128xf32>, vector<8x128xf32> -> vector<8x128xf32>
    %c0_407 = arith.constant 0 : index
    %c0_408 = arith.constant 0 : index
    %547 = vector.load %arg26[%c0_407, %c0_408] : memref<1x128xf32, #tpu.memory_space<vmem>>, vector<1x128xf32>
    %548 = vector.broadcast %547 : vector<1x128xf32> to vector<8x128xf32>
    %549 = arith.addf %546, %548 : vector<8x128xf32>
    %c0_409 = arith.constant 0 : index
    %c0_410 = arith.constant 0 : index
    %550 = vector.load %arg27[%c0_409, %c0_410] : memref<8x128xf32, #tpu.memory_space<vmem>>, vector<8x128xf32>
    tpu.vector_store %arg27[%c0_409, %c0_410], %549 {strides = array<i32>} : memref<8x128xf32, #tpu.memory_space<vmem>>, vector<8x128xf32>,
    return
  }
  func.func @transform_0(%arg0: i32) -> (i32, i32) {
    %c0_i32 = arith.constant 0 : i32
    %c0_i32_0 = arith.constant 0 : i32
    return %arg0, %c0_i32 : i32, i32
  }
  func.func @transform_1(%arg0: i32) -> (i32, i32) {
    %c0_i32 = arith.constant 0 : i32
    %c0_i32_0 = arith.constant 0 : i32
    return %arg0, %c0_i32 : i32, i32
  }
  func.func @transform_2(%arg0: i32) -> (i32, i32) {
    %c0_i32 = arith.constant 0 : i32
    %c0_i32_0 = arith.constant 0 : i32
    return %arg0, %c0_i32 : i32, i32
  }
  func.func @transform_3(%arg0: i32) -> (i32, i32, i32) {
    %c0_i32 = arith.constant 0 : i32
    %c0_i32_0 = arith.constant 0 : i32
    %c0_i32_1 = arith.constant 0 : i32
    return %arg0, %c0_i32, %c0_i32_0 : i32, i32, i32
  }
  func.func @transform_4(%arg0: i32) -> (i32, i32) {
    %c0_i32 = arith.constant 0 : i32
    %c0_i32_0 = arith.constant 0 : i32
    %c0_i32_1 = arith.constant 0 : i32
    return %c0_i32, %c0_i32_0 : i32, i32
  }
  func.func @transform_5(%arg0: i32) -> (i32, i32) {
    %c0_i32 = arith.constant 0 : i32
    %c0_i32_0 = arith.constant 0 : i32
    %c0_i32_1 = arith.constant 0 : i32
    return %c0_i32, %c0_i32_0 : i32, i32
  }
  func.func @transform_6(%arg0: i32) -> (i32, i32) {
    %c0_i32 = arith.constant 0 : i32
    %c0_i32_0 = arith.constant 0 : i32
    %c0_i32_1 = arith.constant 0 : i32
    return %c0_i32, %c0_i32_0 : i32, i32
  }
  func.func @transform_7(%arg0: i32) -> (i32, i32) {
    %c0_i32 = arith.constant 0 : i32
    %c0_i32_0 = arith.constant 0 : i32
    %c0_i32_1 = arith.constant 0 : i32
    return %c0_i32, %c0_i32_0 : i32, i32
  }
  func.func @transform_8(%arg0: i32) -> (i32, i32, i32, i32) {
    %c0_i32 = arith.constant 0 : i32
    %c0_i32_0 = arith.constant 0 : i32
    %c0_i32_1 = arith.constant 0 : i32
    %c0_i32_2 = arith.constant 0 : i32
    %c0_i32_3 = arith.constant 0 : i32
    return %c0_i32, %c0_i32_0, %c0_i32_1, %c0_i32_2 : i32, i32, i32, i32
  }
  func.func @transform_9(%arg0: i32) -> (i32, i32, i32, i32) {
    %c0_i32 = arith.constant 0 : i32
    %c0_i32_0 = arith.constant 0 : i32
    %c0_i32_1 = arith.constant 0 : i32
    %c0_i32_2 = arith.constant 0 : i32
    %c0_i32_3 = arith.constant 0 : i32
    return %c0_i32, %c0_i32_0, %c0_i32_1, %c0_i32_2 : i32, i32, i32, i32
  }
  func.func @transform_10(%arg0: i32) -> (i32, i32, i32, i32) {
    %c0_i32 = arith.constant 0 : i32
    %c0_i32_0 = arith.constant 0 : i32
    %c0_i32_1 = arith.constant 0 : i32
    %c0_i32_2 = arith.constant 0 : i32
    %c0_i32_3 = arith.constant 0 : i32
    return %c0_i32, %c0_i32_0, %c0_i32_1, %c0_i32_2 : i32, i32, i32, i32
  }
  func.func @transform_11(%arg0: i32) -> (i32, i32, i32, i32) {
    %c0_i32 = arith.constant 0 : i32
    %c0_i32_0 = arith.constant 0 : i32
    %c0_i32_1 = arith.constant 0 : i32
    %c0_i32_2 = arith.constant 0 : i32
    %c0_i32_3 = arith.constant 0 : i32
    return %c0_i32, %c0_i32_0, %c0_i32_1, %c0_i32_2 : i32, i32, i32, i32
  }
  func.func @transform_12(%arg0: i32) -> (i32, i32, i32, i32) {
    %c0_i32 = arith.constant 0 : i32
    %c0_i32_0 = arith.constant 0 : i32
    %c0_i32_1 = arith.constant 0 : i32
    %c0_i32_2 = arith.constant 0 : i32
    %c0_i32_3 = arith.constant 0 : i32
    return %c0_i32, %c0_i32_0, %c0_i32_1, %c0_i32_2 : i32, i32, i32, i32
  }
  func.func @transform_13(%arg0: i32) -> (i32, i32, i32, i32) {
    %c0_i32 = arith.constant 0 : i32
    %c0_i32_0 = arith.constant 0 : i32
    %c0_i32_1 = arith.constant 0 : i32
    %c0_i32_2 = arith.constant 0 : i32
    %c0_i32_3 = arith.constant 0 : i32
    return %c0_i32, %c0_i32_0, %c0_i32_1, %c0_i32_2 : i32, i32, i32, i32
  }
  func.func @transform_14(%arg0: i32) -> (i32, i32, i32, i32) {
    %c0_i32 = arith.constant 0 : i32
    %c0_i32_0 = arith.constant 0 : i32
    %c0_i32_1 = arith.constant 0 : i32
    %c0_i32_2 = arith.constant 0 : i32
    %c0_i32_3 = arith.constant 0 : i32
    return %c0_i32, %c0_i32_0, %c0_i32_1, %c0_i32_2 : i32, i32, i32, i32
  }
  func.func @transform_15(%arg0: i32) -> (i32, i32, i32) {
    %c0_i32 = arith.constant 0 : i32
    %c0_i32_0 = arith.constant 0 : i32
    %c0_i32_1 = arith.constant 0 : i32
    %c0_i32_2 = arith.constant 0 : i32
    return %c0_i32, %c0_i32_0, %c0_i32_1 : i32, i32, i32
  }
  func.func @transform_16(%arg0: i32) -> (i32, i32, i32) {
    %c0_i32 = arith.constant 0 : i32
    %c0_i32_0 = arith.constant 0 : i32
    %c0_i32_1 = arith.constant 0 : i32
    %c0_i32_2 = arith.constant 0 : i32
    return %c0_i32, %c0_i32_0, %c0_i32_1 : i32, i32, i32
  }
  func.func @transform_17(%arg0: i32) -> (i32, i32, i32) {
    %c0_i32 = arith.constant 0 : i32
    %c0_i32_0 = arith.constant 0 : i32
    %c0_i32_1 = arith.constant 0 : i32
    %c0_i32_2 = arith.constant 0 : i32
    return %c0_i32, %c0_i32_0, %c0_i32_1 : i32, i32, i32
  }
  func.func @transform_18(%arg0: i32) -> (i32, i32, i32) {
    %c0_i32 = arith.constant 0 : i32
    %c0_i32_0 = arith.constant 0 : i32
    %c0_i32_1 = arith.constant 0 : i32
    %c0_i32_2 = arith.constant 0 : i32
    return %c0_i32, %c0_i32_0, %c0_i32_1 : i32, i32, i32
  }
  func.func @transform_19(%arg0: i32) -> (i32, i32, i32) {
    %c0_i32 = arith.constant 0 : i32
    %c0_i32_0 = arith.constant 0 : i32
    %c0_i32_1 = arith.constant 0 : i32
    %c0_i32_2 = arith.constant 0 : i32
    return %c0_i32, %c0_i32_0, %c0_i32_1 : i32, i32, i32
  }
  func.func @transform_20(%arg0: i32) -> (i32, i32, i32) {
    %c0_i32 = arith.constant 0 : i32
    %c0_i32_0 = arith.constant 0 : i32
    %c0_i32_1 = arith.constant 0 : i32
    %c0_i32_2 = arith.constant 0 : i32
    return %c0_i32, %c0_i32_0, %c0_i32_1 : i32, i32, i32
  }
  func.func @transform_21(%arg0: i32) -> (i32, i32, i32) {
    %c0_i32 = arith.constant 0 : i32
    %c0_i32_0 = arith.constant 0 : i32
    %c0_i32_1 = arith.constant 0 : i32
    %c0_i32_2 = arith.constant 0 : i32
    return %c0_i32, %c0_i32_0, %c0_i32_1 : i32, i32, i32
  }
  func.func @transform_22(%arg0: i32) -> (i32, i32, i32) {
    %c0_i32 = arith.constant 0 : i32
    %c0_i32_0 = arith.constant 0 : i32
    %c0_i32_1 = arith.constant 0 : i32
    %c0_i32_2 = arith.constant 0 : i32
    return %c0_i32, %c0_i32_0, %c0_i32_1 : i32, i32, i32
  }
  func.func @transform_23(%arg0: i32) -> (i32, i32, i32) {
    %c0_i32 = arith.constant 0 : i32
    %c0_i32_0 = arith.constant 0 : i32
    %c0_i32_1 = arith.constant 0 : i32
    %c0_i32_2 = arith.constant 0 : i32
    return %c0_i32, %c0_i32_0, %c0_i32_1 : i32, i32, i32
  }
  func.func @transform_24(%arg0: i32) -> (i32, i32) {
    %c0_i32 = arith.constant 0 : i32
    %c0_i32_0 = arith.constant 0 : i32
    %c0_i32_1 = arith.constant 0 : i32
    return %c0_i32, %c0_i32_0 : i32, i32
  }
  func.func @transform_25(%arg0: i32) -> (i32, i32) {
    %c0_i32 = arith.constant 0 : i32
    %c0_i32_0 = arith.constant 0 : i32
    %c0_i32_1 = arith.constant 0 : i32
    return %c0_i32, %c0_i32_0 : i32, i32
  }
  func.func @transform_26(%arg0: i32) -> (i32, i32) {
    %c0_i32 = arith.constant 0 : i32
    %c0_i32_0 = arith.constant 0 : i32
    return %arg0, %c0_i32 : i32, i32
  }
}

</mosaic_0001>

<bundles_post_ra>
// kernel: bert_model_forward.1
= control target key start
LH: loop header
LB: loop body
LE: loop exit
PB: predicated region body
PF: predicated region fallthrough
CT: control target
= control target key end

     0   :  { %s7738_s0 = inlined_call_operand.vmem [shape: f32[16,32], index: 0, kind: input, shape index: {}]   ;;  %s7739_s1 = inlined_call_operand.vmem [shape: f32[16,32], index: 1, kind: input, shape index: {}]   ;;  %s7740_s2 = inlined_call_operand.vmem [shape: f32[16,32], index: 2, kind: input, shape index: {}]   ;;  %s7741_s3 = inlined_call_operand.vmem [shape: f32[2,1,8], index: 3, kind: input, shape index: {}]   ;;  %s7742_s4 = inlined_call_operand.vmem [shape: f32[32,32], index: 4, kind: input, shape index: {}]   ;;  %s7743_s5 = inlined_call_operand.vmem [shape: f32[1,32], index: 5, kind: input, shape index: {}, may-alias: {5,7}]   ;;  %s7744_s6 = inlined_call_operand.vmem [shape: f32[1,32], index: 6, kind: input, shape index: {}]   ;;  %s7745_s7 = inlined_call_operand.vmem [shape: f32[1,32], index: 7, kind: input, shape index: {}, may-alias: {5,7}]   ;;  %s7746_s8 = inlined_call_operand.hbm [shape: f32[2,4,32,8], index: 8, kind: input, shape index: {}]   ;;  %s7747_s9 = inlined_call_operand.vmem [shape: f32[2,4,1,8], index: 9, kind: input, shape index: {}, may-alias: {9,11,13}]   ;;  %s7748_s10 = inlined_call_operand.hbm [shape: f32[2,4,32,8], index: 10, kind: input, shape index: {}]   ;;  %s7749_s11 = inlined_call_operand.vmem [shape: f32[2,4,1,8], index: 11, kind: input, shape index: {}, may-alias: {9,11,13}]   ;;  %s7750_s12 = inlined_call_operand.hbm [shape: f32[2,4,32,8], index: 12, kind: input, shape index: {}]   ;;  %s7751_s13 = inlined_call_operand.vmem [shape: f32[2,4,1,8], index: 13, kind: input, shape index: {}, may-alias: {9,11,13}]   ;;  %s7752_s14 = inlined_call_operand.hbm [shape: f32[2,4,8,32], index: 14, kind: input, shape index: {}]   ;;  %s7753_s15 = inlined_call_operand.vmem [shape: f32[2,1,32], index: 15, kind: input, shape index: {}, may-alias: {15,17,21,23}]   ;;  %s7754_s16 = inlined_call_operand.vmem [shape: f32[2,1,32], index: 16, kind: input, shape index: {}, may-alias: {16,22}]   ;;  %s7755_s17 = inlined_call_operand.vmem [shape: f32[2,1,32], index: 17, kind: input, shape index: {}, may-alias: {15,17,21,23}]   ;;  %s7756_s18 = inlined_call_operand.vmem [shape: f32[2,32,128], index: 18, kind: input, shape index: {}]   ;;  %s7757_s19 = inlined_call_operand.vmem [shape: f32[2,1,128], index: 19, kind: input, shape index: {}]   ;;  %s7758_s20 = inlined_call_operand.vmem [shape: f32[2,128,32], index: 20, kind: input, shape index: {}]   ;;  %s7759_s21 = inlined_call_operand.vmem [shape: f32[2,1,32], index: 21, kind: input, shape index: {}, may-alias: {15,17,21,23}]   ;;  %s7760_s22 = inlined_call_operand.vmem [shape: f32[2,1,32], index: 22, kind: input, shape index: {}, may-alias: {16,22}]   ;;  %s7761_s23 = inlined_call_operand.vmem [shape: f32[2,1,32], index: 23, kind: input, shape index: {}, may-alias: {15,17,21,23}]   ;;  %s7762_s24 = inlined_call_operand.vmem [shape: f32[32,128], index: 24, kind: input, shape index: {}]   ;;  %s7763_s25 = inlined_call_operand.vmem [shape: f32[1,128], index: 25, kind: input, shape index: {}]   ;;  %s7764_s26 = inlined_call_operand.vmem [shape: f32[16,128], index: 26, kind: output, shape index: {}]  }
   0x1   :  { %7767 = sst [smem:[#allocation12_spill]] %s7738_s0 }
   0x2   :  { %7768 = sst [smem:[#allocation13_spill]] %s7739_s1 }
   0x3   :  { %7769 = sst [smem:[#allocation14_spill]] %s7740_s2 }
   0x4   :  { %7770 = sst [smem:[#allocation15_spill]] %s7741_s3 }
   0x5   :  { %7771 = sst [smem:[#allocation16_spill]] %s7742_s4 }
   0x6   :  { %7772 = sst [smem:[#allocation17_spill]] %s7743_s5 }
   0x7   :  { %7773 = sst [smem:[#allocation18_spill]] %s7744_s6 }
   0x8   :  { %7774 = sst [smem:[#allocation19_spill]] %s7745_s7 }
   0x9   :  { %7775 = sst [smem:[#allocation20_spill]] %s7746_s8 }
   0xa   :  { %7776 = sst [smem:[#allocation21_spill]] %s7747_s9 }
   0xb   :  { %7777 = sst [smem:[#allocation22_spill]] %s7748_s10 }
   0xc   :  { %31 = vsyncpa [#allocation3], 0 }
   0xd   :  { %32 = vsyncpa [#allocation5], 0 }
   0xe   :  { %33 = vsyncpa [#allocation8], 0  ;;  %s6910_s27 = smov 0  }
   0xf LB: > { %s6916_s3 = sadd.s32 4294967295, %s6765_s27   ;;  %p5653_p0 = scmp.ge.s32.totalorder %s6765_s27, 1  ;;  %s6765_s27 = sphi %s6910_s27, %s39_s27  }
  0x10   : > { %p636_p1 = scmp.lt.s32.totalorder %s6765_s27, 3  ;;  %p6570_p2 = scmp.eq.s32.totalorder %s6916_s3, 0 }
  0x11   : > { %s6767_s28 = smov [#allocation4]   ;;  %s6768_s4 = smov [#allocation2]  }
  0x12   : > { %p6921_p3 = pnand %p5653_p0, %p636_p1  ;;  %s676_s8 = sshll.u32 %s6767_s28, 4  ;;  %s677_s8 = int_to_ptr.vmem [resolvable:$true] %s676_s8 }
  0x13   : > { %s660_s29 = sshll.u32 %s6768_s4, 4  ;;  %s6769_s9 = smov [#allocation6]   ;;  %s6927_s29 = int_to_ptr.vmem [resolvable:$true] %s660_s29 }
  0x14   : > { %p6557_p4 = pneg %p6921_p3  ;;  %s692_s30 = sshll.u32 %s6769_s9, 4  ;;  %s6935_s30 = int_to_ptr.vmem [resolvable:$true] %s692_s30 }
  0x15   : > { %s6770_s2 = smov [#allocation7]   ;;  %s6654_s10 = scalar_lea.vmem %s677_s8, 4096 }
  0x16   : > { %p6931_p5 = pnand %p6570_p2, %p6557_p4  ;;  %s6937_s5 = sshll.u32 %s6770_s2, 4  ;;  %s709_s5 = int_to_ptr.vmem [resolvable:$true] %s6937_s5 }
  0x17   : > { %p6655_p7 = scmp.ne.s32.totalorder %s677_s8, %s6654_s10  ;;  %p6662_p10 = scmp.lt.s32.totalorder %s677_s8, %s677_s8 }
  0x18   : > { %p6645_p6 = pneg %p6931_p5  ;;  %p6663_p11 = scmp.lt.s32.totalorder %s6654_s10, %s6654_s10 }
  0x1a   : > { %p6657_p8 = pnand %p6655_p7, %p6645_p6  ;;  %p6664_p12 = por %p6663_p11, %p6662_p10 }
  0x1c   : > { %p6658_p9 = pneg %p6657_p8 }
  0x1e   : > { %p6665_p13 = pnand %p6664_p12, %p6658_p9 }
  0x20   : > { %6668 = shalt.err (!%p6665_p13)
}
  0x21   : > { %s6771_s6 = smov 128   ;;  %s6772_s1 = smov 8  }
  0x22   : > { %s7780_s9 = sld [smem:[#allocation22_spill]]  ;;  %s6680_s2 = scalar_lea.vmem %s6927_s29, 4096 }
  0x23   : > { %p6681_p0 = scmp.ne.s32.totalorder %s6927_s29, %s6680_s2  ;;  %p6688_p7 = scmp.lt.s32.totalorder %s6927_s29, %s6927_s29 }
  0x24   : > { %p6689_p8 = scmp.lt.s32.totalorder %s6680_s2, %s6680_s2 }
  0x25   : > { %p6683_p1 = pnand %p6681_p0, %p6645_p6 }
  0x26   : > { %p6690_p9 = por %p6689_p8, %p6688_p7 }
  0x27   : > { %p6684_p4 = pneg %p6683_p1 }
  0x28   : > { %6563 = dma.hbm_to_vmem [thread:$0]  (!%p6931_p5), %s7780_s9, 4096, %s677_s8, [#allocation5], %s6771_s6, %s6771_s6, %s6772_s1  }
  0x29   : > { %p6691_p10 = pnand %p6690_p9, %p6684_p4 }
  0x2b   : > { %6694 = shalt.err (!%p6691_p10)
}
  0x2c   : > { %s7781_s28 = sld [smem:[#allocation20_spill]]  ;;  %s6706_s4 = scalar_lea.vmem %s6935_s30, 4096 }
  0x2d   : > { %p6707_p11 = scmp.ne.s32.totalorder %s6935_s30, %s6706_s4  ;;  %p6714_p0 = scmp.lt.s32.totalorder %s6935_s30, %s6935_s30 }
  0x2e   : > { %p6715_p1 = scmp.lt.s32.totalorder %s6706_s4, %s6706_s4 }
  0x2f   : > { %p6709_p12 = pnand %p6707_p11, %p6645_p6 }
  0x30   : > { %p6716_p4 = por %p6715_p1, %p6714_p0 }
  0x31   : > { %p6710_p13 = pneg %p6709_p12 }
  0x32   : > { %6560 = dma.hbm_to_vmem [thread:$0]  (!%p6931_p5), %s7781_s28, 4096, %s6927_s29, [#allocation3], %s6771_s6, %s6771_s6, %s6772_s1  }
  0x33   : > { %p6717_p7 = pnand %p6716_p4, %p6710_p13 }
  0x35   : > { %6720 = shalt.err (!%p6717_p7)
}
  0x36   : > { %6566 = dma.hbm_to_vmem [thread:$0]  (!%p6931_p5), %s7750_s12, 4096, %s6935_s30, [#allocation5], %s6771_s6, %s6771_s6, %s6772_s1  }
  0x37   : > { %s6732_s2 = scalar_lea.vmem %s709_s5, 1024  ;;  %p6740_p11 = scmp.lt.s32.totalorder %s709_s5, %s709_s5 }
  0x38   : > { %p6733_p8 = scmp.ne.s32.totalorder %s709_s5, %s6732_s2  ;;  %p6741_p12 = scmp.lt.s32.totalorder %s6732_s2, %s6732_s2 }
  0x3a   : > { %p6735_p9 = pnand %p6733_p8, %p6645_p6  ;;  %p6742_p13 = por %p6741_p12, %p6740_p11 }
  0x3c   : > { %p6736_p10 = pneg %p6735_p9 }
  0x3e   : > { %p6743_p0 = pnand %p6742_p13, %p6736_p10 }
  0x40   : > { %6746 = shalt.err (!%p6743_p0)
}
  0x41   : > { %6569 = dma.hbm_to_vmem [thread:$0]  (!%p6931_p5), %s7752_s14, 1024, %s709_s5, [#allocation8], %s6771_s6, %s6771_s6, %s6772_s1  }
  0x42   : > { %784 = sbr.rel (%p6921_p3) target bundleno = 10163 (0x27b3), region = 124 }
  0x47   : > { %6752 = dma.done.wait (%p6570_p2), [#allocation3], 4096  }
  0x48   : > { %6754 = vsyncadd (%p6570_p2), [#allocation3], 4294963200 }
  0x49   : > { %6756 = dma.done.wait (%p6570_p2), [#allocation5], 8192  }
  0x4a   : > { %6758 = vsyncadd (%p6570_p2), [#allocation5], 4294959104 }
  0x4b   : > { %6760 = dma.done.wait (%p6570_p2), [#allocation8], 1024  }
  0x4c   : > { %6762 = vsyncadd (%p6570_p2), [#allocation8], 4294966272  ;;  %p875_p3 = scmp.lt.s32.totalorder %s6916_s3, 1  ;;  %v6773_v0 = vmov 0.0   ;;  %vm6774_vm0 = vmmov 0   ;;  %s7782_s5 = sld [smem:[#allocation16_spill]] }
  0x4d   : > { %6043 = vmatprep.subr.mxu0 %v6773_v0  ;;  %6051 = vmatprep.mubr.msk.f32.mxu0 %vm6774_vm0, %v6773_v0  ;;  %s7783_s2 = sld [smem:[#allocation13_spill]]  ;;  %vm906_vm1 = vcmask 261120   ;;  %v1027_v29 = vld [vmem:[#allocation2 + $0x18] sm:$0xff]  ;;  %v1026_v31 = vld [vmem:[#allocation2 + $0x10] sm:$0xff]  ;;  %v1025_v33 = vld [vmem:[#allocation2 + $0x8] sm:$0xff]  ;;  %vm1270_vm2 = vcmask 64512  }
  0x4e   : > { %s7792_s3 = smov (!%p875_p3, %s6916_s3), 1  ;;  %6076 = vmatprep.subr.mxu1 %v6773_v0  ;;  %6084 = vmatprep.mubr.msk.f32.mxu1 %vm6774_vm0, %v6773_v0  ;;  %s7784_s1 = sld [smem:[#allocation17_spill]]  ;;  %v1192_v30 = vld [vmem:[#allocation6 + $0x18] sm:$0xff]  ;;  %v1191_v32 = vld [vmem:[#allocation6 + $0x10] sm:$0xff]  ;;  %v1190_v34 = vld [vmem:[#allocation6 + $0x8] sm:$0xff] }
  0x4f   : > { %s7021_s7 = sshll.u32 %s7792_s3, 3  ;;  %s7785_s9 = sld [smem:[#allocation14_spill]]  ;;  %6077 = vmatpush3.msra.mxu1 %v1192_v30  ;;  %v1024_v35 = vld [vmem:[#allocation2] sm:$0xff]  ;;  %v1111_v46 = vld [vmem:[#allocation4 + $0x18] sm:$0xff]  ;;  %v1110_v47 = vld [vmem:[#allocation4 + $0x10] sm:$0xff] }
  0x50   : > { %s7786_s8 = sld [smem:[#allocation12_spill]]  ;;  %6078 = vmatprep.subr.mxu1 %v6773_v0  ;;  %v1189_v36 = vld [vmem:[#allocation6] sm:$0xff]  ;;  %v1109_v48 = vld [vmem:[#allocation4 + $0x8] sm:$0xff]  ;;  %v1444_v62 = vld [vmem:[#allocation2 + $0x38] sm:$0xff] }
  0x51   : > { %6079 = vmatpush3.msra.mxu1 %v1191_v32  ;;  %v1108_v49 = vld [vmem:[#allocation4] sm:$0xff]  ;;  %s7789_s6 = sld [smem:[#allocation21_spill]]  ;;  %v1443_v63 = vld [vmem:[#allocation2 + $0x30] sm:$0xff] }
  0x52   : > { %v898_v1 = vld [vmem:[%s7782_s5 + $0x18] sm:$0xff]  ;;  %v897_v2 = vld [vmem:[%s7782_s5 + $0x10] sm:$0xff]  ;;  %v896_v3 = vld [vmem:[%s7782_s5 + $0x8] sm:$0xff]  ;;  %6080 = vmatprep.subr.mxu1 %v6773_v0  ;;  %s7790_s4 = sld [smem:[#allocation15_spill]] }
  0x53   : > { %6044 = vmatpush3.msra.mxu0 %v898_v1  ;;  %s882_s10 = scalar_lea.vmem %s7783_s2, %s7021_s7  ;;  %v895_v4 = vld [vmem:[%s7782_s5] sm:$0xff]  ;;  %6081 = vmatpush3.msra.mxu1 %v1190_v34  ;;  %v1442_v1 = vld [vmem:[#allocation2 + $0x28] sm:$0xff] }
  0x54   : > { %6045 = vmatprep.subr.mxu0 %v6773_v0  ;;  %v894_v5 = vld [vmem:[%s882_s10] sm:$0xff]  ;;  %6082 = vmatprep.subr.mxu1 %v6773_v0 }
  0x55   : > { %6046 = vmatpush3.msra.mxu0 %v897_v2  ;;  %v5668_v6 = vld [vmem:[%s7784_s1] ss:$0 sm:$0xff]  ;;  %s886_s29 = scalar_lea.vmem %s7785_s9, %s7021_s7  ;;  %6083 = vmatpush3.msra.mxu1 %v1189_v36  ;;  %s7787_s1 = sld [smem:[#allocation18_spill]] }
  0x56   : > { %6047 = vmatprep.subr.mxu0 %v6773_v0  ;;  %s878_s0 = scalar_lea.vmem %s7786_s8, %s7021_s7  ;;  %v990_v18 = vld [vmem:[%s886_s29] sm:$0xff]  ;;  %6092 = vmatprep.subr.mxu1 %v6773_v0  ;;  %s7788_s9 = sld [smem:[#allocation19_spill]] }
  0x57   : > { %6048 = vmatpush3.msra.mxu0 %v896_v3  ;;  %v989_v20 = vld [vmem:[%s878_s0] sm:$0xff]  ;;  %v1610_v3 = vld [vmem:[#allocation6 + $0x38] sm:$0xff]  ;;  %s893_s8 = scalar_lea.vmem %s7764_s26, %s7021_s7 }
  0x58   : > { %6049 = vmatprep.subr.mxu0 %v6773_v0  ;;  %v5676_v50 = vld [vmem:[%s7751_s13] ss:$0 sm:$0xff] }
  0x59   : > { %6050 = vmatpush3.msra.mxu0 %v895_v4  ;;  %v5674_v56 = vld [vmem:[%s7749_s11] ss:$0 sm:$0xff]  ;;  %v1609_v4 = vld [vmem:[#allocation6 + $0x30] sm:$0xff] }
  0x5a   : > { %6052 = vmatmul.mubr.msk.f32.vlgmr.msra.gmra.mxu0 %vm906_vm1, %v894_v5  ;;  %6054 = vmatprep.subr.mxu0 %v6773_v0  ;;  %v5672_v58 = vld [vmem:[%s7789_s6] ss:$0 sm:$0xff]  ;;  %v1608_v5 = vld [vmem:[#allocation6 + $0x28] sm:$0xff] }
  0x5b   : > { %6062 = vmatprep.mubr.msk.f32.mxu0 %vm6774_vm0, %v6773_v0  ;;  %6055 = vmatpush3.msra.mxu0 %v1027_v29  ;;  %v5670_v41 = vld [vmem:[%s7787_s1] ss:$0 sm:$0xff] }
  0x5c   : > { %6056 = vmatprep.subr.mxu0 %v6773_v0  ;;  %v5671_v43 = vld [vmem:[%s7788_s9] ss:$0 sm:$0xff]  ;;  %s7126_s9 = scalar_lea.vmem %s7790_s4, %s7792_s3 }
  0x5d   : > { %6057 = vmatpush3.msra.mxu0 %v1026_v31  ;;  %v1441_v2 = vld [vmem:[#allocation2 + $0x20] sm:$0xff] }
  0x5e   : > { %6058 = vmatprep.subr.mxu0 %v6773_v0  ;;  %v5686_v31 = vld [vmem:[%s7749_s11 + $0x1] ss:$0 sm:$0xff] }
  0x5f   : > { %6059 = vmatpush3.msra.mxu0 %v1025_v33  ;;  %v5683_v33 = vld [vmem:[%s7789_s6 + $0x1] ss:$0 sm:$0xff] }
  0x60   : > { %6060 = vmatprep.subr.mxu0 %v6773_v0 }
  0x61   : > { %6061 = vmatpush3.msra.mxu0 %v1024_v35  ;;  %v5689_v35 = vld [vmem:[%s7751_s13 + $0x1] ss:$0 sm:$0xff] }
  0x62   : > { %6065 = vmatprep.subr.mxu0 %v6773_v0 }
 0x11a   : > { %v976_v7 = vpop.f32.mrf.mxu0 }
 0x11b   : > { %v977_v8 = vadd.f32 %v5668_v6, %v976_v7  ;;  %v1607_v6 = vld [vmem:[#allocation6 + $0x20] sm:$0xff] }
 0x11c   : > { %v6053_v9 = vpop.f32.mrf.mxu0  ;;  %v7129_v7 = vld [vmem:[%s7126_s9] ss:$0 sm:$0xff] }
 0x11d   : > { %v981_v10 = vmul.f32 0.044715, %v977_v8  ;;  %v980_v16 = vmul.f32 0.5, %v977_v8 }
 0x11f   : > { %v982_v11 = vmul.f32 %v981_v10, %v977_v8 }
 0x121   : > { %v983_v12 = vmul.f32 %v982_v11, %v977_v8 }
 0x123   : > { %v984_v13 = vadd.f32 %v983_v12, %v977_v8 }
 0x125   : > { %v985_v14 = vmul.f32 0.7978846, %v984_v13 }
 0x127   : > { %6594 = vtanh.f32 %v985_v14 }
 0x134   : > { %v6595_v15 = vpop.eup %6594 }
 0x135   : > { %v987_v17 = vadd.f32 1.0, %v6595_v15 }
 0x137   : > { %v988_v19 = vmul.f32 %v987_v17, %v980_v16 }
 0x139   : > { %v991_v21 = vmul.f32 %v990_v18, %v988_v19 }
 0x13b   : > { %v992_v22 = vadd.f32 %v991_v21, %v989_v20 }
 0x13d   : > { %v995_v23 = vsel %vm906_vm1, %v992_v22, 0.0 }
 0x13e   : > { %996 = vadd.xlane.f32.xlu0 %v995_v23 }
 0x1c7   : > { %v997_v24 = vpop.xlane.xlu0 %996 }
 0x1c8   : > { %v999_v25 = vmul.f32 0.03125, %v997_v24 }
 0x1ca   : > { %v1000_v26 = vsub.f32 %v992_v22, %v999_v25  ;;  %v1527_v25 = vld [vmem:[#allocation4 + $0x38] sm:$0xff] }
 0x1cc   : > { %v1001_v27 = vmul.f32 %v1000_v26, %v1000_v26 }
 0x1ce   : > { %v1002_v28 = vsel %vm906_vm1, %v1001_v27, 0.0  ;;  %v1525_v27 = vld [vmem:[#allocation4 + $0x28] sm:$0xff] }
 0x1cf   : > { %1003 = vadd.xlane.f32.xlu0 %v1002_v28  ;;  %v1524_v28 = vld [vmem:[#allocation4 + $0x20] sm:$0xff] }
 0x258   : > { %v1004_v37 = vpop.xlane.xlu0 %1003 }
 0x259   : > { %v1005_v38 = vmul.f32 0.03125, %v1004_v37 }
 0x25b   : > { %v1006_v39 = vadd.f32 1e-12, %v1005_v38 }
 0x25d   : > { %6596 = vrsqrt.f32 %v1006_v39 }
 0x26a   : > { %v6597_v40 = vpop.eup %6596 }
 0x26b   : > { %v1008_v42 = vmul.f32 %v6597_v40, %v1000_v26  ;;  %v1526_v26 = vld [vmem:[#allocation4 + $0x30] sm:$0xff] }
 0x26d   : > { %v1015_v44 = vmul.f32 %v5670_v41, %v1008_v42 }
 0x26f   : > { %v7073_v45 = vadd.f32 %v5671_v43, %v1015_v44 }
 0x271   : > { %6063 = vmatmul.mubr.msk.f32.vlgmr.msra.gmra.mxu0 %vm906_vm1, %v7073_v45  ;;  %6085 = vmatmul.mubr.msk.f32.vlgmr.msra.gmra.mxu1 %vm906_vm1, %v7073_v45 }
 0x272   : > { %6066 = vmatpush3.msra.mxu0 %v1111_v46  ;;  %6073 = vmatprep.mubr.msk.f32.mxu0 %vm6774_vm0, %v6773_v0 }
 0x273   : > { %6067 = vmatprep.subr.mxu0 %v6773_v0  ;;  %6094 = vmatprep.mubr.msk.f32.mxu1 %vm6774_vm0, %v6773_v0 }
 0x274   : > { %6068 = vmatpush3.msra.mxu0 %v1110_v47 }
 0x275   : > { %6069 = vmatprep.subr.mxu0 %v6773_v0 }
 0x276   : > { %6070 = vmatpush3.msra.mxu0 %v1109_v48 }
 0x277   : > { %6071 = vmatprep.subr.mxu0 %v6773_v0 }
 0x278   : > { %6072 = vmatpush3.msra.mxu0 %v1108_v49 }
 0x279   : > { %6074 = vmatmul.mubr.msk.f32.vlgmr.msra.gmra.mxu0 %vm906_vm1, %v7073_v45  ;;  %6087 = vmatprep.subr.mxu0 %v6773_v0 }
 0x27a   : > { %6089 = vmatprep.mubr.msk.f32.mxu0 %vm6774_vm0, %v6773_v0 }
 0x331   : > { %v1104_v51 = vpop.f32.mrf.mxu0  ;;  %v1266_v52 = vpop.f32.mrf.mxu1 }
 0x332   : > { %v1267_v53 = vadd.f32 %v5676_v50, %v1266_v52  ;;  %v1105_v61 = vadd.f32 %v5672_v58, %v1104_v51  ;;  %v1852_v50 = vld [vmem:[#allocation7 + $0x8] sm:$0xff]  ;;  %v2083_v58 = vld [vmem:[#allocation4 + $0x40] sm:$0xff] }
 0x333   : > { %v6064_v54 = vpop.f32.mrf.mxu0  ;;  %v6086_v55 = vpop.f32.mrf.mxu1 }
 0x334   : > { %6093 = vmatpush3.msra.mxu1 %v1267_v53  ;;  %v1439_v54 = vld [vmem:[#allocation7] sm:$0xff]  ;;  %v2086_v55 = vld [vmem:[#allocation4 + $0x58] sm:$0xff] }
 0x335   : > { %6108 = vmatprep.subr.mxu1 %v6773_v0 }
 0x339   : > { %v1185_v57 = vpop.f32.mrf.mxu0 }
 0x33a   : > { %v1186_v59 = vadd.f32 %v5674_v56, %v1185_v57  ;;  %v2085_v56 = vld [vmem:[#allocation4 + $0x50] sm:$0xff]  ;;  %v2084_v57 = vld [vmem:[#allocation4 + $0x48] sm:$0xff] }
 0x33b   : > { %v6075_v60 = vpop.f32.mrf.mxu0 }
 0x33c   : > { %6088 = vmatpush3.xpose.msk.msra.mxu0 %vm1270_vm2, %v1186_v59  ;;  %v2003_v59 = vld [vmem:[#allocation2 + $0x58] sm:$0xff] }
 0x33d   : > { %6097 = vmatprep.subr.mxu0 %v6773_v0 }
 0x33f   : > { %6090 = vmatmul.mubr.msk.f32.vlgmr.msra.gmra.mxu0 %vm1270_vm2, %v1105_v61  ;;  %v2002_v61 = vld [vmem:[#allocation2 + $0x50] sm:$0xff] }
 0x340   : > { %6098 = vmatpush3.msra.mxu0 %v1444_v62  ;;  %6105 = vmatprep.mubr.msk.f32.mxu0 %vm6774_vm0, %v6773_v0 }
 0x341   : > { %6099 = vmatprep.subr.mxu0 %v6773_v0 }
 0x342   : > { %6100 = vmatpush3.msra.mxu0 %v1443_v63  ;;  %v2001_v63 = vld [vmem:[#allocation2 + $0x48] sm:$0xff] }
 0x343   : > { %6101 = vmatprep.subr.mxu0 %v6773_v0 }
 0x344   : > { %6102 = vmatpush3.msra.mxu0 %v1442_v1 }
 0x345   : > { %6103 = vmatprep.subr.mxu0 %v6773_v0 }
 0x346   : > { %6104 = vmatpush3.msra.mxu0 %v1441_v2  ;;  %v2000_v2 = vld [vmem:[#allocation2 + $0x40] sm:$0xff] }
 0x347   : > { %6106 = vmatmul.mubr.msk.f32.vlgmr.msra.gmra.mxu0 %vm906_vm1, %v7073_v45  ;;  %6119 = vmatprep.subr.mxu0 %v6773_v0 }
 0x348   : > { %6120 = vmatpush3.msra.mxu0 %v1610_v3  ;;  %6127 = vmatprep.mubr.msk.f32.mxu0 %vm6774_vm0, %v6773_v0 }
 0x349   : > { %6121 = vmatprep.subr.mxu0 %v6773_v0 }
 0x34a   : > { %6122 = vmatpush3.msra.mxu0 %v1609_v4  ;;  %v2169_v4 = vld [vmem:[#allocation6 + $0x58] sm:$0xff] }
 0x34b   : > { %6123 = vmatprep.subr.mxu0 %v6773_v0 }
 0x34c   : > { %6124 = vmatpush3.msra.mxu0 %v1608_v5  ;;  %v2168_v5 = vld [vmem:[#allocation6 + $0x50] sm:$0xff] }
 0x34d   : > { %6125 = vmatprep.subr.mxu0 %v6773_v0 }
 0x34e   : > { %6126 = vmatpush3.msra.mxu0 %v1607_v6  ;;  %v5700_v6 = vld [vmem:[%s7749_s11 + $0x2] ss:$0 sm:$0xff] }
 0x34f   : > { %6128 = vmatmul.mubr.msk.f32.vlgmr.msra.gmra.mxu0 %vm906_vm1, %v7073_v45  ;;  %6140 = vmatprep.subr.mxu0 %v6773_v0 }
 0x350   : > { %6142 = vmatprep.mubr.msk.f32.mxu0 %vm6774_vm0, %v6773_v0  ;;  %6141 = vmatpush3.msra.mxu0 %v1852_v50  ;;  %v2571_v50 = vld [vmem:[#allocation4 + $0x68] sm:$0xff] }
 0x351   : > { %6150 = vmatprep.subr.mxu0 %v6773_v0 }
 0x3ff   : > { %v1343_v8 = vpop.f32.mrf.mxu0 }
 0x400   : > { %v1347_v9 = vmul.f32 0.35355338, %v1343_v8  ;;  %v2167_v8 = vld [vmem:[#allocation6 + $0x48] sm:$0xff] }
 0x401   : > { %v6091_v10 = vpop.f32.mrf.mxu0 }
 0x402   : > { %v1354_v11 = vadd.f32 %v7129_v7, %v1347_v9 }
 0x404   : > { %v1355_v12 = vsel %vm1270_vm2, %v1354_v11, -inf }
 0x405   : > { %1356 = vmax.xlane.f32.xlu1 %v1355_v12 }
 0x407   : > { %v1519_v13 = vpop.f32.mrf.mxu0 }
 0x408   : > { %v1520_v37 = vadd.f32 %v5683_v33, %v1519_v13  ;;  %v2411_v33 = vld [vmem:[#allocation7 + $0x10] sm:$0xff] }
 0x409   : > { %v6107_v14 = vpop.f32.mrf.mxu0 }
 0x40f   : > { %v1685_v15 = vpop.f32.mrf.mxu0 }
 0x410   : > { %v1686_v38 = vadd.f32 %v5689_v35, %v1685_v15  ;;  %v5697_v15 = vld [vmem:[%s7789_s6 + $0x2] ss:$0 sm:$0xff] }
 0x411   : > { %v6129_v16 = vpop.f32.mrf.mxu0 }
 0x48e   : > { %v1357_v17 = vpop.xlane.xlu1 %1356 }
 0x48f   : > { %v1358_v18 = vsub.f32 %v1354_v11, %v1357_v17  ;;  %v2166_v11 = vld [vmem:[#allocation6 + $0x40] sm:$0xff] }
 0x491   : > { %v1359_v19 = vmul.f32 1.442695, %v1358_v18 }
 0x493   : > { %6598 = vpow2.f32 %v1359_v19  ;;  %v5703_v19 = vld [vmem:[%s7751_s13 + $0x2] ss:$0 sm:$0xff] }
 0x4a0   : > { %v6599_v20 = vpop.eup %6598 }
 0x4a1   : > { %v1361_v21 = vsel %vm1270_vm2, %v6599_v20, 0.0 }
 0x4a2   : > { %1362 = vadd.xlane.f32.xlu1 %v1361_v21 }
 0x52b   : > { %v1363_v22 = vpop.xlane.xlu1 %1362 }
 0x52c   : > { %6600 = vrcp.f32 %v1363_v22 }
 0x539   : > { %v6601_v23 = vpop.eup %6600 }
 0x53a   : > { %v1365_v24 = vmul.f32 %v6601_v23, %v6599_v20 }
 0x53c   : > { %6095 = vmatmul.mubr.msk.f32.vlgmr.msra.gmra.mxu1 %vm1270_vm2, %v1365_v24 }
 0x53d   : > { %6109 = vmatpush3.msra.mxu1 %v1527_v25  ;;  %6116 = vmatprep.mubr.msk.f32.mxu1 %vm6774_vm0, %v6773_v0 }
 0x53e   : > { %6110 = vmatprep.subr.mxu1 %v6773_v0 }
 0x53f   : > { %6111 = vmatpush3.msra.mxu1 %v1526_v26 }
 0x540   : > { %6112 = vmatprep.subr.mxu1 %v6773_v0 }
 0x541   : > { %6113 = vmatpush3.msra.mxu1 %v1525_v27 }
 0x542   : > { %6114 = vmatprep.subr.mxu1 %v6773_v0 }
 0x543   : > { %6115 = vmatpush3.msra.mxu1 %v1524_v28 }
 0x544   : > { %6117 = vmatmul.mubr.msk.f32.vlgmr.msra.gmra.mxu1 %vm906_vm1, %v7073_v45  ;;  %6130 = vmatprep.subr.mxu1 %v6773_v0 }
 0x545   : > { %6132 = vmatprep.mubr.msk.f32.mxu1 %vm6774_vm0, %v6773_v0 }
 0x5fc   : > { %v1435_v29 = vpop.f32.mrf.mxu1 }
 0x5fe   : > { %v6096_v30 = vpop.f32.mrf.mxu1 }
 0x604   : > { %v1602_v32 = vpop.f32.mrf.mxu1 }
 0x605   : > { %v1603_v34 = vadd.f32 %v5686_v31, %v1602_v32 }
 0x606   : > { %v6118_v36 = vpop.f32.mrf.mxu1 }
 0x607   : > { %6131 = vmatpush3.xpose.msk.msra.mxu1 %vm1270_vm2, %v1603_v34 }
 0x608   : > { %6135 = vmatprep.subr.mxu1 %v6773_v0 }
 0x60a   : > { %6133 = vmatmul.mubr.msk.f32.vlgmr.msra.gmra.mxu1 %vm1270_vm2, %v1520_v37  ;;  %v2490_v37 = vld [vmem:[#allocation2 + $0x78] sm:$0xff] }
 0x60b   : > { %6136 = vmatpush3.msra.mxu1 %v1686_v38  ;;  %6137 = vmatprep.mubr.msk.f32.mxu1 %vm6774_vm0, %v6773_v0  ;;  %v2489_v38 = vld [vmem:[#allocation2 + $0x70] sm:$0xff] }
 0x60c   : > { %6145 = vmatprep.subr.mxu1 %v6773_v0 }
 0x6ca   : > { %v1761_v39 = vpop.f32.mrf.mxu1 }
 0x6cb   : > { %v1765_v40 = vmul.f32 0.35355338, %v1761_v39  ;;  %v2488_v39 = vld [vmem:[#allocation2 + $0x68] sm:$0xff] }
 0x6cc   : > { %v6134_v41 = vpop.f32.mrf.mxu1 }
 0x6cd   : > { %v1766_v42 = vadd.f32 %v7129_v7, %v1765_v40  ;;  %v2487_v40 = vld [vmem:[#allocation2 + $0x60] sm:$0xff]  ;;  %v2656_v41 = vld [vmem:[#allocation6 + $0x78] sm:$0xff] }
 0x6cf   : > { %v1767_v43 = vsel %vm1270_vm2, %v1766_v42, -inf }
 0x6d0   : > { %1768 = vmax.xlane.f32.xlu0 %v1767_v43  ;;  %v2654_v43 = vld [vmem:[#allocation6 + $0x68] sm:$0xff] }
 0x759   : > { %v1769_v44 = vpop.xlane.xlu0 %1768 }
 0x75a   : > { %v1770_v46 = vsub.f32 %v1766_v42, %v1769_v44  ;;  %v2655_v42 = vld [vmem:[#allocation6 + $0x70] sm:$0xff]  ;;  %v2653_v44 = vld [vmem:[#allocation6 + $0x60] sm:$0xff] }
 0x75c   : > { %v1771_v47 = vmul.f32 1.442695, %v1770_v46  ;;  %v2573_v46 = vld [vmem:[#allocation4 + $0x78] sm:$0xff] }
 0x75e   : > { %6602 = vpow2.f32 %v1771_v47 }
 0x76b   : > { %v6603_v48 = vpop.eup %6602 }
 0x76c   : > { %v1773_v49 = vsel %vm1270_vm2, %v6603_v48, 0.0 }
 0x76d   : > { %1774 = vadd.xlane.f32.xlu1 %v1773_v49 }
 0x7f6   : > { %v1775_v51 = vpop.xlane.xlu1 %1774 }
 0x7f7   : > { %6604 = vrcp.f32 %v1775_v51  ;;  %v2570_v51 = vld [vmem:[#allocation4 + $0x60] sm:$0xff] }
 0x804   : > { %v6605_v52 = vpop.eup %6604 }
 0x805   : > { %v1777_v53 = vmul.f32 %v6605_v52, %v6603_v48  ;;  %v2572_v48 = vld [vmem:[#allocation4 + $0x70] sm:$0xff] }
 0x807   : > { %6138 = vmatmul.mubr.msk.f32.vlgmr.msra.gmra.mxu1 %vm1270_vm2, %v1777_v53 }
 0x808   : > { %6146 = vmatpush3.msra.mxu1 %v1439_v54  ;;  %6147 = vmatprep.mubr.msk.f32.mxu1 %vm6774_vm0, %v6773_v0 }
 0x809   : > { %6161 = vmatprep.subr.mxu1 %v6773_v0 }
 0x80b   : > { %6148 = vmatmul.mubr.msk.f32.vlgmr.msra.gmra.mxu1 %vm1270_vm2, %v1435_v29 }
 0x80c   : > { %6162 = vmatpush3.msra.mxu1 %v2086_v55  ;;  %6169 = vmatprep.mubr.msk.f32.mxu1 %vm6774_vm0, %v6773_v0 }
 0x80d   : > { %6163 = vmatprep.subr.mxu1 %v6773_v0 }
 0x80e   : > { %6164 = vmatpush3.msra.mxu1 %v2085_v56 }
 0x80f   : > { %6165 = vmatprep.subr.mxu1 %v6773_v0 }
 0x810   : > { %6166 = vmatpush3.msra.mxu1 %v2084_v57 }
 0x811   : > { %6167 = vmatprep.subr.mxu1 %v6773_v0 }
 0x812   : > { %6168 = vmatpush3.msra.mxu1 %v2083_v58 }
 0x813   : > { %6170 = vmatmul.mubr.msk.f32.vlgmr.msra.gmra.mxu1 %vm906_vm1, %v7073_v45  ;;  %6183 = vmatprep.subr.mxu1 %v6773_v0 }
 0x814   : > { %6185 = vmatprep.mubr.msk.f32.mxu1 %vm6774_vm0, %v6773_v0 }
 0x8c7   : > { %v1847_v60 = vpop.f32.mrf.mxu1 }
 0x8c8   : > { %6143 = vmatmul.mubr.msk.f32.vlgmr.msra.gmra.mxu0 %vm1270_vm2, %v1847_v60  ;;  %v5713_v60 = vld [vmem:[%s7749_s11 + $0x3] ss:$0 sm:$0xff] }
 0x8c9   : > { %6151 = vmatpush3.msra.mxu0 %v2003_v59  ;;  %v6139_v62 = vpop.f32.mrf.mxu1  ;;  %6158 = vmatprep.mubr.msk.f32.mxu0 %vm6774_vm0, %v6773_v0 }
 0x8ca   : > { %6152 = vmatprep.subr.mxu0 %v6773_v0  ;;  %v5710_v62 = vld [vmem:[%s7789_s6 + $0x3] ss:$0 sm:$0xff] }
 0x8cb   : > { %6153 = vmatpush3.msra.mxu0 %v2002_v61  ;;  %v7183_v1 = vpop.f32.mrf.mxu1 }
 0x8cc   : > { %6154 = vmatprep.subr.mxu0 %v6773_v0 }
 0x8cd   : > { %6155 = vmatpush3.msra.mxu0 %v2001_v63  ;;  %v6149_v3 = vpop.f32.mrf.mxu1 }
 0x8ce   : > { %6156 = vmatprep.subr.mxu0 %v6773_v0 }
 0x8cf   : > { %6157 = vmatpush3.msra.mxu0 %v2000_v2  ;;  %v5716_v2 = vld [vmem:[%s7751_s13 + $0x3] ss:$0 sm:$0xff] }
 0x8d0   : > { %6159 = vmatmul.mubr.msk.f32.vlgmr.msra.gmra.mxu0 %vm906_vm1, %v7073_v45  ;;  %6172 = vmatprep.subr.mxu0 %v6773_v0 }
 0x8d1   : > { %6173 = vmatpush3.msra.mxu0 %v2169_v4  ;;  %6180 = vmatprep.mubr.msk.f32.mxu0 %vm6774_vm0, %v6773_v0 }
 0x8d2   : > { %6174 = vmatprep.subr.mxu0 %v6773_v0 }
 0x8d3   : > { %v2161_v9 = vpop.f32.mrf.mxu1  ;;  %6175 = vmatpush3.msra.mxu0 %v2168_v5 }
 0x8d4   : > { %v2162_v10 = vadd.f32 %v5700_v6, %v2161_v9  ;;  %6176 = vmatprep.subr.mxu0 %v6773_v0 }
 0x8d5   : > { %v6171_v12 = vpop.f32.mrf.mxu1  ;;  %6177 = vmatpush3.msra.mxu0 %v2167_v8 }
 0x8d6   : > { %6178 = vmatprep.subr.mxu0 %v6773_v0  ;;  %6184 = vmatpush3.xpose.msk.msra.mxu1 %vm1270_vm2, %v2162_v10 }
 0x8d7   : > { %6179 = vmatpush3.msra.mxu0 %v2166_v11  ;;  %6188 = vmatprep.subr.mxu1 %v6773_v0 }
 0x8d8   : > { %6181 = vmatmul.mubr.msk.f32.vlgmr.msra.gmra.mxu0 %vm906_vm1, %v7073_v45  ;;  %6193 = vmatprep.subr.mxu0 %v6773_v0 }
 0x8d9   : > { %6195 = vmatprep.mubr.msk.f32.mxu0 %vm6774_vm0, %v6773_v0  ;;  %6194 = vmatpush3.msra.mxu0 %v2411_v33 }
 0x8da   : > { %6209 = vmatprep.subr.mxu0 %v6773_v0 }
 0x988   : > { %v7205_v13 = vpop.f32.mrf.mxu0 }
 0x989   : > { %v1996_v56 = vadd.f32 %v7183_v1, %v7205_v13 }
 0x98a   : > { %v6144_v14 = vpop.f32.mrf.mxu0 }
 0x990   : > { %v2078_v16 = vpop.f32.mrf.mxu0 }
 0x991   : > { %v2079_v17 = vadd.f32 %v5697_v15, %v2078_v16  ;;  %v2898_v16 = vld [vmem:[#allocation7 + $0x18] sm:$0xff] }
 0x992   : > { %v6160_v18 = vpop.f32.mrf.mxu0 }
 0x993   : > { %6186 = vmatmul.mubr.msk.f32.vlgmr.msra.gmra.mxu1 %vm1270_vm2, %v2079_v17 }
 0x994   : > { %6190 = vmatprep.mubr.msk.f32.mxu1 %vm6774_vm0, %v6773_v0 }
 0x998   : > { %v2244_v20 = vpop.f32.mrf.mxu0 }
 0x999   : > { %v2245_v21 = vadd.f32 %v5703_v19, %v2244_v20 }
 0x99a   : > { %v6182_v22 = vpop.f32.mrf.mxu0 }
 0x99b   : > { %6189 = vmatpush3.msra.mxu1 %v2245_v21 }
 0x99c   : > { %6198 = vmatprep.subr.mxu1 %v6773_v0 }
 0xa53   : > { %v2320_v23 = vpop.f32.mrf.mxu1 }
 0xa54   : > { %v2324_v24 = vmul.f32 0.35355338, %v2320_v23  ;;  %v5722_v23 = vld [vmem:[%s7753_s15] ss:$0 sm:$0xff] }
 0xa55   : > { %v6187_v25 = vpop.f32.mrf.mxu1 }
 0xa56   : > { %v2325_v26 = vadd.f32 %v7129_v7, %v2324_v24 }
 0xa58   : > { %v2326_v27 = vsel %vm1270_vm2, %v2325_v26, -inf }
 0xa59   : > { %2327 = vmax.xlane.f32.xlu0 %v2326_v27 }
 0xae2   : > { %v2328_v28 = vpop.xlane.xlu0 %2327 }
 0xae3   : > { %v2329_v29 = vsub.f32 %v2325_v26, %v2328_v28 }
 0xae5   : > { %v2330_v30 = vmul.f32 1.442695, %v2329_v29 }
 0xae7   : > { %6606 = vpow2.f32 %v2330_v30 }
 0xaf4   : > { %v6607_v31 = vpop.eup %6606 }
 0xaf5   : > { %v2332_v32 = vsel %vm1270_vm2, %v6607_v31, 0.0 }
 0xaf6   : > { %2333 = vadd.xlane.f32.xlu1 %v2332_v32 }
 0xb7f   : > { %v2334_v34 = vpop.xlane.xlu1 %2333 }
 0xb80   : > { %6608 = vrcp.f32 %v2334_v34  ;;  %v3014_v34 = vld [vmem:[%s7756_s18 + $0x18] sm:$0xff] }
 0xb8d   : > { %v6609_v35 = vpop.eup %6608 }
 0xb8e   : > { %v2336_v36 = vmul.f32 %v6609_v35, %v6607_v31  ;;  %v3012_v35 = vld [vmem:[%s7756_s18 + $0x8] sm:$0xff] }
 0xb90   : > { %6191 = vmatmul.mubr.msk.f32.vlgmr.msra.gmra.mxu1 %vm1270_vm2, %v2336_v36  ;;  %v3011_v36 = vld [vmem:[%s7756_s18] sm:$0xff] }
 0xb91   : > { %6199 = vmatpush3.msra.mxu1 %v2490_v37  ;;  %6206 = vmatprep.mubr.msk.f32.mxu1 %vm6774_vm0, %v6773_v0 }
 0xb92   : > { %6200 = vmatprep.subr.mxu1 %v6773_v0 }
 0xb93   : > { %6201 = vmatpush3.msra.mxu1 %v2489_v38 }
 0xb94   : > { %6202 = vmatprep.subr.mxu1 %v6773_v0 }
 0xb95   : > { %6203 = vmatpush3.msra.mxu1 %v2488_v39 }
 0xb96   : > { %6204 = vmatprep.subr.mxu1 %v6773_v0 }
 0xb97   : > { %6205 = vmatpush3.msra.mxu1 %v2487_v40 }
 0xb98   : > { %6207 = vmatmul.mubr.msk.f32.vlgmr.msra.gmra.mxu1 %vm906_vm1, %v7073_v45  ;;  %6220 = vmatprep.subr.mxu1 %v6773_v0 }
 0xb99   : > { %6221 = vmatpush3.msra.mxu1 %v2656_v41  ;;  %6228 = vmatprep.mubr.msk.f32.mxu1 %vm6774_vm0, %v6773_v0  ;;  %v5723_v41 = vld [vmem:[%s7754_s16] ss:$0 sm:$0xff] }
 0xb9a   : > { %6222 = vmatprep.subr.mxu1 %v6773_v0 }
 0xb9b   : > { %6223 = vmatpush3.msra.mxu1 %v2655_v42 }
 0xb9c   : > { %6224 = vmatprep.subr.mxu1 %v6773_v0 }
 0xb9d   : > { %6225 = vmatpush3.msra.mxu1 %v2654_v43  ;;  %v5724_v43 = vld [vmem:[%s7755_s17] ss:$0 sm:$0xff] }
 0xb9e   : > { %6226 = vmatprep.subr.mxu1 %v6773_v0 }
 0xb9f   : > { %6227 = vmatpush3.msra.mxu1 %v2653_v44 }
 0xba0   : > { %6229 = vmatmul.mubr.msk.f32.vlgmr.msra.gmra.mxu1 %vm906_vm1, %v7073_v45  ;;  %6241 = vmatprep.subr.mxu1 %v6773_v0 }
 0xba1   : > { %6243 = vmatprep.mubr.msk.f32.mxu1 %vm6774_vm0, %v6773_v0  ;;  %6242 = vmatpush3.msra.mxu1 %v2898_v16 }
 0xba2   : > { %6257 = vmatprep.subr.mxu1 %v6773_v0 }
 0xc50   : > { %v2406_v47 = vpop.f32.mrf.mxu1 }
 0xc51   : > { %6196 = vmatmul.mubr.msk.f32.vlgmr.msra.gmra.mxu0 %vm1270_vm2, %v2406_v47  ;;  %v3119_v47 = vld [vmem:[%s7758_s20 + $0x78] sm:$0xff] }
 0xc52   : > { %6210 = vmatpush3.msra.mxu0 %v2573_v46  ;;  %v6192_v49 = vpop.f32.mrf.mxu1  ;;  %6217 = vmatprep.mubr.msk.f32.mxu0 %vm6774_vm0, %v6773_v0 }
 0xc53   : > { %6211 = vmatprep.subr.mxu0 %v6773_v0  ;;  %v3117_v49 = vld [vmem:[%s7758_s20 + $0x68] sm:$0xff] }
 0xc54   : > { %6212 = vmatpush3.msra.mxu0 %v2572_v48  ;;  %v3118_v48 = vld [vmem:[%s7758_s20 + $0x70] sm:$0xff] }
 0xc55   : > { %6213 = vmatprep.subr.mxu0 %v6773_v0 }
 0xc56   : > { %6214 = vmatpush3.msra.mxu0 %v2571_v50  ;;  %v3116_v50 = vld [vmem:[%s7758_s20 + $0x60] sm:$0xff] }
 0xc57   : > { %6215 = vmatprep.subr.mxu0 %v6773_v0 }
 0xc58   : > { %v2565_v52 = vpop.f32.mrf.mxu1  ;;  %6216 = vmatpush3.msra.mxu0 %v2570_v51  ;;  %v3115_v51 = vld [vmem:[%s7758_s20 + $0x58] sm:$0xff] }
 0xc59   : > { %6218 = vmatmul.mubr.msk.f32.vlgmr.msra.gmra.mxu0 %vm906_vm1, %v7073_v45  ;;  %6231 = vmatprep.subr.mxu0 %v6773_v0  ;;  %v2566_v1 = vadd.f32 %v5710_v62, %v2565_v52  ;;  %v3114_v52 = vld [vmem:[%s7758_s20 + $0x50] sm:$0xff]  ;;  %v3104_v62 = vld [vmem:[%s7758_s20] sm:$0xff] }
 0xc5a   : > { %v6208_v53 = vpop.f32.mrf.mxu1  ;;  %6233 = vmatprep.mubr.msk.f32.mxu0 %vm6774_vm0, %v6773_v0 }
 0xc5b   : > { %v3113_v53 = vld [vmem:[%s7758_s20 + $0x48] sm:$0xff] }
 0xc60   : > { %v2731_v54 = vpop.f32.mrf.mxu1 }
 0xc61   : > { %v2732_v4 = vadd.f32 %v5716_v2, %v2731_v54  ;;  %v3112_v54 = vld [vmem:[%s7758_s20 + $0x40] sm:$0xff] }
 0xc62   : > { %v6230_v55 = vpop.f32.mrf.mxu1 }
 0xc63   : > { %v3111_v55 = vld [vmem:[%s7758_s20 + $0x38] sm:$0xff] }
 0xd11   : > { %v2481_v57 = vpop.f32.mrf.mxu0 }
 0xd12   : > { %v2485_v58 = vadd.f32 %v2481_v57, %v1996_v56  ;;  %v3110_v56 = vld [vmem:[%s7758_s20 + $0x30] sm:$0xff]  ;;  %v3109_v57 = vld [vmem:[%s7758_s20 + $0x28] sm:$0xff] }
 0xd13   : > { %v6197_v59 = vpop.f32.mrf.mxu0 }
 0xd14   : > { %v3107_v59 = vld [vmem:[%s7758_s20 + $0x18] sm:$0xff] }
 0xd19   : > { %v2648_v61 = vpop.f32.mrf.mxu0 }
 0xd1a   : > { %v2649_v63 = vadd.f32 %v5713_v60, %v2648_v61  ;;  %v3106_v60 = vld [vmem:[%s7758_s20 + $0x10] sm:$0xff]  ;;  %v3105_v61 = vld [vmem:[%s7758_s20 + $0x8] sm:$0xff] }
 0xd1b   : > { %v6219_v3 = vpop.f32.mrf.mxu0 }
 0xd1c   : > { %6232 = vmatpush3.xpose.msk.msra.mxu0 %vm1270_vm2, %v2649_v63  ;;  %v5725_v63 = vld [vmem:[%s7757_s19] ss:$0 sm:$0xff] }
 0xd1d   : > { %6236 = vmatprep.subr.mxu0 %v6773_v0 }
 0xd1f   : > { %6234 = vmatmul.mubr.msk.f32.vlgmr.msra.gmra.mxu0 %vm1270_vm2, %v2566_v1 }
 0xd20   : > { %6237 = vmatpush3.msra.mxu0 %v2732_v4  ;;  %6238 = vmatprep.mubr.msk.f32.mxu0 %vm6774_vm0, %v6773_v0 }
 0xd21   : > { %6246 = vmatprep.subr.mxu0 %v6773_v0 }
 0xddf   : > { %v2807_v5 = vpop.f32.mrf.mxu0 }
 0xde0   : > { %v2811_v6 = vmul.f32 0.35355338, %v2807_v5 }
 0xde1   : > { %v6235_v8 = vpop.f32.mrf.mxu0 }
 0xde2   : > { %v2812_v9 = vadd.f32 %v7129_v7, %v2811_v6 }
 0xde4   : > { %v2813_v10 = vsel %vm1270_vm2, %v2812_v9, -inf }
 0xde5   : > { %2814 = vmax.xlane.f32.xlu0 %v2813_v10 }
 0xe6e   : > { %v2815_v11 = vpop.xlane.xlu0 %2814 }
 0xe6f   : > { %v2816_v12 = vsub.f32 %v2812_v9, %v2815_v11 }
 0xe71   : > { %v2817_v13 = vmul.f32 1.442695, %v2816_v12 }
 0xe73   : > { %6610 = vpow2.f32 %v2817_v13 }
 0xe80   : > { %v6611_v14 = vpop.eup %6610 }
 0xe81   : > { %v2819_v15 = vsel %vm1270_vm2, %v6611_v14, 0.0 }
 0xe82   : > { %2820 = vadd.xlane.f32.xlu1 %v2819_v15 }
 0xf0b   : > { %v2821_v17 = vpop.xlane.xlu1 %2820 }
 0xf0c   : > { %6612 = vrcp.f32 %v2821_v17 }
 0xf19   : > { %v6613_v18 = vpop.eup %6612 }
 0xf1a   : > { %v2823_v19 = vmul.f32 %v6613_v18, %v6611_v14  ;;  %v5727_v14 = vld [vmem:[%s7759_s21] ss:$0 sm:$0xff] }
 0xf1c   : > { %6239 = vmatmul.mubr.msk.f32.vlgmr.msra.gmra.mxu0 %vm1270_vm2, %v2823_v19 }
 0xf1d   : > { %6254 = vmatprep.mubr.msk.f32.mxu0 %vm6774_vm0, %v6773_v0  ;;  %6247 = vmatpush3.msra.mxu0 %v3014_v34 }
 0xf1e   : > { %6248 = vmatprep.subr.mxu0 %v6773_v0 }
 0xfdc   : > { %v2893_v20 = vpop.f32.mrf.mxu0 }
 0xfdd   : > { %6244 = vmatmul.mubr.msk.f32.vlgmr.msra.gmra.mxu1 %vm1270_vm2, %v2893_v20 }
 0xfde   : > { %v6240_v21 = vpop.f32.mrf.mxu0  ;;  %6289 = vmatprep.mubr.msk.f32.mxu1 %vm6774_vm0, %v6773_v0  ;;  %6258 = vmatpush3.msra.mxu1 %v3119_v47 }
 0xfdf   : > { %6259 = vmatprep.subr.mxu1 %v6773_v0 }
 0xfe0   : > { %6260 = vmatpush3.msra.mxu1 %v3118_v48  ;;  %v5734_v48 = vld [vmem:[%s7749_s11 + $0x4] ss:$0 sm:$0xff] }
 0xfe1   : > { %6261 = vmatprep.subr.mxu1 %v6773_v0 }
 0xfe2   : > { %6262 = vmatpush3.msra.mxu1 %v3117_v49 }
 0xfe3   : > { %6263 = vmatprep.subr.mxu1 %v6773_v0 }
 0xfe4   : > { %6264 = vmatpush3.msra.mxu1 %v3116_v50  ;;  %v5731_v50 = vld [vmem:[%s7789_s6 + $0x4] ss:$0 sm:$0xff] }
 0xfe5   : > { %6265 = vmatprep.subr.mxu1 %v6773_v0 }
 0xfe6   : > { %6266 = vmatpush3.msra.mxu1 %v3115_v51 }
 0xfe7   : > { %6267 = vmatprep.subr.mxu1 %v6773_v0 }
 0xfe8   : > { %6268 = vmatpush3.msra.mxu1 %v3114_v52 }
 0xfe9   : > { %6269 = vmatprep.subr.mxu1 %v6773_v0 }
 0xfea   : > { %6270 = vmatpush3.msra.mxu1 %v3113_v53 }
 0xfeb   : > { %6271 = vmatprep.subr.mxu1 %v6773_v0 }
 0xfec   : > { %6272 = vmatpush3.msra.mxu1 %v3112_v54  ;;  %v3647_v54 = vld [vmem:[#allocation2 + $0xb8] sm:$0xff] }
 0xfed   : > { %6273 = vmatprep.subr.mxu1 %v6773_v0 }
 0xfee   : > { %6274 = vmatpush3.msra.mxu1 %v3111_v55  ;;  %v5737_v55 = vld [vmem:[%s7751_s13 + $0x4] ss:$0 sm:$0xff] }
 0xfef   : > { %6275 = vmatprep.subr.mxu1 %v6773_v0 }
 0xff0   : > { %6276 = vmatpush3.msra.mxu1 %v3110_v56  ;;  %v3646_v56 = vld [vmem:[#allocation2 + $0xb0] sm:$0xff] }
 0xff1   : > { %6277 = vmatprep.subr.mxu1 %v6773_v0 }
 0xff2   : > { %6278 = vmatpush3.msra.mxu1 %v3109_v57 }
 0xff3   : > { %6279 = vmatprep.subr.mxu1 %v6773_v0 }
0x109d   : > { %v2968_v22 = vpop.f32.mrf.mxu1 }
0x109e   : > { %v2972_v24 = vadd.f32 %v2968_v22, %v2485_v58  ;;  %v3108_v58 = vld [vmem:[%s7758_s20 + $0x20] sm:$0xff] }
0x109f   : > { %v6245_v25 = vpop.f32.mrf.mxu1  ;;  %6280 = vmatpush3.msra.mxu1 %v3108_v58  ;;  %v3645_v58 = vld [vmem:[#allocation2 + $0xa8] sm:$0xff] }
0x10a0   : > { %v2980_v26 = vadd.f32 %v5722_v23, %v2972_v24  ;;  %6281 = vmatprep.subr.mxu1 %v6773_v0  ;;  %v3231_v25 = vld [vmem:[#allocation2 + $0x98] sm:$0xff] }
0x10a1   : > { %6282 = vmatpush3.msra.mxu1 %v3107_v59 }
0x10a2   : > { %v2981_v27 = vadd.f32 %v2980_v26, %v7073_v45  ;;  %v3013_v45 = vld [vmem:[%s7756_s18 + $0x10] sm:$0xff]  ;;  %6283 = vmatprep.subr.mxu1 %v6773_v0 }
0x10a3   : > { %6249 = vmatpush3.msra.mxu0 %v3013_v45  ;;  %6284 = vmatpush3.msra.mxu1 %v3106_v60  ;;  %v3230_v26 = vld [vmem:[#allocation2 + $0x90] sm:$0xff]  ;;  %v5729_v45 = vld [vmem:[%s7761_s23] ss:$0 sm:$0xff] }
0x10a4   : > { %v2984_v28 = vsel %vm906_vm1, %v2981_v27, 0.0  ;;  %6250 = vmatprep.subr.mxu0 %v6773_v0  ;;  %6285 = vmatprep.subr.mxu1 %v6773_v0 }
0x10a5   : > { %2985 = vadd.xlane.f32.xlu0 %v2984_v28  ;;  %6251 = vmatpush3.msra.mxu0 %v3012_v35  ;;  %v3228_v28 = vld [vmem:[#allocation2 + $0x80] sm:$0xff] }
0x10a6   : > { %6252 = vmatprep.subr.mxu0 %v6773_v0  ;;  %6286 = vmatpush3.msra.mxu1 %v3105_v61  ;;  %v3644_v61 = vld [vmem:[#allocation2 + $0xa0] sm:$0xff] }
0x10a7   : > { %6253 = vmatpush3.msra.mxu0 %v3011_v36  ;;  %6287 = vmatprep.subr.mxu1 %v6773_v0 }
0x10a8   : > { %6292 = vmatprep.subr.mxu0 %v6773_v0  ;;  %6288 = vmatpush3.msra.mxu1 %v3104_v62  ;;  %v3813_v62 = vld [vmem:[#allocation6 + $0xb8] sm:$0xff] }
0x10a9   : > { %6330 = vmatprep.subr.mxu1 %v6773_v0 }
0x112e   : > { %v2986_v29 = vpop.xlane.xlu0 %2985 }
0x112f   : > { %v2987_v30 = vmul.f32 0.03125, %v2986_v29 }
0x1131   : > { %v2988_v31 = vsub.f32 %v2981_v27, %v2987_v30  ;;  %v3229_v27 = vld [vmem:[#allocation2 + $0x88] sm:$0xff] }
0x1133   : > { %v2989_v32 = vmul.f32 %v2988_v31, %v2988_v31 }
0x1135   : > { %v2990_v33 = vsel %vm906_vm1, %v2989_v32, 0.0 }
0x1136   : > { %2991 = vadd.xlane.f32.xlu1 %v2990_v33  ;;  %v5728_v33 = vld [vmem:[%s7760_s22] ss:$0 sm:$0xff] }
0x11bf   : > { %v2992_v37 = vpop.xlane.xlu1 %2991 }
0x11c0   : > { %v2993_v38 = vmul.f32 0.03125, %v2992_v37  ;;  %v3317_v37 = vld [vmem:[#allocation4 + $0x98] sm:$0xff] }
0x11c2   : > { %v2994_v39 = vadd.f32 1e-12, %v2993_v38  ;;  %v3316_v38 = vld [vmem:[#allocation4 + $0x90] sm:$0xff] }
0x11c4   : > { %6614 = vrsqrt.f32 %v2994_v39  ;;  %v3315_v39 = vld [vmem:[#allocation4 + $0x88] sm:$0xff] }
0x11d1   : > { %v6615_v40 = vpop.eup %6614 }
0x11d2   : > { %v2996_v42 = vmul.f32 %v6615_v40, %v2988_v31  ;;  %v3314_v40 = vld [vmem:[#allocation4 + $0x80] sm:$0xff] }
0x11d4   : > { %v3003_v44 = vmul.f32 %v5723_v41, %v2996_v42  ;;  %v3400_v41 = vld [vmem:[#allocation6 + $0x98] sm:$0xff]  ;;  %v3399_v42 = vld [vmem:[#allocation6 + $0x90] sm:$0xff] }
0x11d6   : > { %v7306_v46 = vadd.f32 %v5724_v43, %v3003_v44  ;;  %v3398_v43 = vld [vmem:[#allocation6 + $0x88] sm:$0xff]  ;;  %v3397_v44 = vld [vmem:[#allocation6 + $0x80] sm:$0xff] }
0x11d8   : > { %6255 = vmatmul.mubr.msk.f32.vlgmr.msra.gmra.mxu0 %vm906_vm1, %v7306_v46 }
0x11d9   : > { %6300 = vmatprep.mubr.msk.f32.mxu0 %vm6774_vm0, %v6773_v0  ;;  %6293 = vmatpush3.msra.mxu0 %v3231_v25 }
0x11da   : > { %6294 = vmatprep.subr.mxu0 %v6773_v0 }
0x11db   : > { %6295 = vmatpush3.msra.mxu0 %v3230_v26  ;;  %v5746_v26 = vld [vmem:[%s7749_s11 + $0x5] ss:$0 sm:$0xff] }
0x11dc   : > { %6296 = vmatprep.subr.mxu0 %v6773_v0 }
0x11dd   : > { %6297 = vmatpush3.msra.mxu0 %v3229_v27 }
0x11de   : > { %6298 = vmatprep.subr.mxu0 %v6773_v0 }
0x11df   : > { %6299 = vmatpush3.msra.mxu0 %v3228_v28  ;;  %v5743_v28 = vld [vmem:[%s7789_s6 + $0x5] ss:$0 sm:$0xff] }
0x11e0   : > { %6303 = vmatprep.subr.mxu0 %v6773_v0 }
0x1298   : > { %v3091_v2 = vpop.f32.mrf.mxu0 }
0x1299   : > { %v3092_v3 = vadd.f32 %v5725_v63, %v3091_v2  ;;  %v3812_v63 = vld [vmem:[#allocation6 + $0xb0] sm:$0xff]  ;;  %v3811_v2 = vld [vmem:[#allocation6 + $0xa8] sm:$0xff] }
0x129a   : > { %v6256_v1 = vpop.f32.mrf.mxu0 }
0x129b   : > { %v3096_v4 = vmul.f32 0.044715, %v3092_v3  ;;  %v3095_v11 = vmul.f32 0.5, %v3092_v3 }
0x129d   : > { %v3097_v5 = vmul.f32 %v3096_v4, %v3092_v3 }
0x129f   : > { %v3098_v6 = vmul.f32 %v3097_v5, %v3092_v3 }
0x12a1   : > { %v3099_v8 = vadd.f32 %v3098_v6, %v3092_v3  ;;  %v3810_v3 = vld [vmem:[#allocation6 + $0xa0] sm:$0xff] }
0x12a3   : > { %v3100_v9 = vmul.f32 0.7978846, %v3099_v8 }
0x12a5   : > { %6616 = vtanh.f32 %v3100_v9 }
0x12b2   : > { %v6617_v10 = vpop.eup %6616 }
0x12b3   : > { %v3102_v12 = vadd.f32 1.0, %v6617_v10 }
0x12b5   : > { %v3103_v13 = vmul.f32 %v3102_v12, %v3095_v11 }
0x12b7   : > { %6290 = vmatmul.mubr.f32.vlgmr.msra.gmra.mxu1 %v3103_v13 }
0x12b8   : > { %6332 = vmatprep.mubr.msk.f32.mxu1 %vm6774_vm0, %v6773_v0 }
0x1377   : > { %v3193_v15 = vpop.f32.mrf.mxu1 }
0x1378   : > { %v3194_v16 = vadd.f32 %v5727_v14, %v3193_v15 }
0x1379   : > { %v6291_v17 = vpop.f32.mrf.mxu1 }
0x137a   : > { %v3197_v18 = vadd.f32 %v3194_v16, %v7306_v46 }
0x137c   : > { %v3200_v19 = vsel %vm906_vm1, %v3197_v18, 0.0 }
0x137d   : > { %3201 = vadd.xlane.f32.xlu0 %v3200_v19 }
0x1406   : > { %v3202_v20 = vpop.xlane.xlu0 %3201 }
0x1407   : > { %v3203_v21 = vmul.f32 0.03125, %v3202_v20 }
0x1409   : > { %v3204_v22 = vsub.f32 %v3197_v18, %v3203_v21  ;;  %v3729_v21 = vld [vmem:[#allocation4 + $0xb0] sm:$0xff] }
0x140b   : > { %v3205_v23 = vmul.f32 %v3204_v22, %v3204_v22 }
0x140d   : > { %v3206_v24 = vsel %vm906_vm1, %v3205_v23, 0.0  ;;  %v3727_v23 = vld [vmem:[#allocation4 + $0xa0] sm:$0xff] }
0x140e   : > { %3207 = vadd.xlane.f32.xlu1 %v3206_v24 }
0x1497   : > { %v3208_v29 = vpop.xlane.xlu1 %3207 }
0x1498   : > { %v3209_v30 = vmul.f32 0.03125, %v3208_v29 }
0x149a   : > { %v3210_v31 = vadd.f32 1e-12, %v3209_v30  ;;  %v5749_v30 = vld [vmem:[%s7751_s13 + $0x5] ss:$0 sm:$0xff] }
0x149c   : > { %6618 = vrsqrt.f32 %v3210_v31 }
0x14a9   : > { %v6619_v32 = vpop.eup %6618 }
0x14aa   : > { %v3212_v34 = vmul.f32 %v6619_v32, %v3204_v22  ;;  %v3728_v22 = vld [vmem:[#allocation4 + $0xa8] sm:$0xff] }
0x14ac   : > { %v3219_v35 = vmul.f32 %v5728_v33, %v3212_v34 }
0x14ae   : > { %v7397_v36 = vadd.f32 %v5729_v45, %v3219_v35 }
0x14b0   : > { %6301 = vmatmul.mubr.msk.f32.vlgmr.msra.gmra.mxu0 %vm906_vm1, %v7397_v36 }
0x14b1   : > { %6304 = vmatpush3.msra.mxu0 %v3317_v37  ;;  %6311 = vmatprep.mubr.msk.f32.mxu0 %vm6774_vm0, %v6773_v0  ;;  %v7480_v37 = vld [vmem:[%s7126_s9] ss:$0 sm:$0xff] }
0x14b2   : > { %6305 = vmatprep.subr.mxu0 %v6773_v0 }
0x14b3   : > { %6306 = vmatpush3.msra.mxu0 %v3316_v38 }
0x14b4   : > { %6307 = vmatprep.subr.mxu0 %v6773_v0 }
0x14b5   : > { %6308 = vmatpush3.msra.mxu0 %v3315_v39 }
0x14b6   : > { %6309 = vmatprep.subr.mxu0 %v6773_v0 }
0x14b7   : > { %6310 = vmatpush3.msra.mxu0 %v3314_v40 }
0x14b8   : > { %6312 = vmatmul.mubr.msk.f32.vlgmr.msra.gmra.mxu0 %vm906_vm1, %v7397_v36  ;;  %6314 = vmatprep.subr.mxu0 %v6773_v0 }
0x14b9   : > { %6315 = vmatpush3.msra.mxu0 %v3400_v41  ;;  %6322 = vmatprep.mubr.msk.f32.mxu0 %vm6774_vm0, %v6773_v0 }
0x14ba   : > { %6316 = vmatprep.subr.mxu0 %v6773_v0 }
0x14bb   : > { %6317 = vmatpush3.msra.mxu0 %v3399_v42 }
0x14bc   : > { %6318 = vmatprep.subr.mxu0 %v6773_v0 }
0x14bd   : > { %6319 = vmatpush3.msra.mxu0 %v3398_v43 }
0x14be   : > { %6320 = vmatprep.subr.mxu0 %v6773_v0 }
0x14bf   : > { %6321 = vmatpush3.msra.mxu0 %v3397_v44 }
0x14c0   : > { %6323 = vmatmul.mubr.msk.f32.vlgmr.msra.gmra.mxu0 %vm906_vm1, %v7397_v36  ;;  %6325 = vmatprep.subr.mxu0 %v6773_v0 }
0x14c1   : > { %6327 = vmatprep.mubr.msk.f32.mxu0 %vm6774_vm0, %v6773_v0 }
0x1570   : > { %v3309_v46 = vpop.f32.mrf.mxu0 }
0x1571   : > { %v3310_v53 = vadd.f32 %v5731_v50, %v3309_v46  ;;  %v4055_v46 = vld [vmem:[#allocation7 + $0x28] sm:$0xff]  ;;  %v3642_v50 = vld [vmem:[#allocation7 + $0x20] sm:$0xff] }
0x1572   : > { %v6302_v47 = vpop.f32.mrf.mxu0 }
0x1578   : > { %v3392_v49 = vpop.f32.mrf.mxu0 }
0x1579   : > { %v3393_v51 = vadd.f32 %v5734_v48, %v3392_v49 }
0x157a   : > { %v6313_v52 = vpop.f32.mrf.mxu0 }
0x157b   : > { %6326 = vmatpush3.xpose.msk.msra.mxu0 %vm1270_vm2, %v3393_v51  ;;  %v4289_v51 = vld [vmem:[#allocation4 + $0xd8] sm:$0xff]  ;;  %v4288_v52 = vld [vmem:[#allocation4 + $0xd0] sm:$0xff] }
0x157c   : > { %6335 = vmatprep.subr.mxu0 %v6773_v0 }
0x157e   : > { %6328 = vmatmul.mubr.msk.f32.vlgmr.msra.gmra.mxu0 %vm1270_vm2, %v3310_v53  ;;  %v4287_v53 = vld [vmem:[#allocation4 + $0xc8] sm:$0xff] }
0x157f   : > { %6336 = vmatpush3.msra.mxu0 %v3647_v54  ;;  %6343 = vmatprep.mubr.msk.f32.mxu0 %vm6774_vm0, %v6773_v0  ;;  %v4286_v54 = vld [vmem:[#allocation4 + $0xc0] sm:$0xff] }
0x1580   : > { %v3475_v57 = vpop.f32.mrf.mxu0  ;;  %6337 = vmatprep.subr.mxu0 %v6773_v0 }
0x1581   : > { %v3476_v59 = vadd.f32 %v5737_v55, %v3475_v57  ;;  %6338 = vmatpush3.msra.mxu0 %v3646_v56  ;;  %v4206_v55 = vld [vmem:[#allocation2 + $0xd8] sm:$0xff]  ;;  %v4205_v57 = vld [vmem:[#allocation2 + $0xd0] sm:$0xff] }
0x1582   : > { %v6324_v60 = vpop.f32.mrf.mxu0  ;;  %6339 = vmatprep.subr.mxu0 %v6773_v0 }
0x1583   : > { %6331 = vmatpush3.msra.mxu1 %v3476_v59  ;;  %6340 = vmatpush3.msra.mxu0 %v3645_v58  ;;  %v4204_v59 = vld [vmem:[#allocation2 + $0xc8] sm:$0xff] }
0x1584   : > { %6341 = vmatprep.subr.mxu0 %v6773_v0  ;;  %6346 = vmatprep.subr.mxu1 %v6773_v0 }
0x1585   : > { %6342 = vmatpush3.msra.mxu0 %v3644_v61  ;;  %v4203_v61 = vld [vmem:[#allocation2 + $0xc0] sm:$0xff] }
0x1586   : > { %6344 = vmatmul.mubr.msk.f32.vlgmr.msra.gmra.mxu0 %vm906_vm1, %v7397_v36  ;;  %6357 = vmatprep.subr.mxu0 %v6773_v0 }
0x1587   : > { %6358 = vmatpush3.msra.mxu0 %v3813_v62  ;;  %6365 = vmatprep.mubr.msk.f32.mxu0 %vm6774_vm0, %v6773_v0 }
0x1588   : > { %6359 = vmatprep.subr.mxu0 %v6773_v0 }
0x1589   : > { %6360 = vmatpush3.msra.mxu0 %v3812_v63  ;;  %v4372_v63 = vld [vmem:[#allocation6 + $0xd8] sm:$0xff] }
0x158a   : > { %6361 = vmatprep.subr.mxu0 %v6773_v0 }
0x158b   : > { %6362 = vmatpush3.msra.mxu0 %v3811_v2  ;;  %v4371_v2 = vld [vmem:[#allocation6 + $0xd0] sm:$0xff] }
0x158c   : > { %6363 = vmatprep.subr.mxu0 %v6773_v0 }
0x158d   : > { %6364 = vmatpush3.msra.mxu0 %v3810_v3  ;;  %v5760_v3 = vld [vmem:[%s7749_s11 + $0x6] ss:$0 sm:$0xff] }
0x158e   : > { %6366 = vmatmul.mubr.msk.f32.vlgmr.msra.gmra.mxu0 %vm906_vm1, %v7397_v36  ;;  %6378 = vmatprep.subr.mxu0 %v6773_v0 }
0x158f   : > { %6380 = vmatprep.mubr.msk.f32.mxu0 %vm6774_vm0, %v6773_v0  ;;  %6379 = vmatpush3.msra.mxu0 %v4055_v46  ;;  %v4774_v46 = vld [vmem:[#allocation4 + $0xe8] sm:$0xff] }
0x1590   : > { %6388 = vmatprep.subr.mxu0 %v6773_v0 }
0x163e   : > { %v3551_v1 = vpop.f32.mrf.mxu0 }
0x163f   : > { %v3555_v4 = vmul.f32 0.35355338, %v3551_v1  ;;  %v4370_v1 = vld [vmem:[#allocation6 + $0xc8] sm:$0xff] }
0x1640   : > { %v6329_v5 = vpop.f32.mrf.mxu0 }
0x1641   : > { %v3556_v6 = vadd.f32 %v7129_v7, %v3555_v4  ;;  %v3730_v7 = vld [vmem:[#allocation4 + $0xb8] sm:$0xff] }
0x1643   : > { %v3557_v8 = vsel %vm1270_vm2, %v3556_v6, -inf }
0x1644   : > { %3558 = vmax.xlane.f32.xlu0 %v3557_v8 }
0x1646   : > { %v3722_v9 = vpop.f32.mrf.mxu0 }
0x1647   : > { %v3723_v32 = vadd.f32 %v5743_v28, %v3722_v9  ;;  %v4614_v28 = vld [vmem:[#allocation7 + $0x30] sm:$0xff] }
0x1648   : > { %v6345_v10 = vpop.f32.mrf.mxu0 }
0x164e   : > { %v3888_v11 = vpop.f32.mrf.mxu0 }
0x164f   : > { %v3889_v33 = vadd.f32 %v5749_v30, %v3888_v11  ;;  %v5757_v11 = vld [vmem:[%s7789_s6 + $0x6] ss:$0 sm:$0xff] }
0x1650   : > { %v6367_v12 = vpop.f32.mrf.mxu0 }
0x16cd   : > { %v3559_v13 = vpop.xlane.xlu0 %3558 }
0x16ce   : > { %v3560_v14 = vsub.f32 %v3556_v6, %v3559_v13  ;;  %v4369_v6 = vld [vmem:[#allocation6 + $0xc0] sm:$0xff] }
0x16d0   : > { %v3561_v15 = vmul.f32 1.442695, %v3560_v14 }
0x16d2   : > { %6620 = vpow2.f32 %v3561_v15  ;;  %v5763_v15 = vld [vmem:[%s7751_s13 + $0x6] ss:$0 sm:$0xff] }
0x16df   : > { %v6621_v16 = vpop.eup %6620 }
0x16e0   : > { %v3563_v17 = vsel %vm1270_vm2, %v6621_v16, 0.0 }
0x16e1   : > { %3564 = vadd.xlane.f32.xlu1 %v3563_v17 }
0x176a   : > { %v3565_v18 = vpop.xlane.xlu1 %3564 }
0x176b   : > { %6622 = vrcp.f32 %v3565_v18 }
0x1778   : > { %v6623_v19 = vpop.eup %6622 }
0x1779   : > { %v3567_v20 = vmul.f32 %v6623_v19, %v6621_v16 }
0x177b   : > { %6333 = vmatmul.mubr.msk.f32.vlgmr.msra.gmra.mxu1 %vm1270_vm2, %v3567_v20 }
0x177c   : > { %6347 = vmatpush3.msra.mxu1 %v3730_v7  ;;  %6354 = vmatprep.mubr.msk.f32.mxu1 %vm6774_vm0, %v6773_v0 }
0x177d   : > { %6348 = vmatprep.subr.mxu1 %v6773_v0 }
0x177e   : > { %6349 = vmatpush3.msra.mxu1 %v3729_v21 }
0x177f   : > { %6350 = vmatprep.subr.mxu1 %v6773_v0 }
0x1780   : > { %6351 = vmatpush3.msra.mxu1 %v3728_v22 }
0x1781   : > { %6352 = vmatprep.subr.mxu1 %v6773_v0 }
0x1782   : > { %6353 = vmatpush3.msra.mxu1 %v3727_v23 }
0x1783   : > { %6355 = vmatmul.mubr.msk.f32.vlgmr.msra.gmra.mxu1 %vm906_vm1, %v7397_v36  ;;  %6368 = vmatprep.subr.mxu1 %v6773_v0 }
0x1784   : > { %6370 = vmatprep.mubr.msk.f32.mxu1 %vm6774_vm0, %v6773_v0 }
0x183b   : > { %v3637_v24 = vpop.f32.mrf.mxu1 }
0x183d   : > { %v6334_v25 = vpop.f32.mrf.mxu1 }
0x1843   : > { %v3805_v27 = vpop.f32.mrf.mxu1 }
0x1844   : > { %v3806_v29 = vadd.f32 %v5746_v26, %v3805_v27 }
0x1845   : > { %v6356_v31 = vpop.f32.mrf.mxu1 }
0x1846   : > { %6369 = vmatpush3.xpose.msk.msra.mxu1 %vm1270_vm2, %v3806_v29 }
0x1847   : > { %6373 = vmatprep.subr.mxu1 %v6773_v0 }
0x1849   : > { %6371 = vmatmul.mubr.msk.f32.vlgmr.msra.gmra.mxu1 %vm1270_vm2, %v3723_v32  ;;  %v4693_v32 = vld [vmem:[#allocation2 + $0xf8] sm:$0xff] }
0x184a   : > { %6374 = vmatpush3.msra.mxu1 %v3889_v33  ;;  %6375 = vmatprep.mubr.msk.f32.mxu1 %vm6774_vm0, %v6773_v0  ;;  %v4692_v33 = vld [vmem:[#allocation2 + $0xf0] sm:$0xff] }
0x184b   : > { %6383 = vmatprep.subr.mxu1 %v6773_v0 }
0x1909   : > { %v3964_v34 = vpop.f32.mrf.mxu1 }
0x190a   : > { %v3968_v45 = vmul.f32 0.35355338, %v3964_v34  ;;  %v4691_v34 = vld [vmem:[#allocation2 + $0xe8] sm:$0xff] }
0x190b   : > { %v6372_v35 = vpop.f32.mrf.mxu1 }
0x190c   : > { %v3969_v38 = vadd.f32 %v7480_v37, %v3968_v45  ;;  %v4690_v45 = vld [vmem:[#allocation2 + $0xe0] sm:$0xff]  ;;  %v4859_v35 = vld [vmem:[#allocation6 + $0xf8] sm:$0xff] }
0x190e   : > { %v3970_v39 = vsel %vm1270_vm2, %v3969_v38, -inf }
0x190f   : > { %3971 = vmax.xlane.f32.xlu0 %v3970_v39  ;;  %v4857_v39 = vld [vmem:[#allocation6 + $0xe8] sm:$0xff] }
0x1998   : > { %v3972_v40 = vpop.xlane.xlu0 %3971 }
0x1999   : > { %v3973_v41 = vsub.f32 %v3969_v38, %v3972_v40  ;;  %v4858_v38 = vld [vmem:[#allocation6 + $0xf0] sm:$0xff]  ;;  %v4856_v40 = vld [vmem:[#allocation6 + $0xe0] sm:$0xff] }
0x199b   : > { %v3974_v42 = vmul.f32 1.442695, %v3973_v41  ;;  %v4776_v41 = vld [vmem:[#allocation4 + $0xf8] sm:$0xff] }
0x199d   : > { %6624 = vpow2.f32 %v3974_v42 }
0x19aa   : > { %v6625_v43 = vpop.eup %6624 }
0x19ab   : > { %v3976_v44 = vsel %vm1270_vm2, %v6625_v43, 0.0 }
0x19ac   : > { %3977 = vadd.xlane.f32.xlu1 %v3976_v44 }
0x1a35   : > { %v3978_v47 = vpop.xlane.xlu1 %3977 }
0x1a36   : > { %6626 = vrcp.f32 %v3978_v47  ;;  %v4773_v47 = vld [vmem:[#allocation4 + $0xe0] sm:$0xff] }
0x1a43   : > { %v6627_v48 = vpop.eup %6626 }
0x1a44   : > { %v3980_v49 = vmul.f32 %v6627_v48, %v6625_v43  ;;  %v4775_v43 = vld [vmem:[#allocation4 + $0xf0] sm:$0xff] }
0x1a46   : > { %6376 = vmatmul.mubr.msk.f32.vlgmr.msra.gmra.mxu1 %vm1270_vm2, %v3980_v49 }
0x1a47   : > { %6384 = vmatpush3.msra.mxu1 %v3642_v50  ;;  %6385 = vmatprep.mubr.msk.f32.mxu1 %vm6774_vm0, %v6773_v0 }
0x1a48   : > { %6399 = vmatprep.subr.mxu1 %v6773_v0 }
0x1a4a   : > { %6386 = vmatmul.mubr.msk.f32.vlgmr.msra.gmra.mxu1 %vm1270_vm2, %v3637_v24 }
0x1a4b   : > { %6400 = vmatpush3.msra.mxu1 %v4289_v51  ;;  %6407 = vmatprep.mubr.msk.f32.mxu1 %vm6774_vm0, %v6773_v0 }
0x1a4c   : > { %6401 = vmatprep.subr.mxu1 %v6773_v0 }
0x1a4d   : > { %6402 = vmatpush3.msra.mxu1 %v4288_v52 }
0x1a4e   : > { %6403 = vmatprep.subr.mxu1 %v6773_v0 }
0x1a4f   : > { %6404 = vmatpush3.msra.mxu1 %v4287_v53 }
0x1a50   : > { %6405 = vmatprep.subr.mxu1 %v6773_v0 }
0x1a51   : > { %6406 = vmatpush3.msra.mxu1 %v4286_v54 }
0x1a52   : > { %6408 = vmatmul.mubr.msk.f32.vlgmr.msra.gmra.mxu1 %vm906_vm1, %v7397_v36  ;;  %6421 = vmatprep.subr.mxu1 %v6773_v0 }
0x1a53   : > { %6423 = vmatprep.mubr.msk.f32.mxu1 %vm6774_vm0, %v6773_v0 }
0x1b06   : > { %v4050_v56 = vpop.f32.mrf.mxu1 }
0x1b07   : > { %6381 = vmatmul.mubr.msk.f32.vlgmr.msra.gmra.mxu0 %vm1270_vm2, %v4050_v56  ;;  %v5773_v56 = vld [vmem:[%s7749_s11 + $0x7] ss:$0 sm:$0xff] }
0x1b08   : > { %6389 = vmatpush3.msra.mxu0 %v4206_v55  ;;  %v6377_v58 = vpop.f32.mrf.mxu1  ;;  %6396 = vmatprep.mubr.msk.f32.mxu0 %vm6774_vm0, %v6773_v0 }
0x1b09   : > { %6390 = vmatprep.subr.mxu0 %v6773_v0  ;;  %v5770_v58 = vld [vmem:[%s7789_s6 + $0x7] ss:$0 sm:$0xff] }
0x1b0a   : > { %6391 = vmatpush3.msra.mxu0 %v4205_v57  ;;  %v7505_v60 = vpop.f32.mrf.mxu1 }
0x1b0b   : > { %6392 = vmatprep.subr.mxu0 %v6773_v0 }
0x1b0c   : > { %6393 = vmatpush3.msra.mxu0 %v4204_v59  ;;  %v6387_v62 = vpop.f32.mrf.mxu1 }
0x1b0d   : > { %6394 = vmatprep.subr.mxu0 %v6773_v0 }
0x1b0e   : > { %6395 = vmatpush3.msra.mxu0 %v4203_v61  ;;  %v5776_v61 = vld [vmem:[%s7751_s13 + $0x7] ss:$0 sm:$0xff] }
0x1b0f   : > { %6397 = vmatmul.mubr.msk.f32.vlgmr.msra.gmra.mxu0 %vm906_vm1, %v7397_v36  ;;  %6410 = vmatprep.subr.mxu0 %v6773_v0 }
0x1b10   : > { %6411 = vmatpush3.msra.mxu0 %v4372_v63  ;;  %6418 = vmatprep.mubr.msk.f32.mxu0 %vm6774_vm0, %v6773_v0 }
0x1b11   : > { %6412 = vmatprep.subr.mxu0 %v6773_v0 }
0x1b12   : > { %v4364_v4 = vpop.f32.mrf.mxu1  ;;  %6413 = vmatpush3.msra.mxu0 %v4371_v2 }
0x1b13   : > { %v4365_v5 = vadd.f32 %v5760_v3, %v4364_v4  ;;  %6414 = vmatprep.subr.mxu0 %v6773_v0 }
0x1b14   : > { %v6409_v8 = vpop.f32.mrf.mxu1  ;;  %6415 = vmatpush3.msra.mxu0 %v4370_v1 }
0x1b15   : > { %6416 = vmatprep.subr.mxu0 %v6773_v0  ;;  %6422 = vmatpush3.xpose.msk.msra.mxu1 %vm1270_vm2, %v4365_v5 }
0x1b16   : > { %6417 = vmatpush3.msra.mxu0 %v4369_v6  ;;  %6426 = vmatprep.subr.mxu1 %v6773_v0 }
0x1b17   : > { %6419 = vmatmul.mubr.msk.f32.vlgmr.msra.gmra.mxu0 %vm906_vm1, %v7397_v36  ;;  %6431 = vmatprep.subr.mxu0 %v6773_v0 }
0x1b18   : > { %6433 = vmatprep.mubr.msk.f32.mxu0 %vm6774_vm0, %v6773_v0  ;;  %6432 = vmatpush3.msra.mxu0 %v4614_v28  ;;  %v5791_v28 = vld [vmem:[%s7756_s18 + $0x38] sm:$0xff] }
0x1b19   : > { %6447 = vmatprep.subr.mxu0 %v6773_v0 }
0x1bc7   : > { %v7527_v9 = vpop.f32.mrf.mxu0 }
0x1bc8   : > { %v4199_v52 = vadd.f32 %v7505_v60, %v7527_v9 }
0x1bc9   : > { %v6382_v10 = vpop.f32.mrf.mxu0 }
0x1bcf   : > { %v4281_v12 = vpop.f32.mrf.mxu0 }
0x1bd0   : > { %v4282_v13 = vadd.f32 %v5757_v11, %v4281_v12  ;;  %v5101_v12 = vld [vmem:[#allocation7 + $0x38] sm:$0xff] }
0x1bd1   : > { %v6398_v14 = vpop.f32.mrf.mxu0 }
0x1bd2   : > { %6424 = vmatmul.mubr.msk.f32.vlgmr.msra.gmra.mxu1 %vm1270_vm2, %v4282_v13 }
0x1bd3   : > { %6428 = vmatprep.mubr.msk.f32.mxu1 %vm6774_vm0, %v6773_v0 }
0x1bd7   : > { %v4447_v16 = vpop.f32.mrf.mxu0 }
0x1bd8   : > { %v4448_v17 = vadd.f32 %v5763_v15, %v4447_v16 }
0x1bd9   : > { %v6420_v18 = vpop.f32.mrf.mxu0 }
0x1bda   : > { %6427 = vmatpush3.msra.mxu1 %v4448_v17  ;;  %v5783_v18 = vld [vmem:[%s7753_s15 + $0x1] ss:$0 sm:$0xff] }
0x1bdb   : > { %6436 = vmatprep.subr.mxu1 %v6773_v0 }
0x1c92   : > { %v4523_v19 = vpop.f32.mrf.mxu1 }
0x1c93   : > { %v4527_v20 = vmul.f32 0.35355338, %v4523_v19 }
0x1c94   : > { %v6425_v7 = vpop.f32.mrf.mxu1 }
0x1c95   : > { %v4528_v21 = vadd.f32 %v7480_v37, %v4527_v20 }
0x1c97   : > { %v4529_v22 = vsel %vm1270_vm2, %v4528_v21, -inf }
0x1c98   : > { %4530 = vmax.xlane.f32.xlu0 %v4529_v22 }
0x1d21   : > { %v4531_v23 = vpop.xlane.xlu0 %4530 }
0x1d22   : > { %v4532_v24 = vsub.f32 %v4528_v21, %v4531_v23 }
0x1d24   : > { %v4533_v25 = vmul.f32 1.442695, %v4532_v24 }
0x1d26   : > { %6628 = vpow2.f32 %v4533_v25 }
0x1d33   : > { %v6629_v26 = vpop.eup %6628 }
0x1d34   : > { %v4535_v27 = vsel %vm1270_vm2, %v6629_v26, 0.0 }
0x1d35   : > { %4536 = vadd.xlane.f32.xlu1 %v4535_v27 }
0x1dbe   : > { %v4537_v29 = vpop.xlane.xlu1 %4536 }
0x1dbf   : > { %6630 = vrcp.f32 %v4537_v29  ;;  %v5789_v29 = vld [vmem:[%s7756_s18 + $0x28] sm:$0xff] }
0x1dcc   : > { %v6631_v30 = vpop.eup %6630 }
0x1dcd   : > { %v4539_v31 = vmul.f32 %v6631_v30, %v6629_v26  ;;  %v5788_v30 = vld [vmem:[%s7756_s18 + $0x20] sm:$0xff] }
0x1dcf   : > { %6429 = vmatmul.mubr.msk.f32.vlgmr.msra.gmra.mxu1 %vm1270_vm2, %v4539_v31 }
0x1dd0   : > { %6437 = vmatpush3.msra.mxu1 %v4693_v32  ;;  %6444 = vmatprep.mubr.msk.f32.mxu1 %vm6774_vm0, %v6773_v0 }
0x1dd1   : > { %6438 = vmatprep.subr.mxu1 %v6773_v0 }
0x1dd2   : > { %6439 = vmatpush3.msra.mxu1 %v4692_v33 }
0x1dd3   : > { %6440 = vmatprep.subr.mxu1 %v6773_v0 }
0x1dd4   : > { %6441 = vmatpush3.msra.mxu1 %v4691_v34 }
0x1dd5   : > { %6442 = vmatprep.subr.mxu1 %v6773_v0 }
0x1dd6   : > { %6443 = vmatpush3.msra.mxu1 %v4690_v45  ;;  %v5786_v45 = vld [vmem:[%s7754_s16 + $0x1] ss:$0 sm:$0xff] }
0x1dd7   : > { %6445 = vmatmul.mubr.msk.f32.vlgmr.msra.gmra.mxu1 %vm906_vm1, %v7397_v36  ;;  %6458 = vmatprep.subr.mxu1 %v6773_v0 }
0x1dd8   : > { %6459 = vmatpush3.msra.mxu1 %v4859_v35  ;;  %6466 = vmatprep.mubr.msk.f32.mxu1 %vm6774_vm0, %v6773_v0 }
0x1dd9   : > { %6460 = vmatprep.subr.mxu1 %v6773_v0 }
0x1dda   : > { %6461 = vmatpush3.msra.mxu1 %v4858_v38  ;;  %v5787_v38 = vld [vmem:[%s7755_s17 + $0x1] ss:$0 sm:$0xff] }
0x1ddb   : > { %6462 = vmatprep.subr.mxu1 %v6773_v0 }
0x1ddc   : > { %6463 = vmatpush3.msra.mxu1 %v4857_v39 }
0x1ddd   : > { %6464 = vmatprep.subr.mxu1 %v6773_v0 }
0x1dde   : > { %6465 = vmatpush3.msra.mxu1 %v4856_v40 }
0x1ddf   : > { %6467 = vmatmul.mubr.msk.f32.vlgmr.msra.gmra.mxu1 %vm906_vm1, %v7397_v36  ;;  %6479 = vmatprep.subr.mxu1 %v6773_v0 }
0x1de0   : > { %6481 = vmatprep.mubr.msk.f32.mxu1 %vm6774_vm0, %v6773_v0  ;;  %6480 = vmatpush3.msra.mxu1 %v5101_v12 }
0x1de1   : > { %6495 = vmatprep.subr.mxu1 %v6773_v0 }
0x1e8f   : > { %v4609_v42 = vpop.f32.mrf.mxu1 }
0x1e90   : > { %6434 = vmatmul.mubr.msk.f32.vlgmr.msra.gmra.mxu0 %vm1270_vm2, %v4609_v42  ;;  %v5809_v42 = vld [vmem:[%s7758_s20 + $0xf0] sm:$0xff] }
0x1e91   : > { %6448 = vmatpush3.msra.mxu0 %v4776_v41  ;;  %v6430_v44 = vpop.f32.mrf.mxu1  ;;  %6455 = vmatprep.mubr.msk.f32.mxu0 %vm6774_vm0, %v6773_v0  ;;  %v5810_v41 = vld [vmem:[%s7758_s20 + $0xf8] sm:$0xff] }
0x1e92   : > { %6449 = vmatprep.subr.mxu0 %v6773_v0  ;;  %v5807_v44 = vld [vmem:[%s7758_s20 + $0xe0] sm:$0xff] }
0x1e93   : > { %6450 = vmatpush3.msra.mxu0 %v4775_v43  ;;  %v5808_v43 = vld [vmem:[%s7758_s20 + $0xe8] sm:$0xff] }
0x1e94   : > { %6451 = vmatprep.subr.mxu0 %v6773_v0 }
0x1e95   : > { %6452 = vmatpush3.msra.mxu0 %v4774_v46  ;;  %v5806_v46 = vld [vmem:[%s7758_s20 + $0xd8] sm:$0xff] }
0x1e96   : > { %6453 = vmatprep.subr.mxu0 %v6773_v0 }
0x1e97   : > { %v4768_v48 = vpop.f32.mrf.mxu1  ;;  %6454 = vmatpush3.msra.mxu0 %v4773_v47  ;;  %v5805_v47 = vld [vmem:[%s7758_s20 + $0xd0] sm:$0xff] }
0x1e98   : > { %6456 = vmatmul.mubr.msk.f32.vlgmr.msra.gmra.mxu0 %vm906_vm1, %v7397_v36  ;;  %6469 = vmatprep.subr.mxu0 %v6773_v0  ;;  %v4769_v60 = vadd.f32 %v5770_v58, %v4768_v48  ;;  %v5804_v48 = vld [vmem:[%s7758_s20 + $0xc8] sm:$0xff]  ;;  %v5793_v58 = vld [vmem:[%s7757_s19 + $0x1] ss:$0 sm:$0xff] }
0x1e99   : > { %v6446_v49 = vpop.f32.mrf.mxu1  ;;  %6471 = vmatprep.mubr.msk.f32.mxu0 %vm6774_vm0, %v6773_v0 }
0x1e9a   : > { %v5803_v49 = vld [vmem:[%s7758_s20 + $0xc0] sm:$0xff] }
0x1e9f   : > { %v4934_v50 = vpop.f32.mrf.mxu1 }
0x1ea0   : > { %v4935_v63 = vadd.f32 %v5776_v61, %v4934_v50  ;;  %v5802_v50 = vld [vmem:[%s7758_s20 + $0xb8] sm:$0xff] }
0x1ea1   : > { %v6468_v51 = vpop.f32.mrf.mxu1 }
0x1ea2   : > { %v5801_v51 = vld [vmem:[%s7758_s20 + $0xb0] sm:$0xff] }
0x1f50   : > { %v4684_v53 = vpop.f32.mrf.mxu0 }
0x1f51   : > { %v4688_v54 = vadd.f32 %v4684_v53, %v4199_v52  ;;  %v5800_v52 = vld [vmem:[%s7758_s20 + $0xa8] sm:$0xff]  ;;  %v5799_v53 = vld [vmem:[%s7758_s20 + $0xa0] sm:$0xff] }
0x1f52   : > { %v6435_v55 = vpop.f32.mrf.mxu0 }
0x1f53   : > { %v5797_v55 = vld [vmem:[%s7758_s20 + $0x90] sm:$0xff] }
0x1f58   : > { %v4851_v57 = vpop.f32.mrf.mxu0 }
0x1f59   : > { %v4852_v59 = vadd.f32 %v5773_v56, %v4851_v57  ;;  %v5796_v56 = vld [vmem:[%s7758_s20 + $0x88] sm:$0xff]  ;;  %v5795_v57 = vld [vmem:[%s7758_s20 + $0x80] sm:$0xff] }
0x1f5a   : > { %v6457_v62 = vpop.f32.mrf.mxu0 }
0x1f5b   : > { %6470 = vmatpush3.xpose.msk.msra.mxu0 %vm1270_vm2, %v4852_v59 }
0x1f5c   : > { %6474 = vmatprep.subr.mxu0 %v6773_v0 }
0x1f5e   : > { %6472 = vmatmul.mubr.msk.f32.vlgmr.msra.gmra.mxu0 %vm1270_vm2, %v4769_v60 }
0x1f5f   : > { %6475 = vmatpush3.msra.mxu0 %v4935_v63  ;;  %6476 = vmatprep.mubr.msk.f32.mxu0 %vm6774_vm0, %v6773_v0 }
0x1f60   : > { %6484 = vmatprep.subr.mxu0 %v6773_v0 }
0x201e   : > { %v5010_v2 = vpop.f32.mrf.mxu0 }
0x201f   : > { %v5014_v3 = vmul.f32 0.35355338, %v5010_v2 }
0x2020   : > { %v6473_v1 = vpop.f32.mrf.mxu0 }
0x2021   : > { %v5015_v4 = vadd.f32 %v7480_v37, %v5014_v3 }
0x2023   : > { %v5016_v5 = vsel %vm1270_vm2, %v5015_v4, -inf }
0x2024   : > { %5017 = vmax.xlane.f32.xlu0 %v5016_v5 }
0x20ad   : > { %v5018_v6 = vpop.xlane.xlu0 %5017 }
0x20ae   : > { %v5019_v8 = vsub.f32 %v5015_v4, %v5018_v6 }
0x20b0   : > { %v5020_v9 = vmul.f32 1.442695, %v5019_v8 }
0x20b2   : > { %6632 = vpow2.f32 %v5020_v9  ;;  %v5812_v9 = vld [vmem:[%s7759_s21 + $0x1] ss:$0 sm:$0xff] }
0x20bf   : > { %v6633_v10 = vpop.eup %6632 }
0x20c0   : > { %v5022_v11 = vsel %vm1270_vm2, %v6633_v10, 0.0 }
0x20c1   : > { %5023 = vadd.xlane.f32.xlu1 %v5022_v11 }
0x214a   : > { %v5024_v13 = vpop.xlane.xlu1 %5023 }
0x214b   : > { %6634 = vrcp.f32 %v5024_v13 }
0x2158   : > { %v6635_v14 = vpop.eup %6634 }
0x2159   : > { %v5026_v15 = vmul.f32 %v6635_v14, %v6633_v10 }
0x215b   : > { %6477 = vmatmul.mubr.msk.f32.vlgmr.msra.gmra.mxu0 %vm1270_vm2, %v5026_v15 }
0x215c   : > { %6492 = vmatprep.mubr.msk.f32.mxu0 %vm6774_vm0, %v6773_v0  ;;  %6485 = vmatpush3.msra.mxu0 %v5791_v28  ;;  %v5816_v28 = vld [vmem:[%s7761_s23 + $0x1] ss:$0 sm:$0xff] }
0x215d   : > { %6486 = vmatprep.subr.mxu0 %v6773_v0 }
0x221b   : > { %v5096_v37 = vpop.f32.mrf.mxu0 }
0x221c   : > { %6482 = vmatmul.mubr.msk.f32.vlgmr.msra.gmra.mxu1 %vm1270_vm2, %v5096_v37 }
0x221d   : > { %v6478_v16 = vpop.f32.mrf.mxu0  ;;  %6527 = vmatprep.mubr.msk.f32.mxu1 %vm6774_vm0, %v6773_v0  ;;  %6496 = vmatpush3.msra.mxu1 %v5810_v41 }
0x221e   : > { %6497 = vmatprep.subr.mxu1 %v6773_v0 }
0x221f   : > { %6498 = vmatpush3.msra.mxu1 %v5809_v42 }
0x2220   : > { %6499 = vmatprep.subr.mxu1 %v6773_v0 }
0x2221   : > { %6500 = vmatpush3.msra.mxu1 %v5808_v43 }
0x2222   : > { %6501 = vmatprep.subr.mxu1 %v6773_v0 }
0x2223   : > { %6502 = vmatpush3.msra.mxu1 %v5807_v44 }
0x2224   : > { %6503 = vmatprep.subr.mxu1 %v6773_v0 }
0x2225   : > { %6504 = vmatpush3.msra.mxu1 %v5806_v46 }
0x2226   : > { %6505 = vmatprep.subr.mxu1 %v6773_v0 }
0x2227   : > { %6506 = vmatpush3.msra.mxu1 %v5805_v47 }
0x2228   : > { %6507 = vmatprep.subr.mxu1 %v6773_v0 }
0x2229   : > { %6508 = vmatpush3.msra.mxu1 %v5804_v48 }
0x222a   : > { %6509 = vmatprep.subr.mxu1 %v6773_v0 }
0x222b   : > { %6510 = vmatpush3.msra.mxu1 %v5803_v49 }
0x222c   : > { %6511 = vmatprep.subr.mxu1 %v6773_v0 }
0x222d   : > { %6512 = vmatpush3.msra.mxu1 %v5802_v50 }
0x222e   : > { %6513 = vmatprep.subr.mxu1 %v6773_v0 }
0x222f   : > { %6514 = vmatpush3.msra.mxu1 %v5801_v51 }
0x2230   : > { %6515 = vmatprep.subr.mxu1 %v6773_v0 }
0x2231   : > { %6516 = vmatpush3.msra.mxu1 %v5800_v52 }
0x2232   : > { %6517 = vmatprep.subr.mxu1 %v6773_v0 }
0x2233   : > { %6518 = vmatpush3.msra.mxu1 %v5799_v53 }
0x2234   : > { %6519 = vmatprep.subr.mxu1 %v6773_v0 }
0x22dc   : > { %v5171_v17 = vpop.f32.mrf.mxu1 }
0x22dd   : > { %v5175_v19 = vadd.f32 %v5171_v17, %v4688_v54  ;;  %v5798_v54 = vld [vmem:[%s7758_s20 + $0x98] sm:$0xff] }
0x22de   : > { %v6483_v20 = vpop.f32.mrf.mxu1  ;;  %6520 = vmatpush3.msra.mxu1 %v5798_v54 }
0x22df   : > { %v5184_v7 = vadd.f32 %v5783_v18, %v5175_v19  ;;  %6521 = vmatprep.subr.mxu1 %v6773_v0  ;;  %v5442_v19 = vld [vmem:[%s7762_s24 + $0x18] sm:$0xff]  ;;  %v5441_v20 = vld [vmem:[%s7762_s24 + $0x10] sm:$0xff] }
0x22e0   : > { %6522 = vmatpush3.msra.mxu1 %v5797_v55 }
0x22e1   : > { %v5185_v21 = vadd.f32 %v5184_v7, %v7397_v36  ;;  %v5790_v36 = vld [vmem:[%s7756_s18 + $0x30] sm:$0xff]  ;;  %6523 = vmatprep.subr.mxu1 %v6773_v0  ;;  %v5440_v7 = vld [vmem:[%s7762_s24 + $0x8] sm:$0xff] }
0x22e2   : > { %6487 = vmatpush3.msra.mxu0 %v5790_v36  ;;  %6524 = vmatpush3.msra.mxu1 %v5796_v56 }
0x22e3   : > { %v5190_v22 = vsel %vm906_vm1, %v5185_v21, 0.0  ;;  %6488 = vmatprep.subr.mxu0 %v6773_v0  ;;  %6525 = vmatprep.subr.mxu1 %v6773_v0 }
0x22e4   : > { %5191 = vadd.xlane.f32.xlu0 %v5190_v22  ;;  %6489 = vmatpush3.msra.mxu0 %v5789_v29 }
0x22e5   : > { %6490 = vmatprep.subr.mxu0 %v6773_v0  ;;  %6526 = vmatpush3.msra.mxu1 %v5795_v57 }
0x22e6   : > { %6491 = vmatpush3.msra.mxu0 %v5788_v30 }
0x22e7   : > { %6530 = vmatprep.subr.mxu0 %v6773_v0 }
0x236d   : > { %v5192_v23 = vpop.xlane.xlu0 %5191 }
0x236e   : > { %v5193_v24 = vmul.f32 0.03125, %v5192_v23 }
0x2370   : > { %v5194_v25 = vsub.f32 %v5185_v21, %v5193_v24  ;;  %v5439_v21 = vld [vmem:[%s7762_s24] sm:$0xff] }
0x2372   : > { %v5195_v26 = vmul.f32 %v5194_v25, %v5194_v25 }
0x2374   : > { %v5196_v27 = vsel %vm906_vm1, %v5195_v26, 0.0  ;;  %v5815_v26 = vld [vmem:[%s7760_s22 + $0x1] ss:$0 sm:$0xff] }
0x2375   : > { %5197 = vadd.xlane.f32.xlu1 %v5196_v27 }
0x23fe   : > { %v5198_v31 = vpop.xlane.xlu1 %5197 }
0x23ff   : > { %v5199_v32 = vmul.f32 0.03125, %v5198_v31 }
0x2401   : > { %v5200_v33 = vadd.f32 1e-12, %v5199_v32 }
0x2403   : > { %6636 = vrsqrt.f32 %v5200_v33 }
0x2410   : > { %v6637_v34 = vpop.eup %6636 }
0x2411   : > { %v5202_v35 = vmul.f32 %v6637_v34, %v5194_v25 }
0x2413   : > { %v5209_v39 = vmul.f32 %v5786_v45, %v5202_v35 }
0x2415   : > { %v7628_v40 = vadd.f32 %v5787_v38, %v5209_v39 }
0x2417   : > { %6493 = vmatmul.mubr.msk.f32.vlgmr.msra.gmra.mxu0 %vm906_vm1, %v7628_v40 }
0x2418   : > { %6538 = vmatprep.mubr.msk.f32.mxu0 %vm6774_vm0, %v6773_v0  ;;  %6531 = vmatpush3.msra.mxu0 %v5442_v19 }
0x2419   : > { %6532 = vmatprep.subr.mxu0 %v6773_v0 }
0x241a   : > { %6533 = vmatpush3.msra.mxu0 %v5441_v20 }
0x241b   : > { %6534 = vmatprep.subr.mxu0 %v6773_v0 }
0x241c   : > { %6535 = vmatpush3.msra.mxu0 %v5440_v7 }
0x241d   : > { %6536 = vmatprep.subr.mxu0 %v6773_v0  ;;  %v5817_v0 = vld [vmem:[%s7763_s25] ss:$0 sm:$0xff] }
0x241e   : > { %6537 = vmatpush3.msra.mxu0 %v5439_v21 }
0x24d7   : > { %v5299_v59 = vpop.f32.mrf.mxu0 }
0x24d8   : > { %v5300_v61 = vadd.f32 %v5793_v58, %v5299_v59 }
0x24d9   : > { %v6494_v62 = vpop.f32.mrf.mxu0 }
0x24da   : > { %v5304_v60 = vmul.f32 0.044715, %v5300_v61  ;;  %v5303_v5 = vmul.f32 0.5, %v5300_v61 }
0x24dc   : > { %v5305_v63 = vmul.f32 %v5304_v60, %v5300_v61 }
0x24de   : > { %v5306_v2 = vmul.f32 %v5305_v63, %v5300_v61 }
0x24e0   : > { %v5307_v3 = vadd.f32 %v5306_v2, %v5300_v61 }
0x24e2   : > { %v5308_v1 = vmul.f32 0.7978846, %v5307_v3 }
0x24e4   : > { %6638 = vtanh.f32 %v5308_v1 }
0x24f1   : > { %v6639_v4 = vpop.eup %6638 }
0x24f2   : > { %v5310_v6 = vadd.f32 1.0, %v6639_v4 }
0x24f4   : > { %v5311_v8 = vmul.f32 %v5310_v6, %v5303_v5 }
0x24f6   : > { %6528 = vmatmul.mubr.f32.vlgmr.msra.gmra.mxu1 %v5311_v8 }
0x25b6   : > { %v5403_v10 = vpop.f32.mrf.mxu1 }
0x25b7   : > { %v5404_v11 = vadd.f32 %v5812_v9, %v5403_v10 }
0x25b8   : > { %v6529_v12 = vpop.f32.mrf.mxu1 }
0x25b9   : > { %v5407_v13 = vadd.f32 %v5404_v11, %v7628_v40 }
0x25bb   : > { %v5412_v14 = vsel %vm906_vm1, %v5407_v13, 0.0 }
0x25bc   : > { %5413 = vadd.xlane.f32.xlu0 %v5412_v14 }
0x2645   : > { %v5414_v15 = vpop.xlane.xlu0 %5413 }
0x2646   : > { %v5415_v37 = vmul.f32 0.03125, %v5414_v15 }
0x2648   : > { %v5416_v16 = vsub.f32 %v5407_v13, %v5415_v37 }
0x264a   : > { %v5417_v17 = vmul.f32 %v5416_v16, %v5416_v16 }
0x264c   : > { %v5418_v18 = vsel %vm906_vm1, %v5417_v17, 0.0 }
0x264d   : > { %5419 = vadd.xlane.f32.xlu1 %v5418_v18 }
0x26d6   : > { %v5420_v22 = vpop.xlane.xlu1 %5419 }
0x26d7   : > { %v5421_v23 = vmul.f32 0.03125, %v5420_v22 }
0x26d9   : > { %v5422_v24 = vadd.f32 1e-12, %v5421_v23 }
0x26db   : > { %6640 = vrsqrt.f32 %v5422_v24 }
0x26e8   : > { %v6641_v25 = vpop.eup %6640 }
0x26e9   : > { %v5424_v27 = vmul.f32 %v6641_v25, %v5416_v16 }
0x26eb   : > { %v5431_v36 = vmul.f32 %v5815_v26, %v5424_v27 }
0x26ed   : > { %v5438_v29 = vadd.f32 %v5816_v28, %v5431_v36 }
0x26ef   : > { %6539 = vmatmul.mubr.msk.f32.vlgmr.msra.gmra.mxu0 %vm906_vm1, %v5438_v29 }
0x27af   : > { %v5519_v30 = vpop.f32.mrf.mxu0 }
0x27b0   : > { %v5520_v31 = vadd.f32 %v5817_v0, %v5519_v30 }
0x27b1   : > { %v6540_v32 = vpop.f32.mrf.mxu0 }
0x27b2   : > { %5523 = vst [vmem:[%s893_s8] sm:$0xff] %v5520_v31 }
0x27b3 PF: > { %s39_s27 = sadd.s32 1, %s6765_s27  }
0x27b4   : > { %p36_p2 = scmp.ge.s32.totalorder %s39_s27, 4  }
0x27b6   :  { %38 = sbr.rel (!%p36_p2) target bundleno = 15 (0xf), region = 238 }
0x27bb   :  { %5543 = vsyncpa [#allocation3], 1 }
0x27bc   :  { %5545 = vsyncpa [#allocation3 + $0x1], 1 }
0x27bd   :  { %5546 = vsyncpa [#allocation5], 1 }
0x27be   :  { %5547 = vsyncpa [#allocation8], 1 }

</bundles_post_ra>
